<compile_context>
chip_gen: v5e
topology: v5e:2x2
jax: 0.10.0
libtpu: 0.0.40
codegen_flags: <defaults>
</compile_context>

<pallas_src>
import jax
import jax.numpy as jnp
import numpy as np
from jax.experimental import pallas as pl
from jax.experimental.pallas import tpu as pltpu

NEG_SLOPE = 0.01   # torch.nn.LeakyReLU default negative_slope
RIM = 128          # zero rim (lanes) on each side of the activation scratch


def _leaky(x):
    return jnp.where(x > 0, x, NEG_SLOPE * x)


# ----------------------------------------------------------------------------
# Fused kernel factory.
#   C  : channel count (n_filters)
#   B  : images per grid step (folded into the lane axis)
#   PL : lane-padded per-image spatial size (Hp*Wp rounded up to 128)
# Activations live as (C, B*PL) matrices; image b occupies lanes
# [b*PL, b*PL + Hp*Wp) of the flattened zero-padded (Hp, Wp) grid, so every
# 3x3 tap is a static lane shift that never crosses an image boundary for
# interior output positions.
# ----------------------------------------------------------------------------
def _make_fused_kernel(C, B, PL, Hp, Wp):
    BL = B * PL
    # stride-1 conv taps: lane shift per (kh, kw)
    S1 = [Wp * (kh - 1) + (kw - 1) for kh in range(3) for kw in range(3)]
    # stride-2 conv taps: (parity-plane row block, lane shift) per (kh, kw)
    S2 = [((kh % 2) * 2 + (kw % 2), Wp * (kh // 2 - 1) + (kw // 2 - 1))
          for kh in range(3) for kw in range(3)]

    def kernel(par_ref, w_ref, b_ref, mask_ref, out_ref, scr):
        # Interior mask, broadcast ONCE to the full activation shape.
        mask_b = jnp.broadcast_to(mask_ref[...], (C, BL)) > 0.5

        # Keep the scratch rims zeroed every step (cheap; makes the grid axis
        # safe to split across TensorCores).
        zrim = jnp.zeros((C, RIM), scr.dtype)
        scr[:, 0:RIM] = zrim
        scr[:, RIM + BL:RIM + BL + RIM] = zrim

        def conv(taps, idx):
            # im2col as ONE MXU matmul, K = 9*C (8-aligned; bias NOT folded).
            patches = jnp.concatenate(taps, axis=0)                  # (9C, BL) bf16
            y = jnp.dot(w_ref[idx], patches,
                        preferred_element_type=jnp.float32)          # (C, BL) f32
            y = y + b_ref[idx]                                        # bias: VPU add
            return jnp.where(mask_b, y, 0.0)                          # zero border ring

        def conv_s1(act, idx):
            # act has a zero border ring (leaky(0) = 0 keeps the invariant);
            # store it once into the zero-rimmed scratch and read 9 shifted views.
            scr[:, RIM:RIM + BL] = act.astype(scr.dtype)
            sv = scr[...]
            return conv([sv[:, RIM + s:RIM + s + BL] for s in S1], idx)

        # --- net_downsized[0].pre_conv : Conv2d(C,C,3,stride=2,pad=1,bias) ---
        pv = par_ref[0]                                               # (4C, RIM+BL) bf16
        h = conv([pv[p * C:(p + 1) * C, RIM + s:RIM + s + BL] for (p, s) in S2], 0)
        # --- net_downsized[0].res : x + c3(leaky(c3(leaky(x))))  ('bacdbac') --
        t = conv_s1(_leaky(h), 1)
        h = h + conv_s1(_leaky(t), 2)
        # --- net[0].res : same structure --------------------------------------
        t = conv_s1(_leaky(h), 3)
        h = h + conv_s1(_leaky(t), 4)

        out_ref[0] = h.astype(out_ref.dtype)

    return kernel


# ----------------------------------------------------------------------------
# Module forward (NCHW in, NCHW out, exactly like the PyTorch module)
# ----------------------------------------------------------------------------
def _pack_weight(w_hwio):
    """(3,3,Cin,Cout) -> (Cout, 9*Cin); column order (kh, kw, cin)."""
    cout = w_hwio.shape[3]
    return jnp.transpose(w_hwio, (3, 0, 1, 2)).reshape(cout, -1)


def bottom_up_layer_forward(x_nchw, params, *, batch_per_step=None):
    N, C, H, W = x_nchw.shape
    assert H % 2 == 0 and W % 2 == 0
    Ho, Wo = H // 2, W // 2
    Hp, Wp = Ho + 2, Wo + 2
    P = Hp * Wp
    PL = 128 * int(pl.cdiv(P, 128))        # lane-padded per-image spatial size
    assert Wp + 1 <= RIM                   # tap shifts must fit inside the rim

    # Images per grid step (folded into the matmul lane axis).  Default keeps
    # >= 2 grid steps when N >= 2 (both v7x TensorCores busy) and stays far
    # below the 16 MiB v5e scoped-VMEM default.
    if batch_per_step is None:
        batch_per_step = max(1, min(32, N // 2))
    B = max(1, min(batch_per_step, N))
    n_steps = int(pl.cdiv(N, B))
    Np = n_steps * B
    BL = B * PL

    # --- XLA prep: zero-pad + stride-2 parity split, per-image 128-lane blocks
    xpad = jnp.pad(x_nchw, ((0, 0), (0, 0), (1, 1), (1, 1)))          # (N,C,H+2,W+2)
    planes = []
    for rp in range(2):
        for cp in range(2):
            p = xpad[:, :, rp::2, cp::2]                              # (N,C,Ho+1,Wo+1)
            p = jnp.pad(p, ((0, 0), (0, 0),
                            (0, Hp - (Ho + 1)), (0, Wp - (Wo + 1))))  # (N,C,Hp,Wp)
            planes.append(p.reshape(N, C, P))
    par = jnp.stack(planes, axis=1)                                   # (N,4,C,P)
    par = jnp.pad(par, ((0, Np - N), (0, 0), (0, 0), (0, PL - P)))    # (Np,4,C,PL)
    par = par.reshape(n_steps, B, 4, C, PL).transpose(0, 2, 3, 1, 4)
    par = par.reshape(n_steps, 4 * C, BL)
    par = jnp.pad(par, ((0, 0), (0, 0), (RIM, 0))).astype(jnp.bfloat16)  # left zero rim

    # --- pack the 5 conv weights (bf16, K = 9C) and biases (f32) -------------
    b0, b1 = params['block0'], params['block1']
    w_all = jnp.stack([
        _pack_weight(b0['pre_w']),
        _pack_weight(b0['res']['w1']), _pack_weight(b0['res']['w2']),
        _pack_weight(b1['res']['w1']), _pack_weight(b1['res']['w2']),
    ]).astype(jnp.bfloat16)                                           # (5, C, 9C)
    b_all = jnp.stack([b0['pre_b'],
                       b0['res']['b1'], b0['res']['b2'],
                       b1['res']['b1'], b1['res']['b2']]
                      ).astype(jnp.float32)[:, :, None]               # (5, C, 1)

    # --- interior mask over the per-step lane axis (static host constant) ----
    mi = np.zeros((Hp, Wp), np.float32)
    mi[1:Ho + 1, 1:Wo + 1] = 1.0
    m = np.zeros((B, PL), np.float32)
    m[:, :P] = mi.reshape(-1)[None, :]
    mask = jnp.asarray(m.reshape(1, BL))

    kernel = _make_fused_kernel(C, B, PL, Hp, Wp)
    out = pl.pallas_call(
        kernel,
        out_shape=jax.ShapeDtypeStruct((n_steps, C, BL), jnp.float32),
        grid=(n_steps,),
        in_specs=[
            pl.BlockSpec((1, 4 * C, RIM + BL), lambda s: (s, 0, 0)),   # parity planes
            pl.BlockSpec((5, C, 9 * C), lambda s: (0, 0, 0)),          # packed weights
            pl.BlockSpec((5, C, 1), lambda s: (0, 0, 0)),              # biases
            pl.BlockSpec((1, BL), lambda s: (0, 0)),                   # interior mask
        ],
        out_specs=pl.BlockSpec((1, C, BL), lambda s: (s, 0, 0)),
        scratch_shapes=[pltpu.VMEM((C, RIM + BL + RIM), jnp.bfloat16)],
        compiler_params=pltpu.CompilerParams(dimension_semantics=("parallel",)),
    )(par, w_all, b_all, mask)

    # --- unpack: (n_steps, C, B*PL) -> NCHW interior (N, C, Ho, Wo) ----------
    out = out.reshape(n_steps, C, B, PL).transpose(0, 2, 1, 3).reshape(Np, C, PL)
    out = out[:N, :, :P].reshape(N, C, Hp, Wp)[:, :, 1:Ho + 1, 1:Wo + 1]
    # enable_multiscale=False  =>  return (primary_flow, primary_flow)
    return out, out


# ----------------------------------------------------------------------------
# Deterministic parameter init (shapes follow the module's __init__)
# ----------------------------------------------------------------------------
def _init_conv(key, cin, cout):
    kw, kb = jax.random.split(key)
    fan_in = cin * 9
    w = jax.random.normal(kw, (3, 3, cin, cout), jnp.float32) / jnp.sqrt(fan_in)
    b = 0.1 * jax.random.normal(kb, (cout,), jnp.float32)
    return w, b


def init_params(key, c):
    keys = jax.random.split(key, 5)
    pw, pb = _init_conv(keys[0], c, c)
    r0w1, r0b1 = _init_conv(keys[1], c, c)
    r0w2, r0b2 = _init_conv(keys[2], c, c)
    r1w1, r1b1 = _init_conv(keys[3], c, c)
    r1w2, r1b2 = _init_conv(keys[4], c, c)
    return {
        'block0': {'pre_w': pw, 'pre_b': pb,
                   'res': {'w1': r0w1, 'b1': r0b1, 'w2': r0w2, 'b2': r0b2}},
        'block1': {'res': {'w1': r1w1, 'b1': r1b1, 'w2': r1w2, 'b2': r1b2}},
    }


# ----------------------------------------------------------------------------
# Pure-JAX reference (correctness check only)
# ----------------------------------------------------------------------------
def _conv_ref(x, w_hwio, b, stride):
    y = jax.lax.conv_general_dilated(
        x, w_hwio, (stride, stride), ((1, 1), (1, 1)),
        dimension_numbers=('NCHW', 'HWIO', 'NCHW'),
        precision=jax.lax.Precision.HIGHEST)
    return y + b.reshape(1, -1, 1, 1)


def _res_block_ref(x, p):
    h = _conv_ref(_leaky(x), p['w1'], p['b1'], 1)
    return _conv_ref(_leaky(h), p['w2'], p['b2'], 1) + x


def _forward_ref(x, params):
    h = _conv_ref(x, params['block0']['pre_w'], params['block0']['pre_b'], 2)
    h = _res_block_ref(h, params['block0']['res'])
    h = _res_block_ref(h, params['block1']['res'])
    return h


if __name__ == "__main__":
    key = jax.random.PRNGKey(0)
    k_x, k_p = jax.random.split(key)
    N, C, H, W = 4, 32, 16, 16                 # n_filters = 32; 2 images/step, 2 steps
    x = jax.random.normal(k_x, (N, C, H, W), jnp.float32)
    params = init_params(k_p, C)

    fwd = jax.jit(bottom_up_layer_forward)
    primary, value_for_topdown = fwd(x, params)
    jax.block_until_ready(primary)

    assert primary.shape == (N, C, H // 2, W // 2)
    ref = _forward_ref(x, params)
    # bf16 MXU inputs -> relaxed tolerance (review's correctness note).
    np.testing.assert_allclose(np.asarray(primary), np.asarray(ref),
                               rtol=3e-2, atol=3e-2)
    np.testing.assert_allclose(np.asarray(value_for_topdown), np.asarray(ref),
                               rtol=3e-2, atol=3e-2)
    print("KERNEL_OK")
</pallas_src>

<mosaic_0001>
module attributes {stable_mosaic.version = 11 : i64} {
  func.func @kernel(%arg0: i32, %arg1: memref<1x128x384xbf16, #tpu.memory_space<vmem>>, %arg2: memref<5x32x288xbf16, #tpu.memory_space<vmem>>, %arg3: memref<5x32x1xf32, #tpu.memory_space<vmem>>, %arg4: memref<1x256xf32, #tpu.memory_space<vmem>>, %arg5: memref<1x32x256xf32, #tpu.memory_space<vmem>>, %arg6: memref<32x512xbf16, #tpu.memory_space<vmem>>) attributes {dimension_semantics = [#tpu.dimension_semantics<parallel>], iteration_bounds = array<i64: 2>, scalar_prefetch = 0 : i64, scratch_operands = 1 : i64, tpu.core_type = #tpu.core_type<tc>, window_params = [{transform_indices = @transform_0, window_bounds = array<i64: 1, 128, 384>}, {pipeline_mode = #tpu.pipeline_mode<synchronous>, transform_indices = @transform_1, window_bounds = array<i64: 5, 32, 288>}, {pipeline_mode = #tpu.pipeline_mode<synchronous>, transform_indices = @transform_2, window_bounds = array<i64: 5, 32, 1>}, {pipeline_mode = #tpu.pipeline_mode<synchronous>, transform_indices = @transform_3, window_bounds = array<i64: 1, 256>}, {transform_indices = @transform_4, window_bounds = array<i64: 1, 32, 256>}]} {
    %c0 = arith.constant 0 : index
    %c0_0 = arith.constant 0 : index
    %0 = vector.load %arg4[%c0, %c0_0] : memref<1x256xf32, #tpu.memory_space<vmem>>, vector<1x256xf32>
    %1 = vector.shape_cast %0 : vector<1x256xf32> to vector<1x256xf32>
    %2 = vector.broadcast %1 : vector<1x256xf32> to vector<32x256xf32>
    %cst = arith.constant 5.000000e-01 : f32
    %3 = vector.broadcast %cst : f32 to vector<32x256xf32>
    %4 = arith.cmpf ogt, %2, %3 : vector<32x256xf32>
    %cst_1 = arith.constant 0.000000e+00 : bf16
    %5 = vector.broadcast %cst_1 : bf16 to vector<32x128xbf16>
    %c0_2 = arith.constant 0 : index
    %c0_3 = arith.constant 0 : index
    %6 = vector.load %arg6[%c0_2, %c0_3] : memref<32x512xbf16, #tpu.memory_space<vmem>>, vector<32x128xbf16>
    tpu.vector_store %arg6[%c0_2, %c0_3], %5 {strides = array<i32>} : memref<32x512xbf16, #tpu.memory_space<vmem>>, vector<32x128xbf16>,
    %c0_4 = arith.constant 0 : index
    %c384 = arith.constant 384 : index
    %7 = vector.load %arg6[%c0_4, %c384] : memref<32x512xbf16, #tpu.memory_space<vmem>>, vector<32x128xbf16>
    tpu.vector_store %arg6[%c0_4, %c384], %5 {strides = array<i32>} : memref<32x512xbf16, #tpu.memory_space<vmem>>, vector<32x128xbf16>,
    %c0_5 = arith.constant 0 : index
    %c0_6 = arith.constant 0 : index
    %c0_7 = arith.constant 0 : index
    %8 = vector.load %arg1[%c0_5, %c0_6, %c0_7] : memref<1x128x384xbf16, #tpu.memory_space<vmem>>, vector<1x128x384xbf16>
    %9 = vector.shape_cast %8 : vector<1x128x384xbf16> to vector<128x384xbf16>
    %10 = vector.extract_strided_slice %9 {offsets = [0, 117], sizes = [32, 256], strides = [1, 1]} : vector<128x384xbf16> to vector<32x256xbf16>
    %11 = vector.extract_strided_slice %9 {offsets = [32, 117], sizes = [32, 256], strides = [1, 1]} : vector<128x384xbf16> to vector<32x256xbf16>
    %12 = vector.extract_strided_slice %9 {offsets = [0, 118], sizes = [32, 256], strides = [1, 1]} : vector<128x384xbf16> to vector<32x256xbf16>
    %13 = vector.extract_strided_slice %9 {offsets = [64, 117], sizes = [32, 256], strides = [1, 1]} : vector<128x384xbf16> to vector<32x256xbf16>
    %14 = vector.extract_strided_slice %9 {offsets = [96, 117], sizes = [32, 256], strides = [1, 1]} : vector<128x384xbf16> to vector<32x256xbf16>
    %15 = vector.extract_strided_slice %9 {offsets = [64, 118], sizes = [32, 256], strides = [1, 1]} : vector<128x384xbf16> to vector<32x256xbf16>
    %16 = vector.extract_strided_slice %9 {offsets = [0, 127], sizes = [32, 256], strides = [1, 1]} : vector<128x384xbf16> to vector<32x256xbf16>
    %17 = vector.extract_strided_slice %9 {offsets = [32, 127], sizes = [32, 256], strides = [1, 1]} : vector<128x384xbf16> to vector<32x256xbf16>
    %18 = vector.extract_strided_slice %9 {offsets = [0, 128], sizes = [32, 256], strides = [1, 1]} : vector<128x384xbf16> to vector<32x256xbf16>
    %19 = tpu.concatenate %10, %11, %12, %13, %14, %15, %16, %17, %18 in 0 : vector<32x256xbf16>, vector<32x256xbf16>, vector<32x256xbf16>, vector<32x256xbf16>, vector<32x256xbf16>, vector<32x256xbf16>, vector<32x256xbf16>, vector<32x256xbf16>, vector<32x256xbf16> -> vector<288x256xbf16>
    %c0_8 = arith.constant 0 : index
    %c0_9 = arith.constant 0 : index
    %c0_10 = arith.constant 0 : index
    %20 = vector.load %arg2[%c0_8, %c0_9, %c0_10] : memref<5x32x288xbf16, #tpu.memory_space<vmem>>, vector<1x32x288xbf16>
    %21 = vector.shape_cast %20 : vector<1x32x288xbf16> to vector<32x288xbf16>
    %cst_11 = arith.constant dense<0.000000e+00> : vector<32x256xf32>
    %22 = tpu.matmul %21, %19, %cst_11 {dimension_numbers = #tpu.dot_dimension_numbers<[1], [0], [0], [1], [0, 0, 1, 1], [], []>} : vector<32x288xbf16>, vector<288x256xbf16>, vector<32x256xf32> -> vector<32x256xf32>
    %c0_12 = arith.constant 0 : index
    %c0_13 = arith.constant 0 : index
    %c0_14 = arith.constant 0 : index
    %23 = vector.load %arg3[%c0_12, %c0_13, %c0_14] : memref<5x32x1xf32, #tpu.memory_space<vmem>>, vector<1x32x1xf32>
    %24 = vector.shape_cast %23 : vector<1x32x1xf32> to vector<32x1xf32>
    %25 = vector.broadcast %24 : vector<32x1xf32> to vector<32x256xf32>
    %26 = arith.addf %22, %25 : vector<32x256xf32>
    %cst_15 = arith.constant 0.000000e+00 : f32
    %27 = vector.broadcast %cst_15 : f32 to vector<32x256xf32>
    %28 = arith.select %4, %26, %27 : vector<32x256xi1>, vector<32x256xf32>
    %cst_16 = arith.constant 0.000000e+00 : f32
    %29 = vector.broadcast %cst_16 : f32 to vector<32x256xf32>
    %30 = arith.cmpf ogt, %28, %29 : vector<32x256xf32>
    %cst_17 = arith.constant 0.00999999977 : f32
    %31 = vector.broadcast %cst_17 : f32 to vector<32x256xf32>
    %32 = arith.mulf %31, %28 : vector<32x256xf32>
    %33 = arith.select %30, %28, %32 : vector<32x256xi1>, vector<32x256xf32>
    %34 = arith.truncf %33 : vector<32x256xf32> to vector<32x256xbf16>
    %c0_18 = arith.constant 0 : index
    %c128 = arith.constant 128 : index
    %35 = vector.load %arg6[%c0_18, %c128] : memref<32x512xbf16, #tpu.memory_space<vmem>>, vector<32x256xbf16>
    tpu.vector_store %arg6[%c0_18, %c128], %34 {strides = array<i32>} : memref<32x512xbf16, #tpu.memory_space<vmem>>, vector<32x256xbf16>,
    %c0_19 = arith.constant 0 : index
    %c0_20 = arith.constant 0 : index
    %36 = vector.load %arg6[%c0_19, %c0_20] : memref<32x512xbf16, #tpu.memory_space<vmem>>, vector<32x512xbf16>
    %37 = vector.extract_strided_slice %36 {offsets = [0, 117], sizes = [32, 256], strides = [1, 1]} : vector<32x512xbf16> to vector<32x256xbf16>
    %38 = vector.extract_strided_slice %36 {offsets = [0, 118], sizes = [32, 256], strides = [1, 1]} : vector<32x512xbf16> to vector<32x256xbf16>
    %39 = vector.extract_strided_slice %36 {offsets = [0, 119], sizes = [32, 256], strides = [1, 1]} : vector<32x512xbf16> to vector<32x256xbf16>
    %40 = vector.extract_strided_slice %36 {offsets = [0, 127], sizes = [32, 256], strides = [1, 1]} : vector<32x512xbf16> to vector<32x256xbf16>
    %41 = vector.extract_strided_slice %36 {offsets = [0, 128], sizes = [32, 256], strides = [1, 1]} : vector<32x512xbf16> to vector<32x256xbf16>
    %42 = vector.extract_strided_slice %36 {offsets = [0, 129], sizes = [32, 256], strides = [1, 1]} : vector<32x512xbf16> to vector<32x256xbf16>
    %43 = vector.extract_strided_slice %36 {offsets = [0, 137], sizes = [32, 256], strides = [1, 1]} : vector<32x512xbf16> to vector<32x256xbf16>
    %44 = vector.extract_strided_slice %36 {offsets = [0, 138], sizes = [32, 256], strides = [1, 1]} : vector<32x512xbf16> to vector<32x256xbf16>
    %45 = vector.extract_strided_slice %36 {offsets = [0, 139], sizes = [32, 256], strides = [1, 1]} : vector<32x512xbf16> to vector<32x256xbf16>
    %46 = tpu.concatenate %37, %38, %39, %40, %41, %42, %43, %44, %45 in 0 : vector<32x256xbf16>, vector<32x256xbf16>, vector<32x256xbf16>, vector<32x256xbf16>, vector<32x256xbf16>, vector<32x256xbf16>, vector<32x256xbf16>, vector<32x256xbf16>, vector<32x256xbf16> -> vector<288x256xbf16>
    %c1 = arith.constant 1 : index
    %c0_21 = arith.constant 0 : index
    %c0_22 = arith.constant 0 : index
    %47 = vector.load %arg2[%c1, %c0_21, %c0_22] : memref<5x32x288xbf16, #tpu.memory_space<vmem>>, vector<1x32x288xbf16>
    %48 = vector.shape_cast %47 : vector<1x32x288xbf16> to vector<32x288xbf16>
    %cst_23 = arith.constant dense<0.000000e+00> : vector<32x256xf32>
    %49 = tpu.matmul %48, %46, %cst_23 {dimension_numbers = #tpu.dot_dimension_numbers<[1], [0], [0], [1], [0, 0, 1, 1], [], []>} : vector<32x288xbf16>, vector<288x256xbf16>, vector<32x256xf32> -> vector<32x256xf32>
    %c1_24 = arith.constant 1 : index
    %c0_25 = arith.constant 0 : index
    %c0_26 = arith.constant 0 : index
    %50 = vector.load %arg3[%c1_24, %c0_25, %c0_26] : memref<5x32x1xf32, #tpu.memory_space<vmem>>, vector<1x32x1xf32>
    %51 = vector.shape_cast %50 : vector<1x32x1xf32> to vector<32x1xf32>
    %52 = vector.broadcast %51 : vector<32x1xf32> to vector<32x256xf32>
    %53 = arith.addf %49, %52 : vector<32x256xf32>
    %cst_27 = arith.constant 0.000000e+00 : f32
    %54 = vector.broadcast %cst_27 : f32 to vector<32x256xf32>
    %55 = arith.select %4, %53, %54 : vector<32x256xi1>, vector<32x256xf32>
    %cst_28 = arith.constant 0.000000e+00 : f32
    %56 = vector.broadcast %cst_28 : f32 to vector<32x256xf32>
    %57 = arith.cmpf ogt, %55, %56 : vector<32x256xf32>
    %cst_29 = arith.constant 0.00999999977 : f32
    %58 = vector.broadcast %cst_29 : f32 to vector<32x256xf32>
    %59 = arith.mulf %58, %55 : vector<32x256xf32>
    %60 = arith.select %57, %55, %59 : vector<32x256xi1>, vector<32x256xf32>
    %61 = arith.truncf %60 : vector<32x256xf32> to vector<32x256xbf16>
    %c0_30 = arith.constant 0 : index
    %c128_31 = arith.constant 128 : index
    %62 = vector.load %arg6[%c0_30, %c128_31] : memref<32x512xbf16, #tpu.memory_space<vmem>>, vector<32x256xbf16>
    tpu.vector_store %arg6[%c0_30, %c128_31], %61 {strides = array<i32>} : memref<32x512xbf16, #tpu.memory_space<vmem>>, vector<32x256xbf16>,
    %c0_32 = arith.constant 0 : index
    %c0_33 = arith.constant 0 : index
    %63 = vector.load %arg6[%c0_32, %c0_33] : memref<32x512xbf16, #tpu.memory_space<vmem>>, vector<32x512xbf16>
    %64 = vector.extract_strided_slice %63 {offsets = [0, 117], sizes = [32, 256], strides = [1, 1]} : vector<32x512xbf16> to vector<32x256xbf16>
    %65 = vector.extract_strided_slice %63 {offsets = [0, 118], sizes = [32, 256], strides = [1, 1]} : vector<32x512xbf16> to vector<32x256xbf16>
    %66 = vector.extract_strided_slice %63 {offsets = [0, 119], sizes = [32, 256], strides = [1, 1]} : vector<32x512xbf16> to vector<32x256xbf16>
    %67 = vector.extract_strided_slice %63 {offsets = [0, 127], sizes = [32, 256], strides = [1, 1]} : vector<32x512xbf16> to vector<32x256xbf16>
    %68 = vector.extract_strided_slice %63 {offsets = [0, 128], sizes = [32, 256], strides = [1, 1]} : vector<32x512xbf16> to vector<32x256xbf16>
    %69 = vector.extract_strided_slice %63 {offsets = [0, 129], sizes = [32, 256], strides = [1, 1]} : vector<32x512xbf16> to vector<32x256xbf16>
    %70 = vector.extract_strided_slice %63 {offsets = [0, 137], sizes = [32, 256], strides = [1, 1]} : vector<32x512xbf16> to vector<32x256xbf16>
    %71 = vector.extract_strided_slice %63 {offsets = [0, 138], sizes = [32, 256], strides = [1, 1]} : vector<32x512xbf16> to vector<32x256xbf16>
    %72 = vector.extract_strided_slice %63 {offsets = [0, 139], sizes = [32, 256], strides = [1, 1]} : vector<32x512xbf16> to vector<32x256xbf16>
    %73 = tpu.concatenate %64, %65, %66, %67, %68, %69, %70, %71, %72 in 0 : vector<32x256xbf16>, vector<32x256xbf16>, vector<32x256xbf16>, vector<32x256xbf16>, vector<32x256xbf16>, vector<32x256xbf16>, vector<32x256xbf16>, vector<32x256xbf16>, vector<32x256xbf16> -> vector<288x256xbf16>
    %c2 = arith.constant 2 : index
    %c0_34 = arith.constant 0 : index
    %c0_35 = arith.constant 0 : index
    %74 = vector.load %arg2[%c2, %c0_34, %c0_35] : memref<5x32x288xbf16, #tpu.memory_space<vmem>>, vector<1x32x288xbf16>
    %75 = vector.shape_cast %74 : vector<1x32x288xbf16> to vector<32x288xbf16>
    %cst_36 = arith.constant dense<0.000000e+00> : vector<32x256xf32>
    %76 = tpu.matmul %75, %73, %cst_36 {dimension_numbers = #tpu.dot_dimension_numbers<[1], [0], [0], [1], [0, 0, 1, 1], [], []>} : vector<32x288xbf16>, vector<288x256xbf16>, vector<32x256xf32> -> vector<32x256xf32>
    %c2_37 = arith.constant 2 : index
    %c0_38 = arith.constant 0 : index
    %c0_39 = arith.constant 0 : index
    %77 = vector.load %arg3[%c2_37, %c0_38, %c0_39] : memref<5x32x1xf32, #tpu.memory_space<vmem>>, vector<1x32x1xf32>
    %78 = vector.shape_cast %77 : vector<1x32x1xf32> to vector<32x1xf32>
    %79 = vector.broadcast %78 : vector<32x1xf32> to vector<32x256xf32>
    %80 = arith.addf %76, %79 : vector<32x256xf32>
    %cst_40 = arith.constant 0.000000e+00 : f32
    %81 = vector.broadcast %cst_40 : f32 to vector<32x256xf32>
    %82 = arith.select %4, %80, %81 : vector<32x256xi1>, vector<32x256xf32>
    %83 = arith.addf %28, %82 : vector<32x256xf32>
    %cst_41 = arith.constant 0.000000e+00 : f32
    %84 = vector.broadcast %cst_41 : f32 to vector<32x256xf32>
    %85 = arith.cmpf ogt, %83, %84 : vector<32x256xf32>
    %cst_42 = arith.constant 0.00999999977 : f32
    %86 = vector.broadcast %cst_42 : f32 to vector<32x256xf32>
    %87 = arith.mulf %86, %83 : vector<32x256xf32>
    %88 = arith.select %85, %83, %87 : vector<32x256xi1>, vector<32x256xf32>
    %89 = arith.truncf %88 : vector<32x256xf32> to vector<32x256xbf16>
    %c0_43 = arith.constant 0 : index
    %c128_44 = arith.constant 128 : index
    %90 = vector.load %arg6[%c0_43, %c128_44] : memref<32x512xbf16, #tpu.memory_space<vmem>>, vector<32x256xbf16>
    tpu.vector_store %arg6[%c0_43, %c128_44], %89 {strides = array<i32>} : memref<32x512xbf16, #tpu.memory_space<vmem>>, vector<32x256xbf16>,
    %c0_45 = arith.constant 0 : index
    %c0_46 = arith.constant 0 : index
    %91 = vector.load %arg6[%c0_45, %c0_46] : memref<32x512xbf16, #tpu.memory_space<vmem>>, vector<32x512xbf16>
    %92 = vector.extract_strided_slice %91 {offsets = [0, 117], sizes = [32, 256], strides = [1, 1]} : vector<32x512xbf16> to vector<32x256xbf16>
    %93 = vector.extract_strided_slice %91 {offsets = [0, 118], sizes = [32, 256], strides = [1, 1]} : vector<32x512xbf16> to vector<32x256xbf16>
    %94 = vector.extract_strided_slice %91 {offsets = [0, 119], sizes = [32, 256], strides = [1, 1]} : vector<32x512xbf16> to vector<32x256xbf16>
    %95 = vector.extract_strided_slice %91 {offsets = [0, 127], sizes = [32, 256], strides = [1, 1]} : vector<32x512xbf16> to vector<32x256xbf16>
    %96 = vector.extract_strided_slice %91 {offsets = [0, 128], sizes = [32, 256], strides = [1, 1]} : vector<32x512xbf16> to vector<32x256xbf16>
    %97 = vector.extract_strided_slice %91 {offsets = [0, 129], sizes = [32, 256], strides = [1, 1]} : vector<32x512xbf16> to vector<32x256xbf16>
    %98 = vector.extract_strided_slice %91 {offsets = [0, 137], sizes = [32, 256], strides = [1, 1]} : vector<32x512xbf16> to vector<32x256xbf16>
    %99 = vector.extract_strided_slice %91 {offsets = [0, 138], sizes = [32, 256], strides = [1, 1]} : vector<32x512xbf16> to vector<32x256xbf16>
    %100 = vector.extract_strided_slice %91 {offsets = [0, 139], sizes = [32, 256], strides = [1, 1]} : vector<32x512xbf16> to vector<32x256xbf16>
    %101 = tpu.concatenate %92, %93, %94, %95, %96, %97, %98, %99, %100 in 0 : vector<32x256xbf16>, vector<32x256xbf16>, vector<32x256xbf16>, vector<32x256xbf16>, vector<32x256xbf16>, vector<32x256xbf16>, vector<32x256xbf16>, vector<32x256xbf16>, vector<32x256xbf16> -> vector<288x256xbf16>
    %c3 = arith.constant 3 : index
    %c0_47 = arith.constant 0 : index
    %c0_48 = arith.constant 0 : index
    %102 = vector.load %arg2[%c3, %c0_47, %c0_48] : memref<5x32x288xbf16, #tpu.memory_space<vmem>>, vector<1x32x288xbf16>
    %103 = vector.shape_cast %102 : vector<1x32x288xbf16> to vector<32x288xbf16>
    %cst_49 = arith.constant dense<0.000000e+00> : vector<32x256xf32>
    %104 = tpu.matmul %103, %101, %cst_49 {dimension_numbers = #tpu.dot_dimension_numbers<[1], [0], [0], [1], [0, 0, 1, 1], [], []>} : vector<32x288xbf16>, vector<288x256xbf16>, vector<32x256xf32> -> vector<32x256xf32>
    %c3_50 = arith.constant 3 : index
    %c0_51 = arith.constant 0 : index
    %c0_52 = arith.constant 0 : index
    %105 = vector.load %arg3[%c3_50, %c0_51, %c0_52] : memref<5x32x1xf32, #tpu.memory_space<vmem>>, vector<1x32x1xf32>
    %106 = vector.shape_cast %105 : vector<1x32x1xf32> to vector<32x1xf32>
    %107 = vector.broadcast %106 : vector<32x1xf32> to vector<32x256xf32>
    %108 = arith.addf %104, %107 : vector<32x256xf32>
    %cst_53 = arith.constant 0.000000e+00 : f32
    %109 = vector.broadcast %cst_53 : f32 to vector<32x256xf32>
    %110 = arith.select %4, %108, %109 : vector<32x256xi1>, vector<32x256xf32>
    %cst_54 = arith.constant 0.000000e+00 : f32
    %111 = vector.broadcast %cst_54 : f32 to vector<32x256xf32>
    %112 = arith.cmpf ogt, %110, %111 : vector<32x256xf32>
    %cst_55 = arith.constant 0.00999999977 : f32
    %113 = vector.broadcast %cst_55 : f32 to vector<32x256xf32>
    %114 = arith.mulf %113, %110 : vector<32x256xf32>
    %115 = arith.select %112, %110, %114 : vector<32x256xi1>, vector<32x256xf32>
    %116 = arith.truncf %115 : vector<32x256xf32> to vector<32x256xbf16>
    %c0_56 = arith.constant 0 : index
    %c128_57 = arith.constant 128 : index
    %117 = vector.load %arg6[%c0_56, %c128_57] : memref<32x512xbf16, #tpu.memory_space<vmem>>, vector<32x256xbf16>
    tpu.vector_store %arg6[%c0_56, %c128_57], %116 {strides = array<i32>} : memref<32x512xbf16, #tpu.memory_space<vmem>>, vector<32x256xbf16>,
    %c0_58 = arith.constant 0 : index
    %c0_59 = arith.constant 0 : index
    %118 = vector.load %arg6[%c0_58, %c0_59] : memref<32x512xbf16, #tpu.memory_space<vmem>>, vector<32x512xbf16>
    %119 = vector.extract_strided_slice %118 {offsets = [0, 117], sizes = [32, 256], strides = [1, 1]} : vector<32x512xbf16> to vector<32x256xbf16>
    %120 = vector.extract_strided_slice %118 {offsets = [0, 118], sizes = [32, 256], strides = [1, 1]} : vector<32x512xbf16> to vector<32x256xbf16>
    %121 = vector.extract_strided_slice %118 {offsets = [0, 119], sizes = [32, 256], strides = [1, 1]} : vector<32x512xbf16> to vector<32x256xbf16>
    %122 = vector.extract_strided_slice %118 {offsets = [0, 127], sizes = [32, 256], strides = [1, 1]} : vector<32x512xbf16> to vector<32x256xbf16>
    %123 = vector.extract_strided_slice %118 {offsets = [0, 128], sizes = [32, 256], strides = [1, 1]} : vector<32x512xbf16> to vector<32x256xbf16>
    %124 = vector.extract_strided_slice %118 {offsets = [0, 129], sizes = [32, 256], strides = [1, 1]} : vector<32x512xbf16> to vector<32x256xbf16>
    %125 = vector.extract_strided_slice %118 {offsets = [0, 137], sizes = [32, 256], strides = [1, 1]} : vector<32x512xbf16> to vector<32x256xbf16>
    %126 = vector.extract_strided_slice %118 {offsets = [0, 138], sizes = [32, 256], strides = [1, 1]} : vector<32x512xbf16> to vector<32x256xbf16>
    %127 = vector.extract_strided_slice %118 {offsets = [0, 139], sizes = [32, 256], strides = [1, 1]} : vector<32x512xbf16> to vector<32x256xbf16>
    %128 = tpu.concatenate %119, %120, %121, %122, %123, %124, %125, %126, %127 in 0 : vector<32x256xbf16>, vector<32x256xbf16>, vector<32x256xbf16>, vector<32x256xbf16>, vector<32x256xbf16>, vector<32x256xbf16>, vector<32x256xbf16>, vector<32x256xbf16>, vector<32x256xbf16> -> vector<288x256xbf16>
    %c4 = arith.constant 4 : index
    %c0_60 = arith.constant 0 : index
    %c0_61 = arith.constant 0 : index
    %129 = vector.load %arg2[%c4, %c0_60, %c0_61] : memref<5x32x288xbf16, #tpu.memory_space<vmem>>, vector<1x32x288xbf16>
    %130 = vector.shape_cast %129 : vector<1x32x288xbf16> to vector<32x288xbf16>
    %cst_62 = arith.constant dense<0.000000e+00> : vector<32x256xf32>
    %131 = tpu.matmul %130, %128, %cst_62 {dimension_numbers = #tpu.dot_dimension_numbers<[1], [0], [0], [1], [0, 0, 1, 1], [], []>} : vector<32x288xbf16>, vector<288x256xbf16>, vector<32x256xf32> -> vector<32x256xf32>
    %c4_63 = arith.constant 4 : index
    %c0_64 = arith.constant 0 : index
    %c0_65 = arith.constant 0 : index
    %132 = vector.load %arg3[%c4_63, %c0_64, %c0_65] : memref<5x32x1xf32, #tpu.memory_space<vmem>>, vector<1x32x1xf32>
    %133 = vector.shape_cast %132 : vector<1x32x1xf32> to vector<32x1xf32>
    %134 = vector.broadcast %133 : vector<32x1xf32> to vector<32x256xf32>
    %135 = arith.addf %131, %134 : vector<32x256xf32>
    %cst_66 = arith.constant 0.000000e+00 : f32
    %136 = vector.broadcast %cst_66 : f32 to vector<32x256xf32>
    %137 = arith.select %4, %135, %136 : vector<32x256xi1>, vector<32x256xf32>
    %138 = arith.addf %83, %137 : vector<32x256xf32>
    %c0_67 = arith.constant 0 : index
    %c0_68 = arith.constant 0 : index
    %c0_69 = arith.constant 0 : index
    %139 = vector.load %arg5[%c0_67, %c0_68, %c0_69] : memref<1x32x256xf32, #tpu.memory_space<vmem>>, vector<1x32x256xf32>
    %140 = vector.shape_cast %139 : vector<1x32x256xf32> to vector<32x256xf32>
    %141 = vector.shape_cast %138 : vector<32x256xf32> to vector<1x32x256xf32>
    tpu.vector_store %arg5[%c0_67, %c0_68, %c0_69], %141 {strides = array<i32>} : memref<1x32x256xf32, #tpu.memory_space<vmem>>, vector<1x32x256xf32>,
    return
  }
  func.func @transform_0(%arg0: i32) -> (i32, i32, i32) {
    %c0_i32 = arith.constant 0 : i32
    %c0_i32_0 = arith.constant 0 : i32
    %c0_i32_1 = arith.constant 0 : i32
    return %arg0, %c0_i32, %c0_i32_0 : i32, i32, i32
  }
  func.func @transform_1(%arg0: i32) -> (i32, i32, i32) {
    %c0_i32 = arith.constant 0 : i32
    %c0_i32_0 = arith.constant 0 : i32
    %c0_i32_1 = arith.constant 0 : i32
    %c0_i32_2 = arith.constant 0 : i32
    return %c0_i32, %c0_i32_0, %c0_i32_1 : i32, i32, i32
  }
  func.func @transform_2(%arg0: i32) -> (i32, i32, i32) {
    %c0_i32 = arith.constant 0 : i32
    %c0_i32_0 = arith.constant 0 : i32
    %c0_i32_1 = arith.constant 0 : i32
    %c0_i32_2 = arith.constant 0 : i32
    return %c0_i32, %c0_i32_0, %c0_i32_1 : i32, i32, i32
  }
  func.func @transform_3(%arg0: i32) -> (i32, i32) {
    %c0_i32 = arith.constant 0 : i32
    %c0_i32_0 = arith.constant 0 : i32
    %c0_i32_1 = arith.constant 0 : i32
    return %c0_i32, %c0_i32_0 : i32, i32
  }
  func.func @transform_4(%arg0: i32) -> (i32, i32, i32) {
    %c0_i32 = arith.constant 0 : i32
    %c0_i32_0 = arith.constant 0 : i32
    %c0_i32_1 = arith.constant 0 : i32
    return %arg0, %c0_i32, %c0_i32_0 : i32, i32, i32
  }
}

</mosaic_0001>

<bundles_post_ra>
// kernel: bottom_up_layer_forward.1
= control target key start
LH: loop header
LB: loop body
LE: loop exit
PB: predicated region body
PF: predicated region fallthrough
CT: control target
= control target key end

     0   :  { %s3730_s15 = smov 0   ;;  %s5816_s0 = inlined_call_operand.vmem [shape: bf16[2,128,384], index: 0, kind: input, shape index: {}]   ;;  %s5817_s1 = inlined_call_operand.vmem [shape: bf16[5,32,288], index: 1, kind: input, shape index: {}]   ;;  %s5818_s2 = inlined_call_operand.vmem [shape: f32[5,32,1], index: 2, kind: input, shape index: {}]   ;;  %s5819_s3 = inlined_call_operand.vmem [shape: f32[1,256], index: 3, kind: input, shape index: {}]   ;;  %s5820_s4 = inlined_call_operand.vmem [shape: f32[2,32,256], index: 4, kind: output, shape index: {}]  }
   0x1 LB: > { %s3148_s16 = sadd.s32 4294967295, %s3693_s15   ;;  %p3152_p0 = scmp.ge.s32.totalorder %s3693_s15, 1  ;;  %s3693_s15 = sphi %s3730_s15, %s14_s15  }
   0x2   : > { %p162_p1 = scmp.lt.s32.totalorder %s3693_s15, 3 }
   0x4   : > { %p163_p2 = pnand %p3152_p0, %p162_p1 }
   0x5   : > { %p188_p3 = scmp.lt.s32.totalorder (!%p163_p2), %s3148_s16, 1  ;;  %s3695_s21 = smov (!%p163_p2), 127  }
   0x6   : > { %166 = sbr.rel (%p163_p2) target bundleno = 2726 (0xaa6), region = 36  ;;  %s3696_s22 = smov (!%p163_p2), 117  }
   0x7   : > { %s3697_s23 = smov (!%p163_p2), 118   ;;  %s3698_s24 = smov (!%p163_p2), 11  }
   0x8   : > { %s3700_s11 = smov (!%p163_p2), 126   ;;  %s3701_s12 = smov (!%p163_p2), 107  }
   0x9   : > { %s3702_s13 = smov (!%p163_p2), 108   ;;  %s3703_s14 = smov (!%p163_p2), 116  }
   0xb   : > { %s5826_s16 = smov (!%p188_p3, %s3148_s16), 1  ;;  %vm311_vm0 = vcmask 1039360   ;;  %vm425_vm1 = vcmask 957440   ;;  %vm396_vm2 = vcmask 965632   ;;  %vm598_vm3 = vcmask 89088  }
   0xc   : > { %s3665_s17 = smul.u32 192, %s5826_s16  ;;  %vm671_vm4 = vcmask 261120   ;;  %vm960_vm15 = vcmask 883712  }
   0xe   : > { %s3744_s20 = scalar_lea.vmem %s5816_s0, %s3665_s17  ;;  %s3704_s17 = smov 106  }
   0xf   : > { %v3178_v0 = vld [vmem:[%s3744_s20 + $0x20] sm:$0xf]  ;;  %v3576_v1 = vld [vmem:[%s3744_s20 + $0x28] sm:$0xf0]  ;;  %v3170_v2 = vld [vmem:[%s3744_s20 + $0x18] sm:$0xf] }
  0x10   : > { %v3749_v3 = vor.u32 %v3576_v1, %v3178_v0  ;;  %v3575_v4 = vld [vmem:[%s3744_s20 + $0x20] sm:$0xf0]  ;;  %v3160_v7 = vld [vmem:[%s3744_s20 + $0xc] sm:$0xf0]  ;;  %v3158_v8 = vld [vmem:[%s3744_s20] sm:$0xf] }
  0x11   : > { %v3752_v5 = vor.u32 %v3575_v4, %v3170_v2  ;;  %v3571_v6 = vld [vmem:[%s3744_s20 + $0x4] sm:$0xf]  ;;  %v3572_v9 = vld [vmem:[%s3744_s20 + $0x8] sm:$0xf0]  ;;  %v3574_v11 = vld [vmem:[%s3744_s20 + $0x1c] sm:$0xf] }
  0x12   : > { %309 = vrot.lane.b32.xlu1 %v3749_v3, %s3695_s21  ;;  %v3762_v10 = vor.u32 %v3571_v6, %v3160_v7  ;;  %v3172_v12 = vld [vmem:[%s3744_s20 + $0x24] sm:$0xf0]  ;;  %v3768_v13 = vor.u32 %v3572_v9, %v3158_v8  ;;  %v3573_v15 = vld [vmem:[%s3744_s20 + $0x10] sm:$0xf0]  ;;  %v3580_v18 = vld [vmem:[%s3744_s20 + $0x4c] sm:$0xf] }
  0x13   : > { %305 = vrot.lane.b32.xlu0 %v3752_v5, %s3695_s21  ;;  %v3166_v14 = vld [vmem:[%s3744_s20 + $0x8] sm:$0xf]  ;;  %v3772_v16 = vor.u32 %v3574_v11, %v3172_v12  ;;  %v3196_v19 = vld [vmem:[%s3744_s20 + $0x54] sm:$0xf0]  ;;  %v3202_v21 = vld [vmem:[%s3744_s20 + $0x50] sm:$0xf] }
  0x14   : > { %301 = vrot.lane.b32.xlu2 %v3762_v10, %s3695_s21  ;;  %v3774_v17 = vor.u32 %v3573_v15, %v3166_v14  ;;  %v3199_v20 = vor.u32 %v3580_v18, %v3196_v19  ;;  %v3582_v22 = vld [vmem:[%s3744_s20 + $0x58] sm:$0xf0]  ;;  %v3190_v24 = vld [vmem:[%s3744_s20 + $0x38] sm:$0xf]  ;;  %v3579_v25 = vld [vmem:[%s3744_s20 + $0x40] sm:$0xf0] }
  0x15   : > { %v3792_v23 = vor.u32 %v3582_v22, %v3202_v21  ;;  %v3577_v26 = vld [vmem:[%s3744_s20 + $0x34] sm:$0xf]  ;;  %v3184_v27 = vld [vmem:[%s3744_s20 + $0x3c] sm:$0xf0]  ;;  %v3803_v28 = vor.u32 %v3579_v25, %v3190_v24  ;;  %v3194_v29 = vld [vmem:[%s3744_s20 + $0x48] sm:$0xf] }
  0x16   : > { %v3581_v30 = vld [vmem:[%s3744_s20 + $0x50] sm:$0xf0]  ;;  %v3187_v31 = vor.u32 %v3577_v26, %v3184_v27  ;;  %v3182_v33 = vld [vmem:[%s3744_s20 + $0x30] sm:$0xf]  ;;  %v3578_v34 = vld [vmem:[%s3744_s20 + $0x38] sm:$0xf0] }
  0x17   : > { %v3195_v32 = vor.u32 %v3581_v30, %v3194_v29  ;;  %v3183_v35 = vor.u32 %v3578_v34, %v3182_v33  ;;  %v3226_v36 = vld [vmem:[%s3744_s20 + $0x80] sm:$0xf]  ;;  %v3588_v37 = vld [vmem:[%s3744_s20 + $0x88] sm:$0xf0]  ;;  %v3586_v38 = vld [vmem:[%s3744_s20 + $0x7c] sm:$0xf] }
  0x18   : > { %v3220_v39 = vld [vmem:[%s3744_s20 + $0x84] sm:$0xf0]  ;;  %v3227_v40 = vor.u32 %v3588_v37, %v3226_v36  ;;  %v3218_v41 = vld [vmem:[%s3744_s20 + $0x78] sm:$0xf]  ;;  %v3587_v42 = vld [vmem:[%s3744_s20 + $0x80] sm:$0xf0] }
  0x19   : > { %v3223_v43 = vor.u32 %v3586_v38, %v3220_v39  ;;  %v3219_v44 = vor.u32 %v3587_v42, %v3218_v41  ;;  %v3583_v45 = vld [vmem:[%s3744_s20 + $0x64] sm:$0xf]  ;;  %v3208_v46 = vld [vmem:[%s3744_s20 + $0x6c] sm:$0xf0]  ;;  %v3206_v48 = vld [vmem:[%s3744_s20 + $0x60] sm:$0xf] }
  0x1a   : > { %299 = vrot.lane.b32.xlu1 %v3768_v13, %s3695_s21  ;;  %v3211_v47 = vor.u32 %v3583_v45, %v3208_v46  ;;  %v3584_v49 = vld [vmem:[%s3744_s20 + $0x68] sm:$0xf0]  ;;  %v3214_v50 = vld [vmem:[%s3744_s20 + $0x68] sm:$0xf]  ;;  %v3585_v51 = vld [vmem:[%s3744_s20 + $0x70] sm:$0xf0] }
  0x1b   : > { %307 = vrot.lane.b32.xlu0 %v3772_v16, %s3695_s21  ;;  %v3207_v52 = vor.u32 %v3584_v49, %v3206_v48  ;;  %v3215_v53 = vor.u32 %v3585_v51, %v3214_v50  ;;  %v3244_v45 = vld [vmem:[%s3744_s20 + $0xb4] sm:$0xf0] }
  0x1c   : > { %303 = vrot.lane.b32.xlu2 %v3774_v17, %s3695_s21 }
  0x22   : > { %423 = vrot.lane.b32.xlu1 %v3749_v3, %s3696_s22 }
  0x23   : > { %421 = vrot.lane.b32.xlu0 %v3772_v16, %s3696_s22 }
  0x24   : > { %417 = vrot.lane.b32.xlu2 %v3762_v10, %s3696_s22 }
  0x2a   : > { %409 = vrot.lane.b32.xlu1 %v3199_v20, %s3697_s23 }
  0x2b   : > { %419 = vrot.lane.b32.xlu0 %v3774_v17, %s3696_s22 }
  0x2c   : > { %411 = vrot.lane.b32.xlu2 %v3792_v23, %s3697_s23 }
  0x32   : > { %405 = vrot.lane.b32.xlu1 %v3803_v28, %s3697_s23 }
  0x33   : > { %403 = vrot.lane.b32.xlu0 %v3187_v31, %s3697_s23 }
  0x34   : > { %407 = vrot.lane.b32.xlu2 %v3195_v32, %s3697_s23 }
  0x3a   : > { %394 = vrot.lane.b32.xlu1 %v3749_v3, %s3697_s23 }
  0x3b   : > { %392 = vrot.lane.b32.xlu0 %v3772_v16, %s3697_s23 }
  0x3c   : > { %401 = vrot.lane.b32.xlu2 %v3183_v35, %s3697_s23 }
  0x42   : > { %388 = vrot.lane.b32.xlu1 %v3774_v17, %s3697_s23 }
  0x43   : > { %386 = vrot.lane.b32.xlu0 %v3762_v10, %s3697_s23 }
  0x44   : > { %390 = vrot.lane.b32.xlu2 %v3752_v5, %s3697_s23 }
  0x4a   : > { %378 = vrot.lane.b32.xlu1 %v3227_v40, %s3695_s21 }
  0x4b   : > { %376 = vrot.lane.b32.xlu0 %v3223_v43, %s3695_s21 }
  0x4c   : > { %532 = vrot.lane.b32.xlu2 %v3219_v44, %s3698_s24 }
  0x52   : > { %384 = vrot.lane.b32.xlu1 %v3768_v13, %s3697_s23 }
  0x53   : > { %534 = vrot.lane.b32.xlu0 %v3223_v43, %s3698_s24 }
  0x54   : > { %370 = vrot.lane.b32.xlu2 %v3211_v47, %s3695_s21 }
  0x5a   : > { %526 = vrot.lane.b32.xlu1 %v3207_v52, %s3698_s24 }
  0x5b   : > { %372 = vrot.lane.b32.xlu0 %v3215_v53, %s3695_s21 }
  0x5c   : > { %528 = vrot.lane.b32.xlu2 %v3211_v47, %s3698_s24 }
  0x62   : > { %510 = vrot.lane.b32.xlu1 %v3199_v20, %s3698_s24 }
  0x63   : > { %374 = vrot.lane.b32.xlu0 %v3219_v44, %s3695_s21  ;;  %v3592_v44 = vld [vmem:[%s3744_s20 + $0xac] sm:$0xf] }
  0x64   : > { %504 = vrot.lane.b32.xlu2 %v3187_v31, %s3698_s24  ;;  %v3247_v47 = vor.u32 %v3592_v44, %v3244_v45 }
  0x6a   : > { %502 = vrot.lane.b32.xlu1 %v3183_v35, %s3698_s24 }
  0x6b   : > { %368 = vrot.lane.b32.xlu0 %v3207_v52, %s3695_s21 }
  0x6c   : > { %536 = vrot.lane.b32.xlu2 %v3227_v40, %s3698_s24 }
  0x6e   : > { %v302_v54 = vpop.permute.xlu2 %301 }
  0x72   : > { %498 = vrot.lane.b32.xlu1 %v3772_v16, %s3698_s24 }
  0x73   : > { %508 = vrot.lane.b32.xlu0 %v3195_v32, %s3698_s24 }
  0x76   : > { %v304_v55 = vpop.permute.xlu2 %303 }
  0x77   : > { %v313_v15 = vsel %vm311_vm0, %v302_v54, %v304_v55 }
  0x7b   : > { %496 = vrot.lane.b32.xlu0 %v3752_v5, %s3698_s24 }
  0x7e   : > { %v418_v56 = vpop.permute.xlu2 %417 }
  0x83   : > { %586 = vrot.lane.b32.xlu0 %v418_v56, %s3698_s24 }
  0x84   : > { %v310_v57 = vpop.permute.xlu1 %309 }
  0x85   : > { %v306_v58 = vpop.permute.xlu0 %305 }
  0x86   : > { %v412_v59 = vpop.permute.xlu2 %411 }
  0x8c   : > { %v300_v60 = vpop.permute.xlu1 %299 }
  0x8d   : > { %v308_v61 = vpop.permute.xlu0 %307  ;;  %v312_v2 = vsel %vm311_vm0, %v300_v60, %v302_v54  ;;  %v3242_v54 = vld [vmem:[%s3744_s20 + $0xa8] sm:$0xf] }
  0x8e   : > { %v314_v62 = vsel %vm311_vm0, %v306_v58, %v308_v61  ;;  %v408_v63 = vpop.permute.xlu2 %407  ;;  %v315_v8 = vsel %vm311_vm0, %v308_v61, %v310_v57 }
  0x8f   : > { %520 = vrot.lane.b32.xlu1 %v314_v62, %s3698_s24 }
  0x94   : > { %v3860_v0 = vpop.permute.xlu1 %423 }
  0x95   : > { %v422_v1 = vpop.permute.xlu0 %421 }
  0x96   : > { %592 = vrot.lane.b32.xlu2 %v422_v1, %s3698_s24  ;;  %v427_v4 = vsel %vm425_vm1, %v422_v1, %v3860_v0  ;;  %v402_v5 = vpop.permute.xlu2 %401  ;;  %v3238_v1 = vld [vmem:[%s3744_s20 + $0x98] sm:$0xf] }
  0x97   : > { %514 = vrot.lane.b32.xlu1 %v312_v2, %s3698_s24  ;;  %594 = vrot.lane.b32.xlu0 %v427_v4, %s3698_s24  ;;  %v3591_v2 = vld [vmem:[%s3744_s20 + $0xa0] sm:$0xf0] }
  0x9c   : > { %v410_v6 = vpop.permute.xlu1 %409 }
  0x9d   : > { %v3868_v7 = vpop.permute.xlu0 %419  ;;  %v416_v21 = vsel %vm396_vm2, %v410_v6, %v412_v59 }
  0x9e   : > { %522 = vrot.lane.b32.xlu2 %v315_v8, %s3698_s24  ;;  %v426_v9 = vsel %vm425_vm1, %v418_v56, %v3868_v7  ;;  %v391_v11 = vpop.permute.xlu2 %390  ;;  %v3230_v8 = vld [vmem:[%s3744_s20 + $0x90] sm:$0xf] }
  0x9f   : > { %588 = vrot.lane.b32.xlu1 %v426_v9, %s3698_s24  ;;  %584 = vrot.lane.b32.xlu0 %v412_v59, %s3698_s24  ;;  %v3590_v9 = vld [vmem:[%s3744_s20 + $0x98] sm:$0xf0] }
  0xa4   : > { %v406_v12 = vpop.permute.xlu1 %405 }
  0xa5   : > { %v404_v14 = vpop.permute.xlu0 %403 }
  0xa6   : > { %516 = vrot.lane.b32.xlu2 %v313_v15, %s3698_s24  ;;  %v533_v16 = vpop.permute.xlu2 %532  ;;  %v414_v19 = vsel %vm396_vm2, %v404_v14, %v406_v12  ;;  %v413_v39 = vsel %vm396_vm2, %v402_v5, %v404_v14  ;;  %v3239_v5 = vor.u32 %v3591_v2, %v3238_v1 }
  0xa7   : > { %530 = vrot.lane.b32.xlu1 %v3215_v53, %s3698_s24  ;;  %492 = vrot.lane.b32.xlu0 %v3762_v10, %s3698_s24  ;;  %v415_v10 = vsel %vm396_vm2, %v408_v63, %v410_v6  ;;  %v3589_v53 = vld [vmem:[%s3744_s20 + $0x94] sm:$0xf] }
  0xac   : > { %v395_v18 = vpop.permute.xlu1 %394 }
  0xad   : > { %v393_v20 = vpop.permute.xlu0 %392 }
  0xae   : > { %582 = vrot.lane.b32.xlu2 %v416_v21, %s3698_s24  ;;  %v371_v22 = vpop.permute.xlu2 %370  ;;  %v400_v33 = vsel %vm396_vm2, %v393_v20, %v395_v18  ;;  %v399_v34 = vsel %vm396_vm2, %v391_v11, %v393_v20 }
  0xaf   : > { %576 = vrot.lane.b32.xlu1 %v414_v19, %s3698_s24  ;;  %524 = vrot.lane.b32.xlu0 %v310_v57, %s3698_s24 }
  0xb4   : > { %v389_v24 = vpop.permute.xlu1 %388 }
  0xb5   : > { %v387_v25 = vpop.permute.xlu0 %386 }
  0xb6   : > { %490 = vrot.lane.b32.xlu2 %v3768_v13, %s3698_s24  ;;  %v3891_v26 = vpop.permute.xlu2 %528  ;;  %v398_v29 = vsel %vm396_vm2, %v387_v25, %v389_v24 }
  0xb7   : > { %572 = vrot.lane.b32.xlu0 %v395_v18, %s3698_s24  ;;  %580 = vrot.lane.b32.xlu1 %v415_v10, %s3698_s24 }
  0xbc   : > { %v379_v27 = vpop.permute.xlu1 %378 }
  0xbd   : > { %v377_v30 = vpop.permute.xlu0 %376 }
  0xbe   : > { %578 = vrot.lane.b32.xlu2 %v406_v12, %s3698_s24  ;;  %v3897_v31 = vpop.permute.xlu2 %504  ;;  %v383_v41 = vsel %vm311_vm0, %v377_v30, %v379_v27 }
  0xbf   : > { %564 = vrot.lane.b32.xlu0 %v398_v29, %s3698_s24  ;;  %518 = vrot.lane.b32.xlu1 %v304_v55, %s3698_s24  ;;  %v3593_v55 = vld [vmem:[%s3744_s20 + $0xb0] sm:$0xf0] }
  0xc0   : > { %v3243_v57 = vor.u32 %v3593_v55, %v3242_v54  ;;  %v438_v55 = vld [vmem:[%s5818_s2 + $0x10] sm:$0xff] }
  0xc4   : > { %v385_v13 = vpop.permute.xlu1 %384 }
  0xc5   : > { %v535_v32 = vpop.permute.xlu0 %534  ;;  %v397_v43 = vsel %vm396_vm2, %v385_v13, %v387_v25 }
  0xc6   : > { %570 = vrot.lane.b32.xlu2 %v400_v33, %s3698_s24  ;;  %v613_v35 = vsel %vm598_vm3, %v533_v16, %v535_v32  ;;  %v537_v36 = vpop.permute.xlu2 %536 }
  0xc7   : > { %566 = vrot.lane.b32.xlu1 %v389_v24, %s3698_s24  ;;  %568 = vrot.lane.b32.xlu0 %v399_v34, %s3698_s24  ;;  %v614_v37 = vsel %vm598_vm3, %v535_v32, %v537_v36  ;;  %v3262_v34 = vld [vmem:[%s5817_s1 + $0x8] sm:$0xf] }
  0xc8   : > { %678 = vmatpush.bf16.msra.mxu0 %v613_v35  ;;  %735 = vmatpush.bf16.msra.mxu3 %v614_v37  ;;  %v3597_v35 = vld [vmem:[%s5817_s1 + $0x10] sm:$0xf0] }
  0xc9   : > { %v3988_v37 = vor.u32 %v3597_v35, %v3262_v34 }
  0xcc   : > { %v527_v38 = vpop.permute.xlu1 %526 }
  0xcd   : > { %v611_v40 = vsel %vm598_vm3, %v527_v38, %v3891_v26  ;;  %v373_v42 = vpop.permute.xlu0 %372 }
  0xce   : > { %574 = vrot.lane.b32.xlu2 %v413_v39, %s3698_s24  ;;  %679 = vmatpush.bf16.msra.mxu0 %v611_v40  ;;  %v381_v51 = vsel %vm311_vm0, %v371_v22, %v373_v42 }
  0xcf   : > { %558 = vrot.lane.b32.xlu1 %v383_v41, %s3698_s24  ;;  %506 = vrot.lane.b32.xlu0 %v3803_v28, %s3698_s24  ;;  %v3594_v28 = vld [vmem:[%s3744_s20 + $0xb8] sm:$0xf0]  ;;  %v3254_v41 = vld [vmem:[%s5817_s1] sm:$0xf] }
  0xd4   : > { %v3927_v50 = vpop.permute.xlu1 %510 }
  0xd5   : > { %v375_v46 = vpop.permute.xlu0 %374 }
  0xd6   : > { %512 = vrot.lane.b32.xlu2 %v3792_v23, %s3698_s24  ;;  %v3250_v23 = vld [vmem:[%s3744_s20 + $0xb0] sm:$0xf]  ;;  %v382_v59 = vsel %vm311_vm0, %v375_v46, %v377_v30 }
  0xd7   : > { %562 = vrot.lane.b32.xlu1 %v397_v43, %s3698_s24  ;;  %554 = vrot.lane.b32.xlu0 %v373_v42, %s3698_s24  ;;  %v3251_v49 = vor.u32 %v3594_v28, %v3250_v23  ;;  %v3596_v42 = vld [vmem:[%s5817_s1 + $0x8] sm:$0xf0] }
  0xd8   : > { %v4000_v44 = vor.u32 %v3596_v42, %v3254_v41 }
  0xdc   : > { %v503_v60 = vpop.permute.xlu1 %502 }
  0xdd   : > { %v369_v48 = vpop.permute.xlu0 %368  ;;  %v603_v24 = vsel %vm598_vm3, %v503_v60, %v3897_v31 }
  0xde   : > { %560 = vrot.lane.b32.xlu2 %v379_v27, %s3698_s24  ;;  %v380_v52 = vsel %vm311_vm0, %v369_v48, %v371_v22  ;;  %v3274_v48 = vld [vmem:[%s5817_s1 + $0x20] sm:$0xf] }
  0xdf   : > { %500 = vrot.lane.b32.xlu1 %v3749_v3, %s3698_s24  ;;  %546 = vrot.lane.b32.xlu0 %v3247_v47, %s3698_s24  ;;  %v3232_v3 = vld [vmem:[%s3744_s20 + $0x9c] sm:$0xf0] }
  0xe0   : > { %v3235_v56 = vor.u32 %v3589_v53, %v3232_v3 }
  0xe4   : > { %v3948_v63 = vpop.permute.xlu1 %498 }
  0xe5   : > { %v509_v58 = vpop.permute.xlu0 %508 }
  0xe6   : > { %552 = vrot.lane.b32.xlu2 %v381_v51, %s3698_s24  ;;  %v605_v19 = vsel %vm598_vm3, %v509_v58, %v3927_v50  ;;  %v3266_v58 = vld [vmem:[%s5817_s1 + $0x18] sm:$0xf] }
  0xe7   : > { %548 = vrot.lane.b32.xlu1 %v3251_v49, %s3698_s24  ;;  %550 = vrot.lane.b32.xlu0 %v380_v52, %s3698_s24  ;;  %v3600_v49 = vld [vmem:[%s5817_s1 + $0x28] sm:$0xf0] }
  0xe8   : > { %v4012_v52 = vor.u32 %v3600_v49, %v3274_v48 }
  0xed   : > { %v497_v62 = vpop.permute.xlu0 %496 }
  0xee   : > { %556 = vrot.lane.b32.xlu2 %v382_v59, %s3698_s24  ;;  %v601_v27 = vsel %vm598_vm3, %v497_v62, %v3948_v63  ;;  %v3599_v59 = vld [vmem:[%s5817_s1 + $0x20] sm:$0xf0] }
  0xef   : > { %540 = vrot.lane.b32.xlu1 %v3235_v56, %s3698_s24  ;;  %544 = vrot.lane.b32.xlu0 %v3243_v57, %s3698_s24  ;;  %v3699_v56 = vmov 0  }
  0xf0   : > { %v593_v61 = vpop.permute.xlu2 %592  ;;  %3684 = vset.pattern.permute.xlu1 %v3699_v56  ;;  %207 = vst [vmem:[#allocation2] sm:$0xf] %v3699_v56  ;;  %3686 = vset.pattern.permute.xlu0 %v3699_v56 }
  0xf1   : > { %208 = vst [vmem:[#allocation2 + $0x10] sm:$0xf] %v3699_v56  ;;  %3685 = vset.pattern.permute.xlu2 %v3699_v56 }
  0xf2   : > { %209 = vst [vmem:[#allocation2 + $0x20] sm:$0xf] %v3699_v56 }
  0xf3   : > { %210 = vst [vmem:[#allocation2 + $0x30] sm:$0xf] %v3699_v56 }
  0xf4   : > { %211 = vst [vmem:[#allocation2 + $0xc] sm:$0xf] %v3699_v56 }
  0xf5   : > { %v587_v6 = vpop.permute.xlu0 %586  ;;  %212 = vst [vmem:[#allocation2 + $0x1c] sm:$0xf] %v3699_v56 }
  0xf6   : > { %494 = vrot.lane.b32.xlu2 %v3774_v17, %s3698_s24  ;;  %213 = vst [vmem:[#allocation2 + $0x2c] sm:$0xf] %v3699_v56 }
  0xf7   : > { %596 = vrot.lane.b32.xlu1 %v3860_v0, %s3698_s24  ;;  %590 = vrot.lane.b32.xlu0 %v3868_v7, %s3698_s24  ;;  %v3231_v0 = vor.u32 %v3590_v9, %v3230_v8  ;;  %214 = vst [vmem:[#allocation2 + $0x3c] sm:$0xf] %v3699_v56 }
  0xf8   : > { %v523_v4 = vpop.permute.xlu2 %522 }
  0xfb   : > { %v3602_v49 = vld [vmem:[#allocation2 + $0xc] sm:$0xf] }
  0xfe   : > { %542 = vrot.lane.b32.xlu2 %v3239_v5, %s3698_s24  ;;  %v436_v5 = vld [vmem:[%s5818_s2] sm:$0xff] }
  0xff   : > { %452 = vperm.xlu1 %3684, %v438_v55   ;;  %442 = vperm.xlu0 %3686, %v436_v5   ;;  %v3308_v55 = vld [vmem:[#allocation2 + $0x38] sm:$0xf0] }
 0x100   : > { %v3955_v11 = vpop.permute.xlu2 %516 }
 0x101   : > { %v521_v17 = vpop.permute.xlu1 %520 }
 0x102   : > { %v609_v12 = vsel %vm598_vm3, %v521_v17, %v523_v4 }
 0x103   : > { %680 = vmatpush.bf16.msra.mxu0 %v609_v12 }
 0x106   : > { %538 = vrot.lane.b32.xlu2 %v3231_v0, %s3698_s24 }
 0x108   : > { %v583_v7 = vpop.permute.xlu2 %582 }
 0x109   : > { %v515_v14 = vpop.permute.xlu1 %514  ;;  %v3959_v15 = vpop.permute.xlu0 %594 }
 0x10a   : > { %v607_v16 = vsel %vm598_vm3, %v515_v14, %v3955_v11  ;;  %v633_v18 = vsel %vm598_vm3, %v593_v61, %v3959_v15  ;;  %v3267_v61 = vor.u32 %v3599_v59, %v3266_v58 }
 0x10b   : > { %681 = vmatpush.bf16.msra.mxu0 %v607_v16  ;;  %722 = vmatpush.bf16.msra.mxu2 %v633_v18 }
 0x10f   : > { %682 = vmatpush.bf16.msra.mxu0 %v605_v19 }
 0x110   : > { %v491_v20 = vpop.permute.xlu2 %490 }
 0x111   : > { %v3967_v21 = vpop.permute.xlu1 %588  ;;  %v585_v22 = vpop.permute.xlu0 %584 }
 0x112   : > { %v631_v25 = vsel %vm598_vm3, %v587_v6, %v3967_v21  ;;  %v630_v10 = vsel %vm598_vm3, %v583_v7, %v585_v22 }
 0x113   : > { %683 = vmatpush.bf16.msra.mxu0 %v603_v24  ;;  %723 = vmatpush.bf16.msra.mxu2 %v631_v25 }
 0x116   : > { %3276 = vmatmul.msk.bf16.vlgmr.msra.gmra.mxu2 %vm671_vm4, %v3988_v37 }
 0x117   : > { %754 = vmatpush.bf16.msrb.mxu2 %v630_v10  ;;  %684 = vmatpush.bf16.msra.mxu0 %v601_v27 }
 0x118   : > { %v579_v29 = vpop.permute.xlu2 %578 }
 0x119   : > { %v531_v30 = vpop.permute.xlu1 %530  ;;  %v3976_v13 = vpop.permute.xlu0 %492 }
 0x11a   : > { %v612_v32 = vsel %vm598_vm3, %v3891_v26, %v531_v30  ;;  %v599_v33 = vsel %vm598_vm3, %v491_v20, %v3976_v13 }
 0x11b   : > { %736 = vmatpush.bf16.msra.mxu3 %v612_v32  ;;  %685 = vmatpush.bf16.msra.mxu0 %v599_v33 }
 0x11e   : > { %686 = vmatmul.bf16.vlgmr.msra.gmra.mxu0 %v4000_v44 }
 0x120   : > { %v571_v36 = vpop.permute.xlu2 %570 }
 0x121   : > { %v577_v38 = vpop.permute.xlu1 %576  ;;  %v525_v39 = vpop.permute.xlu0 %524 }
 0x122   : > { %v610_v26 = vsel %vm598_vm3, %v523_v4, %v525_v39  ;;  %v628_v40 = vsel %vm598_vm3, %v577_v38, %v579_v29  ;;  %v437_v4 = vld [vmem:[%s5818_s2 + $0x8] sm:$0xff] }
 0x123   : > { %737 = vmatpush.bf16.msra.mxu3 %v610_v26  ;;  %755 = vmatpush.bf16.msrb.mxu2 %v628_v40 }
 0x124   : > { %447 = vperm.xlu1 %3684, %v437_v4  }
 0x126   : > { %3277 = vmatmul.msk.bf16.gmra.mxu2 %vm671_vm4, %v4012_v52 }
 0x128   : > { %v575_v43 = vpop.permute.xlu2 %574 }
 0x129   : > { %v573_v45 = vpop.permute.xlu0 %572  ;;  %v581_v46 = vpop.permute.xlu1 %580  ;;  %v627_v28 = vsel %vm598_vm3, %v575_v43, %v577_v38  ;;  %v439_v38 = vld [vmem:[%s5818_s2 + $0x18] sm:$0xff] }
 0x12a   : > { %v629_v47 = vsel %vm598_vm3, %v581_v46, %v583_v7  ;;  %v626_v23 = vsel %vm598_vm3, %v571_v36, %v573_v45  ;;  %457 = vperm.xlu2 %3685, %v439_v38   ;;  %v3268_v45 = vld [vmem:[%s5817_s1 + $0x24] sm:$0xf0] }
 0x12b   : > { %697 = vmatpush.bf16.msra.mxu1 %v629_v47  ;;  %756 = vmatpush.bf16.msrb.mxu2 %v626_v23  ;;  %v3294_v47 = vld [vmem:[#allocation2 + $0x20] sm:$0xf] }
 0x12e   : > { %691 = vmatmul.bf16.gmra.mxu0 %v3267_v61 }
 0x12f   : > { %698 = vmatpush.bf16.msra.mxu1 %v627_v28  ;;  %v3607_v28 = vld [vmem:[#allocation2 + $0x2c] sm:$0xf0] }
 0x130   : > { %v513_v51 = vpop.permute.xlu2 %512  ;;  %v3295_v48 = vor.u32 %v3607_v28, %v3294_v47 }
 0x131   : > { %v565_v53 = vpop.permute.xlu0 %564  ;;  %v519_v3 = vpop.permute.xlu1 %518  ;;  %v606_v57 = vsel %vm598_vm3, %v3927_v50, %v513_v51  ;;  %v3304_v51 = vld [vmem:[#allocation2 + $0x18] sm:$0xf0] }
 0x132   : > { %v608_v54 = vsel %vm598_vm3, %v3955_v11, %v519_v3  ;;  %872 = vrot.lane.b32.xlu0 %v3295_v48, %s3695_s21 }
 0x133   : > { %738 = vmatpush.bf16.msra.mxu3 %v608_v54  ;;  %v3606_v54 = vld [vmem:[#allocation2 + $0x2c] sm:$0xf] }
 0x134   : > { %v3311_v56 = vor.u32 %v3606_v54, %v3308_v55 }
 0x137   : > { %739 = vmatpush.bf16.msra.mxu3 %v606_v57 }
 0x138   : > { %v561_v60 = vpop.permute.xlu2 %560 }
 0x139   : > { %v567_v62 = vpop.permute.xlu1 %566  ;;  %v569_v1 = vpop.permute.xlu0 %568 }
 0x13a   : > { %v625_v2 = vsel %vm598_vm3, %v569_v1, %v571_v36  ;;  %v624_v50 = vsel %vm598_vm3, %v565_v53, %v567_v62 }
 0x13b   : > { %699 = vmatpush.bf16.msra.mxu1 %v625_v2  ;;  %757 = vmatpush.bf16.msrb.mxu2 %v624_v50  ;;  %v199_v2 = vld [vmem:[%s5819_s3] sm:$0x3] }
 0x13c   : > { %v201_v5 = vperm.slane %v199_v2, 0 }
 0x13e   : > { %vm4097_vm5 = vcmp.gt.f32.partialorder %v201_v5, 0.5 }
 0x140   : > { %v553_v6 = vpop.permute.xlu2 %552 }
 0x141   : > { %v559_v8 = vpop.permute.xlu1 %558  ;;  %v507_v9 = vpop.permute.xlu0 %506 }
 0x142   : > { %v604_v11 = vsel %vm598_vm3, %v3897_v31, %v507_v9  ;;  %v622_v17 = vsel %vm598_vm3, %v559_v8, %v561_v60 }
 0x143   : > { %740 = vmatpush.bf16.msra.mxu3 %v604_v11  ;;  %758 = vmatpush.bf16.msrb.mxu2 %v622_v17 }
 0x148   : > { %v557_v12 = vpop.permute.xlu2 %556 }
 0x149   : > { %v563_v0 = vpop.permute.xlu1 %562  ;;  %v555_v7 = vpop.permute.xlu0 %554  ;;  %v621_v18 = vsel %vm598_vm3, %v557_v12, %v559_v8 }
 0x14a   : > { %v623_v14 = vsel %vm598_vm3, %v563_v0, %v565_v53  ;;  %v620_v16 = vsel %vm598_vm3, %v553_v6, %v555_v7 }
 0x14b   : > { %700 = vmatpush.bf16.msra.mxu1 %v623_v14  ;;  %759 = vmatpush.bf16.msrb.mxu2 %v620_v16  ;;  %v202_v14 = vperm.slane %v199_v2, 1 }
 0x14d   : > { %vm4105_vm6 = vcmp.gt.f32.partialorder %v202_v14, 0.5 }
 0x14f   : > { %701 = vmatpush.bf16.msra.mxu1 %v621_v18 }
 0x150   : > { %v495_v19 = vpop.permute.xlu2 %494 }
 0x151   : > { %v501_v20 = vpop.permute.xlu1 %500  ;;  %v547_v22 = vpop.permute.xlu0 %546  ;;  %v600_v24 = vsel %vm598_vm3, %v3976_v13, %v495_v19  ;;  %v3256_v13 = vld [vmem:[%s5817_s1 + $0xc] sm:$0xf0] }
 0x152   : > { %v602_v31 = vsel %vm598_vm3, %v3948_v63, %v501_v20  ;;  %v3595_v63 = vld [vmem:[%s5817_s1 + $0x4] sm:$0xf] }
 0x153   : > { %741 = vmatpush.bf16.msra.mxu3 %v602_v31  ;;  %v3259_v36 = vor.u32 %v3595_v63, %v3256_v13 }
 0x157   : > { %742 = vmatpush.bf16.msra.mxu3 %v600_v24 }
 0x158   : > { %v543_v25 = vpop.permute.xlu2 %542 }
 0x159   : > { %v549_v10 = vpop.permute.xlu1 %548  ;;  %v551_v27 = vpop.permute.xlu0 %550 }
 0x15a   : > { %743 = vmatmul.bf16.vlgmr.msra.gmra.mxu3 %v4000_v44  ;;  %v619_v29 = vsel %vm598_vm3, %v551_v27, %v553_v6  ;;  %v618_v30 = vsel %vm598_vm3, %v547_v22, %v549_v10  ;;  %v3598_v44 = vld [vmem:[%s5817_s1 + $0x1c] sm:$0xf] }
 0x15b   : > { %702 = vmatpush.bf16.msra.mxu1 %v619_v29  ;;  %760 = vmatpush.bf16.msrb.mxu2 %v618_v30  ;;  %v3271_v46 = vor.u32 %v3598_v44, %v3268_v45 }
 0x160   : > { %v539_v39 = vpop.permute.xlu2 %538 }
 0x161   : > { %v541_v32 = vpop.permute.xlu1 %540  ;;  %v545_v33 = vpop.permute.xlu0 %544 }
 0x162   : > { %v617_v34 = vsel %vm598_vm3, %v545_v33, %v547_v22  ;;  %v616_v35 = vsel %vm598_vm3, %v541_v32, %v543_v25  ;;  %v615_v26 = vsel %vm598_vm3, %v539_v39, %v541_v32 }
 0x163   : > { %703 = vmatpush.bf16.msra.mxu1 %v617_v34  ;;  %761 = vmatpush.bf16.msrb.mxu2 %v616_v35 }
 0x166   : > { %762 = vmatmul.bf16.vlgmr.msrb.gmra.mxu2 %v3259_v36 }
 0x167   : > { %704 = vmatpush.bf16.msra.mxu1 %v615_v26 }
 0x169   : > { %v597_v40 = vpop.permute.xlu1 %596  ;;  %v591_v42 = vpop.permute.xlu0 %590 }
 0x16a   : > { %705 = vmatmul.bf16.vlgmr.msra.gmra.mxu1 %v3259_v36  ;;  %748 = vmatmul.bf16.gmra.mxu3 %v3267_v61  ;;  %v634_v41 = vsel %vm598_vm3, %v3959_v15, %v597_v40  ;;  %v632_v43 = vsel %vm598_vm3, %v3967_v21, %v591_v42  ;;  %v3282_v15 = vld [vmem:[#allocation2] sm:$0xf]  ;;  %v3603_v21 = vld [vmem:[#allocation2 + $0xc] sm:$0xf0] }
 0x16b   : > { %779 = vmatpush.bf16.msrb.mxu0 %v634_v41  ;;  %v3283_v23 = vor.u32 %v3603_v21, %v3282_v15 }
 0x16d   : > { %866 = vrot.lane.b32.xlu2 %v3283_v23, %s3695_s21  ;;  %899 = vrot.lane.b32.xlu1 %v3283_v23, %s3697_s23 }
 0x16e   : > { %882 = vrot.lane.b32.xlu0 %v3283_v23, %s3700_s11 }
 0x16f   : > { %780 = vmatpush.bf16.msrb.mxu0 %v632_v43 }
 0x171   : > { %v453_v60 = vpop.permute.xlu1 %452  ;;  %v443_v1 = vpop.permute.xlu0 %442 }
 0x172   : > { %3278 = vmatmul.msk.bf16.vlgmr.msrb.gmra.mxu0 %vm671_vm4, %v3988_v37 }
 0x175   : > { %905 = vrot.lane.b32.xlu2 %v3295_v48, %s3697_s23  ;;  %975 = vrot.lane.b32.xlu1 %v3311_v56, %s3701_s12 }
 0x176   : > { %767 = vmatmul.bf16.gmra.mxu2 %v3271_v46  ;;  %888 = vrot.lane.b32.xlu0 %v3295_v48, %s3700_s11 }
 0x17a   : > { %710 = vmatmul.bf16.gmra.mxu1 %v3271_v46 }
 0x17e   : > { %941 = vrot.lane.b32.xlu0 %v3311_v56, %s3703_s14 }
 0x182   : > { %3279 = vmatmul.msk.bf16.gmra.mxu0 %vm671_vm4, %v4012_v52  ;;  %v3307_v52 = vor.u32 %v3602_v49, %v3304_v51 }
 0x184   : > { %969 = vrot.lane.b32.xlu2 %v3307_v52, %s3701_s12  ;;  %952 = vrot.lane.b32.xlu1 %v3307_v52, %s3702_s13  ;;  %v458_v15 = vpop.permute.xlu2 %457 }
 0x186   : > { %986 = vrot.lane.b32.xlu0 %v3307_v52, %s3704_s17 }
 0x18c   : > { %958 = vrot.lane.b32.xlu2 %v3311_v56, %s3702_s13  ;;  %1063 = vrot.lane.b32.xlu1 %v3283_v23, %s3698_s24 }
 0x18e   : > { %1069 = vrot.lane.b32.xlu0 %v3295_v48, %s3698_s24 }
 0x194   : > { %935 = vrot.lane.b32.xlu2 %v3307_v52, %s3703_s14 }
 0x196   : > { %v448_v12 = vpop.permute.xlu1 %447 }
 0x199   : > { %v725_v37 = vpop.f32.mrf.mxu2 }
 0x19b   : > { %v687_v53 = vpop.f32.mrf.mxu0 }
 0x19c   : > { %992 = vrot.lane.b32.xlu2 %v3311_v56, %s3704_s17  ;;  %v688_v50 = vadd.f32 %v687_v53, %v443_v1 }
 0x1a1   : > { %v727_v3 = vpop.f32.mrf.mxu2 }
 0x1a3   : > { %v689_v57 = vpop.f32.mrf.mxu0 }
 0x1a4   : > { %v690_v18 = vadd.f32 %v689_v57, %v448_v12 }
 0x1a9   : > { %v730_v58 = vpop.f32.mrf.mxu2 }
 0x1ab   : > { %v692_v59 = vpop.f32.mrf.mxu0 }
 0x1ac   : > { %v693_v35 = vadd.f32 %v692_v59, %v453_v60 }
 0x1b1   : > { %v4089_v62 = vpop.f32.mrf.mxu2 }
 0x1b3   : > { %v694_v4 = vpop.f32.mrf.mxu0 }
 0x1dd   : > { %v744_v61 = vpop.f32.mrf.mxu3 }
 0x1de   : > { %v745_v8 = vadd.f32 %v744_v61, %v443_v1 }
 0x1e5   : > { %v746_v0 = vpop.f32.mrf.mxu3 }
 0x1e6   : > { %v747_v13 = vadd.f32 %v746_v0, %v448_v12 }
 0x1e7   : > { %v706_v6 = vpop.f32.mrf.mxu1 }
 0x1e8   : > { %v707_v9 = vadd.f32 %v706_v6, %v688_v50 }
 0x1e9   : > { %v763_v11 = vpop.f32.mrf.mxu2 }
 0x1ea   : > { %v726_v17 = vadd.f32 %v725_v37, %v707_v9  ;;  %v764_v16 = vadd.f32 %v763_v11, %v745_v8  ;;  %v695_v37 = vadd.f32 %v694_v4, %v458_v15 }
 0x1ec   : > { %v4103_v19 = vsel %vm4097_vm5, %v726_v17, 0.0 }
 0x1ed   : > { %v808_v10 = vmul.f32 0.01, %v4103_v19  ;;  %vm800_vm7 = vcmp.gt.f32.partialorder %v4103_v19, 0.0  ;;  %v749_v32 = vpop.f32.mrf.mxu3 }
 0x1ee   : > { %v750_v47 = vadd.f32 %v749_v32, %v453_v60 }
 0x1ef   : > { %v708_v20 = vpop.f32.mrf.mxu1  ;;  %v782_v31 = vpop.f32.mrf.mxu0  ;;  %v816_v33 = vsel %vm800_vm7, %v4103_v19, %v808_v10  ;;  %vm894_vm7 = vcmask 1031168  }
 0x1f0   : > { %v709_v24 = vadd.f32 %v708_v20, %v690_v18  ;;  %v783_v25 = vadd.f32 %v782_v31, %v764_v16 }
 0x1f1   : > { %v765_v27 = vpop.f32.mrf.mxu2 }
 0x1f2   : > { %v728_v29 = vadd.f32 %v727_v3, %v709_v24  ;;  %v4113_v30 = vsel %vm4105_vm6, %v783_v25, 0.0  ;;  %v766_v39 = vadd.f32 %v765_v27, %v747_v13 }
 0x1f3   : > { %vm801_vm8 = vcmp.gt.f32.partialorder %v4113_v30, 0.0  ;;  %v809_v63 = vmul.f32 0.01, %v4113_v30 }
 0x1f4   : > { %v4121_v36 = vsel %vm4097_vm5, %v728_v29, 0.0  ;;  %v4182_v29 = vpop.permute.xlu2 %866 }
 0x1f5   : > { %v817_v34 = vsel %vm801_vm8, %v4113_v30, %v809_v63  ;;  %v810_v43 = vmul.f32 0.01, %v4121_v36  ;;  %vm802_vm9 = vcmp.gt.f32.partialorder %v4121_v36, 0.0  ;;  %v751_v48 = vpop.f32.mrf.mxu3  ;;  %vm977_vm8 = vcmask 875520  }
 0x1f6   : > { %v824_v38 = vpack.c.bf16 %v817_v34, %v816_v33  ;;  %v752_v56 = vadd.f32 %v751_v48, %v458_v15 }
 0x1f7   : > { %v711_v26 = vpop.f32.mrf.mxu1  ;;  %v784_v40 = vpop.f32.mrf.mxu0  ;;  %v818_v23 = vsel %vm802_vm9, %v4121_v36, %v810_v43  ;;  %vm943_vm9 = vcmask 949248  }
 0x1f8   : > { %828 = vst [vmem:[#allocation2 + $0x4] sm:$0xff] %v824_v38  ;;  %v712_v41 = vadd.f32 %v711_v26, %v693_v35  ;;  %v785_v42 = vadd.f32 %v784_v40, %v766_v39  ;;  %v4202_v35 = vpop.permute.xlu0 %872 }
 0x1f9   : > { %v768_v44 = vpop.f32.mrf.mxu2 }
 0x1fa   : > { %v731_v45 = vadd.f32 %v730_v58, %v712_v41  ;;  %v4127_v46 = vsel %vm4105_vm6, %v785_v42, 0.0  ;;  %v769_v52 = vadd.f32 %v768_v44, %v750_v47  ;;  %v900_v41 = vpop.permute.xlu1 %899 }
 0x1fb   : > { %vm803_vm10 = vcmp.gt.f32.partialorder %v4127_v46, 0.0  ;;  %v811_v21 = vmul.f32 0.01, %v4127_v46 }
 0x1fc   : > { %v4135_v49 = vsel %vm4097_vm5, %v731_v45, 0.0  ;;  %v4190_v63 = vpop.permute.xlu2 %905 }
 0x1fd   : > { %v819_v28 = vsel %vm803_vm10, %v4127_v46, %v811_v21  ;;  %v812_v57 = vmul.f32 0.01, %v4135_v49  ;;  %vm804_vm11 = vcmp.gt.f32.partialorder %v4135_v49, 0.0  ;;  %vm994_vm10 = vcmask 867328  }
 0x1fe   : > { %v825_v51 = vpack.c.bf16 %v819_v28, %v818_v23 }
 0x1ff   : > { %v713_v53 = vpop.f32.mrf.mxu1  ;;  %v787_v3 = vpop.f32.mrf.mxu0  ;;  %v820_v2 = vsel %vm804_vm11, %v4135_v49, %v812_v57  ;;  %v3601_v4 = vld [vmem:[#allocation2 + $0x4] sm:$0xf] }
 0x200   : > { %829 = vst [vmem:[#allocation2 + $0x14] sm:$0xff] %v825_v51  ;;  %v714_v54 = vadd.f32 %v713_v53, %v695_v37  ;;  %v788_v55 = vadd.f32 %v787_v3, %v769_v52  ;;  %v4213_v39 = vpop.permute.xlu0 %882 }
 0x201   : > { %v770_v58 = vpop.f32.mrf.mxu2 }
 0x202   : > { %v733_v59 = vadd.f32 %v4089_v62, %v714_v54  ;;  %v4142_v60 = vsel %vm4105_vm6, %v788_v55, 0.0  ;;  %v771_v1 = vadd.f32 %v770_v58, %v752_v56  ;;  %v3290_v62 = vld [vmem:[#allocation2 + $0x8] sm:$0xf]  ;;  %v4232_v44 = vpop.permute.xlu1 %975 }
 0x203   : > { %vm805_vm12 = vcmp.gt.f32.partialorder %v4142_v60, 0.0  ;;  %v813_v61 = vmul.f32 0.01, %v4142_v60 }
 0x204   : > { %v4150_v5 = vsel %vm4097_vm5, %v733_v59, 0.0  ;;  %v4200_v34 = vpop.permute.xlu2 %969 }
 0x205   : > { %v821_v50 = vsel %vm805_vm12, %v4142_v60, %v813_v61  ;;  %v814_v14 = vmul.f32 0.01, %v4150_v5  ;;  %vm806_vm13 = vcmp.gt.f32.partialorder %v4150_v5, 0.0 }
 0x206   : > { %v826_v6 = vpack.c.bf16 %v821_v50, %v820_v2 }
 0x207   : > { %v3604_v8 = vld [vmem:[#allocation2 + $0x14] sm:$0xf0]  ;;  %v789_v9 = vpop.f32.mrf.mxu0  ;;  %v3284_v11 = vld [vmem:[#allocation2 + $0x10] sm:$0xf0]  ;;  %v822_v20 = vsel %vm806_vm13, %v4150_v5, %v814_v14 }
 0x208   : > { %830 = vst [vmem:[#allocation2 + $0x24] sm:$0xff] %v826_v6  ;;  %v790_v17 = vadd.f32 %v789_v9, %v771_v1  ;;  %v4152_v12 = vor.u32 %v3604_v8, %v3290_v62  ;;  %v3287_v0 = vor.u32 %v3601_v4, %v3284_v11  ;;  %v4222_v40 = vpop.permute.xlu0 %888 }
 0x20a   : > { %v4158_v16 = vsel %vm4105_vm6, %v790_v17, 0.0  ;;  %967 = vrot.lane.b32.xlu0 %v4152_v12, %s3701_s12  ;;  %870 = vrot.lane.b32.xlu2 %v4152_v12, %s3695_s21  ;;  %v4241_v21 = vpop.permute.xlu1 %952 }
 0x20b   : > { %vm807_vm14 = vcmp.gt.f32.partialorder %v4158_v16, 0.0  ;;  %v815_v18 = vmul.f32 0.01, %v4158_v16  ;;  %868 = vrot.lane.b32.xlu1 %v3287_v0, %s3695_s21 }
 0x20c   : > { %v4208_v38 = vpop.permute.xlu2 %958 }
 0x20d   : > { %v823_v31 = vsel %vm807_vm14, %v4158_v16, %v815_v18 }
 0x20e   : > { %v827_v24 = vpack.c.bf16 %v823_v31, %v822_v20 }
 0x20f   : > { %v3605_v10 = vld [vmem:[#allocation2 + $0x24] sm:$0xf]  ;;  %v3302_v32 = vld [vmem:[#allocation2 + $0x28] sm:$0xf] }
 0x210   : > { %831 = vst [vmem:[#allocation2 + $0x34] sm:$0xff] %v827_v24  ;;  %v4230_v43 = vpop.permute.xlu0 %941 }
 0x212   : > { %903 = vrot.lane.b32.xlu0 %v4152_v12, %s3697_s23  ;;  %886 = vrot.lane.b32.xlu2 %v4152_v12, %s3700_s11  ;;  %v4248_v28 = vpop.permute.xlu1 %1063 }
 0x213   : > { %884 = vrot.lane.b32.xlu1 %v3287_v0, %s3700_s11 }
 0x214   : > { %v4217_v26 = vpop.permute.xlu2 %935 }
 0x217   : > { %v3296_v25 = vld [vmem:[#allocation2 + $0x30] sm:$0xf0]  ;;  %v3608_v13 = vld [vmem:[#allocation2 + $0x34] sm:$0xf0] }
 0x218   : > { %v3299_v27 = vor.u32 %v3605_v10, %v3296_v25  ;;  %v4193_v33 = vor.u32 %v3608_v13, %v3302_v32  ;;  %v4239_v15 = vpop.permute.xlu0 %986 }
 0x21a   : > { %948 = vrot.lane.b32.xlu0 %v3287_v0, %s3702_s13  ;;  %965 = vrot.lane.b32.xlu2 %v3287_v0, %s3701_s12 }
 0x21b   : > { %950 = vrot.lane.b32.xlu1 %v4152_v12, %s3702_s13 }
 0x21c   : > { %v4226_v42 = vpop.permute.xlu2 %992 }
 0x220   : > { %v4246_v23 = vpop.permute.xlu0 %1069 }
 0x222   : > { %917 = vrot.lane.b32.xlu0 %v4152_v12, %s3696_s22  ;;  %901 = vrot.lane.b32.xlu2 %v3287_v0, %s3697_s23 }
 0x223   : > { %931 = vrot.lane.b32.xlu1 %v3287_v0, %s3703_s14 }
 0x22a   : > { %933 = vrot.lane.b32.xlu2 %v4152_v12, %s3703_s14  ;;  %971 = vrot.lane.b32.xlu0 %v3299_v27, %s3701_s12 }
 0x22b   : > { %982 = vrot.lane.b32.xlu1 %v3287_v0, %s3704_s17 }
 0x232   : > { %915 = vrot.lane.b32.xlu2 %v3287_v0, %s3696_s22  ;;  %907 = vrot.lane.b32.xlu0 %v3299_v27, %s3697_s23 }
 0x233   : > { %874 = vrot.lane.b32.xlu1 %v3299_v27, %s3695_s21 }
 0x23a   : > { %984 = vrot.lane.b32.xlu2 %v4152_v12, %s3704_s17  ;;  %939 = vrot.lane.b32.xlu0 %v4193_v33, %s3703_s14 }
 0x23b   : > { %890 = vrot.lane.b32.xlu1 %v3299_v27, %s3700_s11 }
 0x242   : > { %1065 = vrot.lane.b32.xlu2 %v3287_v0, %s3698_s24  ;;  %919 = vrot.lane.b32.xlu0 %v3299_v27, %s3696_s22 }
 0x243   : > { %973 = vrot.lane.b32.xlu1 %v4193_v33, %s3701_s12 }
 0x24a   : > { %876 = vrot.lane.b32.xlu2 %v4193_v33, %s3695_s21  ;;  %988 = vrot.lane.b32.xlu0 %v3299_v27, %s3704_s17 }
 0x24b   : > { %909 = vrot.lane.b32.xlu1 %v4193_v33, %s3697_s23 }
 0x252   : > { %892 = vrot.lane.b32.xlu2 %v4193_v33, %s3700_s11 }
 0x253   : > { %954 = vrot.lane.b32.xlu1 %v3299_v27, %s3702_s13 }
 0x25a   : > { %956 = vrot.lane.b32.xlu2 %v4193_v33, %s3702_s13 }
 0x25b   : > { %921 = vrot.lane.b32.xlu1 %v4193_v33, %s3696_s22 }
 0x262   : > { %937 = vrot.lane.b32.xlu2 %v3299_v27, %s3703_s14 }
 0x263   : > { %990 = vrot.lane.b32.xlu1 %v4193_v33, %s3704_s17 }
 0x264   : > { %v4237_v45 = vpop.permute.xlu2 %870 }
 0x26b   : > { %1071 = vrot.lane.b32.xlu1 %v3299_v27, %s3698_s24 }
 0x26c   : > { %v4244_v47 = vpop.permute.xlu2 %886 }
 0x274   : > { %v966_v48 = vpop.permute.xlu2 %965 }
 0x275   : > { %1147 = vrot.lane.b32.xlu2 %v966_v48, %s3698_s24 }
 0x27c   : > { %v4251_v37 = vpop.permute.xlu0 %967  ;;  %v902_v51 = vpop.permute.xlu2 %901 }
 0x27d   : > { %v869_v52 = vpop.permute.xlu1 %868  ;;  %v911_v50 = vsel %vm396_vm2, %v900_v41, %v902_v51  ;;  %v978_v6 = vsel %vm977_vm8, %v966_v48, %v4251_v37 }
 0x27e   : > { %v878_v9 = vsel %vm311_vm0, %v4182_v29, %v869_v52  ;;  %v879_v10 = vsel %vm311_vm0, %v869_v52, %v4237_v45 }
 0x284   : > { %v904_v53 = vpop.permute.xlu0 %903  ;;  %v4253_v3 = vpop.permute.xlu2 %933 }
 0x285   : > { %v885_v54 = vpop.permute.xlu1 %884  ;;  %v912_v0 = vsel %vm396_vm2, %v902_v51, %v904_v53 }
 0x286   : > { %v896_v1 = vsel %vm894_vm7, %v885_v54, %v4244_v47  ;;  %v895_v20 = vsel %vm894_vm7, %v4213_v39, %v885_v54 }
 0x28c   : > { %v949_v55 = vpop.permute.xlu0 %948  ;;  %v916_v56 = vpop.permute.xlu2 %915 }
 0x28d   : > { %v4255_v57 = vpop.permute.xlu1 %950  ;;  %1135 = vrot.lane.b32.xlu0 %v949_v55, %s3698_s24  ;;  %1111 = vrot.lane.b32.xlu2 %v916_v56, %s3698_s24 }
 0x28e   : > { %v961_v58 = vsel %vm960_vm15, %v949_v55, %v4255_v57  ;;  %v979_v55 = vsel %vm977_vm8, %v4251_v37, %v4200_v34 }
 0x28f   : > { %1137 = vrot.lane.b32.xlu1 %v961_v58, %s3698_s24 }
 0x294   : > { %v4262_v59 = vpop.permute.xlu2 %984  ;;  %v4283_v11 = vpop.permute.xlu0 %917 }
 0x295   : > { %v932_v61 = vpop.permute.xlu1 %931  ;;  %1103 = vrot.lane.b32.xlu2 %v904_v53, %s3698_s24  ;;  %v923_v32 = vsel %vm425_vm1, %v916_v56, %v4283_v11 }
 0x296   : > { %1123 = vrot.lane.b32.xlu0 %v932_v61, %s3698_s24  ;;  %v944_v62 = vsel %vm943_vm9, %v932_v61, %v4253_v3 }
 0x297   : > { %1089 = vrot.lane.b32.xlu1 %v896_v1, %s3698_s24 }
 0x29c   : > { %v4269_v2 = vpop.permute.xlu2 %1065  ;;  %v972_v31 = vpop.permute.xlu0 %971 }
 0x29d   : > { %v4272_v4 = vpop.permute.xlu1 %982  ;;  %1099 = vrot.lane.b32.xlu2 %v911_v50, %s3698_s24  ;;  %v945_v50 = vsel %vm943_vm9, %v4253_v3, %v4217_v26 }
 0x29e   : > { %1149 = vrot.lane.b32.xlu0 %v978_v6, %s3698_s24 }
 0x29f   : > { %1125 = vrot.lane.b32.xlu1 %v944_v62, %s3698_s24 }
 0x2a4   : > { %v877_v8 = vpop.permute.xlu2 %876  ;;  %v908_v27 = vpop.permute.xlu0 %907 }
 0x2a5   : > { %v875_v17 = vpop.permute.xlu1 %874  ;;  %1075 = vrot.lane.b32.xlu2 %v878_v9, %s3698_s24  ;;  %v913_v54 = vsel %vm396_vm2, %v4190_v63, %v908_v27 }
 0x2a6   : > { %1101 = vrot.lane.b32.xlu0 %v912_v0, %s3698_s24  ;;  %v881_v56 = vsel %vm311_vm0, %v875_v17, %v877_v8  ;;  %v880_v26 = vsel %vm311_vm0, %v4202_v35, %v875_v17 }
 0x2ac   : > { %v893_v14 = vpop.permute.xlu2 %892  ;;  %v940_v39 = vpop.permute.xlu0 %939 }
 0x2ad   : > { %v891_v18 = vpop.permute.xlu1 %890 }
 0x2ae   : > { %1087 = vrot.lane.b32.xlu0 %v895_v20, %s3698_s24  ;;  %v898_v52 = vsel %vm894_vm7, %v891_v18, %v893_v14  ;;  %v897_v37 = vsel %vm894_vm7, %v4222_v40, %v891_v18 }
 0x2b4   : > { %v957_v24 = vpop.permute.xlu2 %956  ;;  %v920_v51 = vpop.permute.xlu0 %919 }
 0x2b5   : > { %v4291_v25 = vpop.permute.xlu1 %973  ;;  %v964_v40 = vsel %vm960_vm15, %v957_v24, %v4208_v38  ;;  %v947_v38 = vsel %vm943_vm9, %v940_v39, %v4230_v43  ;;  %v995_v43 = vsel %vm994_vm10, %v4272_v4, %v4262_v59 }
 0x2b6   : > { %1077 = vrot.lane.b32.xlu0 %v879_v10, %s3698_s24  ;;  %v980_v53 = vsel %vm977_vm8, %v972_v31, %v4291_v25  ;;  %v981_v9 = vsel %vm977_vm8, %v4291_v25, %v4232_v44  ;;  %v3323_v44 = vld [vmem:[%s5818_s2 + $0x38] sm:$0xff]  ;;  %v3322_v10 = vld [vmem:[%s5818_s2 + $0x30] sm:$0xff] }
 0x2bc   : > { %v938_v29 = vpop.permute.xlu2 %937  ;;  %v989_v62 = vpop.permute.xlu0 %988 }
 0x2bd   : > { %v910_v13 = vpop.permute.xlu1 %909  ;;  %1129 = vrot.lane.b32.xlu2 %v938_v29, %s3698_s24  ;;  %v946_v61 = vsel %vm943_vm9, %v938_v29, %v940_v39 }
 0x2be   : > { %1113 = vrot.lane.b32.xlu0 %v923_v32, %s3698_s24  ;;  %v914_v63 = vsel %vm396_vm2, %v908_v27, %v910_v13  ;;  %v3321_v32 = vld [vmem:[%s5818_s2 + $0x28] sm:$0xff] }
 0x2c5   : > { %v955_v41 = vpop.permute.xlu1 %954 }
 0x2c6   : > { %1141 = vrot.lane.b32.xlu1 %v955_v41, %s3698_s24  ;;  %1153 = vrot.lane.b32.xlu0 %v972_v31, %s3698_s24  ;;  %v963_v48 = vsel %vm960_vm15, %v955_v41, %v957_v24 }
 0x2c7   : > { %1143 = vrot.lane.b32.xlu2 %v963_v48, %s3698_s24 }
 0x2cd   : > { %v922_v58 = vpop.permute.xlu1 %921 }
 0x2ce   : > { %1117 = vrot.lane.b32.xlu1 %v920_v51, %s3698_s24  ;;  %1109 = vrot.lane.b32.xlu0 %v910_v13, %s3698_s24  ;;  %v924_v1 = vsel %vm425_vm1, %v920_v51, %v922_v58 }
 0x2cf   : > { %1095 = vrot.lane.b32.xlu2 %v898_v52, %s3698_s24  ;;  %v4328_v34 = vpop.permute.xlu2 %1147 }
 0x2d5   : > { %v991_v3 = vpop.permute.xlu1 %990 }
 0x2d6   : > { %1155 = vrot.lane.b32.xlu1 %v980_v53, %s3698_s24  ;;  %1105 = vrot.lane.b32.xlu0 %v913_v54, %s3698_s24  ;;  %v998_v35 = vsel %vm994_vm10, %v991_v3, %v4226_v42  ;;  %v997_v18 = vsel %vm994_vm10, %v989_v62, %v991_v3 }
 0x2d7   : > { %1085 = vrot.lane.b32.xlu2 %v877_v8, %s3698_s24  ;;  %v962_v8 = vsel %vm960_vm15, %v4255_v57, %v4241_v21 }
 0x2dd   : > { %v4384_v17 = vpop.permute.xlu1 %1071 }
 0x2de   : > { %1151 = vrot.lane.b32.xlu0 %v979_v55, %s3698_s24  ;;  %1097 = vrot.lane.b32.xlu1 %v893_v14, %s3698_s24 }
 0x2df   : > { %1083 = vrot.lane.b32.xlu2 %v881_v56, %s3698_s24 }
 0x2e6   : > { %1107 = vrot.lane.b32.xlu1 %v914_v63, %s3698_s24  ;;  %1131 = vrot.lane.b32.xlu0 %v946_v61, %s3698_s24 }
 0x2e7   : > { %1119 = vrot.lane.b32.xlu2 %v924_v1, %s3698_s24  ;;  %v4339_v6 = vpop.permute.xlu2 %1111 }
 0x2ee   : > { %1093 = vrot.lane.b32.xlu1 %v897_v37, %s3698_s24  ;;  %1091 = vrot.lane.b32.xlu0 %v4244_v47, %s3698_s24 }
 0x2ef   : > { %1127 = vrot.lane.b32.xlu2 %v945_v50, %s3698_s24  ;;  %v4349_v47 = vpop.permute.xlu2 %1103 }
 0x2f6   : > { %1139 = vrot.lane.b32.xlu1 %v962_v8, %s3698_s24  ;;  %1165 = vrot.lane.b32.xlu0 %v989_v62, %s3698_s24 }
 0x2f7   : > { %1145 = vrot.lane.b32.xlu2 %v964_v40, %s3698_s24  ;;  %v4365_v57 = vpop.permute.xlu2 %1099 }
 0x2fe   : > { %1081 = vrot.lane.b32.xlu1 %v880_v26, %s3698_s24  ;;  %1073 = vrot.lane.b32.xlu0 %v4193_v33, %s3698_s24 }
 0x2ff   : > { %1159 = vrot.lane.b32.xlu2 %v4272_v4, %s3698_s24  ;;  %v1136_v21 = vpop.permute.xlu0 %1135 }
 0x301   : > { %v4395_v14 = vpop.permute.xlu1 %1137 }
 0x302   : > { %v1195_v1 = vsel %vm598_vm3, %v1136_v21, %v4395_v14 }
 0x306   : > { %1079 = vrot.lane.b32.xlu1 %v4237_v45, %s3698_s24  ;;  %1133 = vrot.lane.b32.xlu0 %v947_v38, %s3698_s24  ;;  %v4382_v45 = vpop.permute.xlu2 %1075 }
 0x307   : > { %1169 = vrot.lane.b32.xlu2 %v998_v35, %s3698_s24 }
 0x308   : > { %v4368_v33 = vpop.permute.xlu0 %1123 }
 0x309   : > { %v1090_v24 = vpop.permute.xlu1 %1089 }
 0x30e   : > { %1157 = vrot.lane.b32.xlu1 %v981_v9, %s3698_s24  ;;  %1161 = vrot.lane.b32.xlu0 %v995_v43, %s3698_s24 }
 0x30f   : > { %1067 = vrot.lane.b32.xlu2 %v4152_v12, %s3698_s24  ;;  %v3320_v12 = vld [vmem:[%s5818_s2 + $0x20] sm:$0xff] }
 0x310   : > { %v4380_v42 = vpop.permute.xlu0 %1149 }
 0x311   : > { %v4410_v29 = vpop.permute.xlu1 %1125  ;;  %v1199_v56 = vsel %vm598_vm3, %v4328_v34, %v4380_v42 }
 0x312   : > { %v1191_v21 = vsel %vm598_vm3, %v4368_v33, %v4410_v29  ;;  %v3609_v33 = vld [vmem:[%s5817_s1 + $0x34] sm:$0xf] }
 0x316   : > { %1121 = vrot.lane.b32.xlu1 %v922_v58, %s3698_s24  ;;  %1115 = vrot.lane.b32.xlu0 %v4283_v11, %s3698_s24  ;;  %v996_v11 = vsel %vm994_vm10, %v4262_v59, %v4239_v15 }
 0x317   : > { %1030 = vperm.xlu2 %3685, %v3323_v44   ;;  %v1130_v0 = vpop.permute.xlu2 %1129 }
 0x318   : > { %v1102_v4 = vpop.permute.xlu0 %1101 }
 0x319   : > { %v1183_v26 = vsel %vm598_vm3, %v4365_v57, %v1102_v4  ;;  %v1184_v3 = vsel %vm598_vm3, %v1102_v4, %v4349_v47  ;;  %v3328_v47 = vld [vmem:[%s5817_s1 + $0x3c] sm:$0xf0] }
 0x31e   : > { %1167 = vrot.lane.b32.xlu1 %v997_v18, %s3698_s24  ;;  %1015 = vperm.xlu0 %3686, %v3320_v12   ;;  %v4461_v12 = vor.u32 %v3609_v33, %v3328_v47 }
 0x320   : > { %v1088_v20 = vpop.permute.xlu0 %1087 }
 0x321   : > { %v4399_v31 = vpop.permute.xlu2 %1143  ;;  %v1179_v4 = vsel %vm598_vm3, %v1088_v20, %v1090_v24 }
 0x326   : > { %1163 = vrot.lane.b32.xlu1 %v996_v11, %s3698_s24 }
 0x328   : > { %v4405_v25 = vpop.permute.xlu0 %1077 }
 0x329   : > { %v1096_v27 = vpop.permute.xlu2 %1095 }
 0x32e   : > { %1025 = vperm.xlu1 %3684, %v3322_v10  }
 0x330   : > { %v4412_v13 = vpop.permute.xlu0 %1113 }
 0x331   : > { %v1086_v15 = vpop.permute.xlu2 %1085 }
 0x336   : > { %1020 = vperm.xlu1 %3684, %v3321_v32  }
 0x338   : > { %v1142_v59 = vpop.permute.xlu1 %1141  ;;  %v1154_v39 = vpop.permute.xlu0 %1153 }
 0x339   : > { %v1084_v51 = vpop.permute.xlu2 %1083  ;;  %v1197_v61 = vsel %vm598_vm3, %v1142_v59, %v4399_v31 }
 0x340   : > { %v1118_v41 = vpop.permute.xlu1 %1117  ;;  %v1110_v48 = vpop.permute.xlu0 %1109 }
 0x341   : > { %v4421_v55 = vpop.permute.xlu2 %1119 }
 0x342   : > { %v1189_v43 = vsel %vm598_vm3, %v1118_v41, %v4421_v55  ;;  %v1175_v41 = vsel %vm598_vm3, %v4382_v45, %v4405_v25  ;;  %v3326_v45 = vld [vmem:[%s5817_s1 + $0x30] sm:$0xf] }
 0x348   : > { %v4417_v52 = vpop.permute.xlu1 %1155  ;;  %v1106_v53 = vpop.permute.xlu0 %1105 }
 0x349   : > { %v1201_v54 = vsel %vm598_vm3, %v1154_v39, %v4417_v52  ;;  %v4432_v37 = vpop.permute.xlu2 %1127 }
 0x34a   : > { %1268 = vmatpush.bf16.msrb.mxu3 %v1201_v54  ;;  %v1192_v33 = vsel %vm598_vm3, %v4410_v29, %v4432_v37  ;;  %v3346_v29 = vld [vmem:[%s5817_s1 + $0x50] sm:$0xf] }
 0x34e   : > { %1269 = vmatpush.bf16.msrb.mxu3 %v1199_v56  ;;  %v3610_v56 = vld [vmem:[%s5817_s1 + $0x38] sm:$0xf0] }
 0x350   : > { %v4426_v58 = vpop.permute.xlu0 %1151  ;;  %v1098_v63 = vpop.permute.xlu1 %1097 }
 0x351   : > { %v1146_v38 = vpop.permute.xlu2 %1145  ;;  %v1182_v57 = vsel %vm598_vm3, %v1096_v27, %v1098_v63  ;;  %v3327_v63 = vor.u32 %v3610_v56, %v3326_v45 }
 0x352   : > { %1270 = vmatpush.bf16.msrb.mxu3 %v1197_v61 }
 0x356   : > { %1271 = vmatpush.bf16.msrb.mxu3 %v1195_v1 }
 0x358   : > { %v1108_v50 = vpop.permute.xlu1 %1107  ;;  %v4434_v62 = vpop.permute.xlu0 %1131 }
 0x359   : > { %v1185_v8 = vsel %vm598_vm3, %v1106_v53, %v1108_v50  ;;  %v1193_v34 = vsel %vm598_vm3, %v1130_v0, %v4434_v62  ;;  %v1186_v40 = vsel %vm598_vm3, %v1108_v50, %v1110_v48  ;;  %v1187_v0 = vsel %vm598_vm3, %v4339_v6, %v4412_v13  ;;  %v4465_v10 = vpop.permute.xlu2 %1159  ;;  %v3612_v6 = vld [vmem:[%s5817_s1 + $0x4c] sm:$0xf] }
 0x35a   : > { %1249 = vmatpush.bf16.msrb.mxu1 %v1185_v8  ;;  %1272 = vmatpush.bf16.msrb.mxu3 %v1193_v34 }
 0x35b   : > { %1306 = vmatpush.bf16.msra.mxu0 %v1186_v40  ;;  %v1198_v40 = vsel %vm598_vm3, %v4399_v31, %v1146_v38 }
 0x35e   : > { %1250 = vmatpush.bf16.msrb.mxu1 %v1183_v26  ;;  %1273 = vmatpush.bf16.msrb.mxu3 %v1191_v21 }
 0x35f   : > { %1307 = vmatpush.bf16.msra.mxu0 %v1184_v3 }
 0x360   : > { %v1094_v35 = vpop.permute.xlu1 %1093  ;;  %v1092_v44 = vpop.permute.xlu0 %1091 }
 0x361   : > { %v1181_v9 = vsel %vm598_vm3, %v1094_v35, %v1096_v27  ;;  %v1180_v18 = vsel %vm598_vm3, %v1090_v24, %v1092_v44  ;;  %v1178_v27 = vsel %vm598_vm3, %v1084_v51, %v1086_v15  ;;  %v3340_v24 = vld [vmem:[%s5817_s1 + $0x54] sm:$0xf0]  ;;  %v1170_v39 = vpop.permute.xlu2 %1169  ;;  %v3354_v35 = vld [vmem:[#allocation2] sm:$0xf] }
 0x362   : > { %1251 = vmatpush.bf16.msrb.mxu1 %v1181_v9  ;;  %1274 = vmatpush.bf16.msrb.mxu3 %v1189_v43  ;;  %v4478_v15 = vor.u32 %v3612_v6, %v3340_v24  ;;  %v3617_v9 = vld [vmem:[#allocation2 + $0xc] sm:$0xf0]  ;;  %v3611_v43 = vld [vmem:[%s5817_s1 + $0x40] sm:$0xf0]  ;;  %v3376_v6 = vld [vmem:[#allocation2 + $0x18] sm:$0xf0] }
 0x363   : > { %1308 = vmatpush.bf16.msra.mxu0 %v1182_v57  ;;  %v3355_v57 = vor.u32 %v3617_v9, %v3354_v35 }
 0x365   : > { %1437 = vrot.lane.b32.xlu2 %v3355_v57, %s3695_s21 }
 0x366   : > { %1252 = vmatpush.bf16.msrb.mxu1 %v1179_v4  ;;  %1275 = vmatpush.bf16.msrb.mxu3 %v1187_v0 }
 0x367   : > { %1309 = vmatpush.bf16.msra.mxu0 %v1180_v18 }
 0x368   : > { %v1140_v11 = vpop.permute.xlu1 %1139  ;;  %v1166_v20 = vpop.permute.xlu0 %1165 }
 0x369   : > { %1276 = vmatmul.bf16.vlgmr.msrb.gmra.mxu3 %v4461_v12  ;;  %v1068_v61 = vpop.permute.xlu2 %1067  ;;  %v1196_v26 = vsel %vm598_vm3, %v4395_v14, %v1140_v11  ;;  %v3334_v14 = vld [vmem:[%s5817_s1 + $0x38] sm:$0xf] }
 0x36a   : > { %v1172_v8 = vsel %vm598_vm3, %v4269_v2, %v1068_v61  ;;  %v3335_v47 = vor.u32 %v3611_v43, %v3334_v14 }
 0x36b   : > { %1310 = vmatpush.bf16.msra.mxu0 %v1178_v27 }
 0x370   : > { %v1082_v32 = vpop.permute.xlu1 %1081  ;;  %v1074_v54 = vpop.permute.xlu0 %1073 }
 0x371   : > { %v1177_v59 = vsel %vm598_vm3, %v1082_v32, %v1084_v51  ;;  %v1173_v51 = vsel %vm598_vm3, %v4246_v23, %v4384_v17  ;;  %v1171_v23 = vsel %vm598_vm3, %v4248_v28, %v4269_v2  ;;  %v1200_v28 = vsel %vm598_vm3, %v4380_v42, %v4426_v58  ;;  %v3613_v2 = vld [vmem:[%s5817_s1 + $0x50] sm:$0xf0] }
 0x372   : > { %1253 = vmatpush.bf16.msrb.mxu1 %v1177_v59  ;;  %v3616_v59 = vld [vmem:[#allocation2 + $0xc] sm:$0xf] }
 0x376   : > { %1254 = vmatpush.bf16.msrb.mxu1 %v1175_v41 }
 0x378   : > { %v1080_v48 = vpop.permute.xlu1 %1079 }
 0x379   : > { %v1176_v53 = vsel %vm598_vm3, %v4405_v25, %v1080_v48  ;;  %1281 = vmatmul.bf16.gmra.mxu3 %v4478_v15  ;;  %v1174_v25 = vsel %vm598_vm3, %v4384_v17, %v1074_v54  ;;  %v1134_v17 = vpop.permute.xlu0 %1133 }
 0x37a   : > { %1255 = vmatpush.bf16.msrb.mxu1 %v1173_v51  ;;  %1311 = vmatpush.bf16.msra.mxu0 %v1176_v53  ;;  %v1194_v31 = vsel %vm598_vm3, %v4434_v62, %v1134_v17 }
 0x37e   : > { %1256 = vmatpush.bf16.msrb.mxu1 %v1171_v23  ;;  %1312 = vmatpush.bf16.msra.mxu0 %v1174_v25 }
 0x380   : > { %v1158_v1 = vpop.permute.xlu1 %1157 }
 0x381   : > { %v1202_v50 = vsel %vm598_vm3, %v4417_v52, %v1158_v1  ;;  %1257 = vmatmul.bf16.vlgmr.msrb.gmra.mxu1 %v3327_v63  ;;  %v3338_v52 = vld [vmem:[%s5817_s1 + $0x48] sm:$0xf]  ;;  %v1162_v42 = vpop.permute.xlu0 %1161 }
 0x382   : > { %1313 = vmatpush.bf16.msra.mxu0 %v1172_v8  ;;  %1325 = vmatpush.bf16.msra.mxu1 %v1202_v50  ;;  %v3339_v21 = vor.u32 %v3613_v2, %v3338_v52  ;;  %v1203_v62 = vsel %vm598_vm3, %v4465_v10, %v1162_v42  ;;  %v3366_v10 = vld [vmem:[#allocation2 + $0x20] sm:$0xf] }
 0x385   : > { %1314 = vmatmul.bf16.vlgmr.msra.gmra.mxu0 %v3327_v63 }
 0x386   : > { %1326 = vmatpush.bf16.msra.mxu1 %v1200_v28 }
 0x388   : > { %v1122_v34 = vpop.permute.xlu1 %1121 }
 0x389   : > { %v1190_v4 = vsel %vm598_vm3, %v4421_v55, %v1122_v34  ;;  %v1116_v18 = vpop.permute.xlu0 %1115  ;;  %v3614_v55 = vld [vmem:[%s5817_s1 + $0x58] sm:$0xf0] }
 0x38a   : > { %1327 = vmatpush.bf16.msra.mxu1 %v1198_v40  ;;  %v1188_v11 = vsel %vm598_vm3, %v4412_v13, %v1116_v18  ;;  %v3347_v37 = vor.u32 %v3614_v55, %v3346_v29  ;;  %v3621_v13 = vld [vmem:[#allocation2 + $0x2c] sm:$0xf0] }
 0x38b   : > { %v3367_v27 = vor.u32 %v3621_v13, %v3366_v10 }
 0x38d   : > { %1443 = vrot.lane.b32.xlu2 %v3367_v27, %s3695_s21  ;;  %1475 = vrot.lane.b32.xlu0 %v3367_v27, %s3697_s23 }
 0x38e   : > { %1328 = vmatpush.bf16.msra.mxu1 %v1196_v26 }
 0x390   : > { %v1168_v58 = vpop.permute.xlu1 %1167 }
 0x391   : > { %1262 = vmatmul.bf16.gmra.mxu1 %v3339_v21  ;;  %v1205_v3 = vsel %vm598_vm3, %v1166_v20, %v1168_v58  ;;  %v1206_v38 = vsel %vm598_vm3, %v1168_v58, %v1170_v39  ;;  %v3380_v20 = vld [vmem:[#allocation2 + $0x38] sm:$0xf0]  ;;  %v3379_v39 = vor.u32 %v3616_v59, %v3376_v6  ;;  %v1016_v56 = vpop.permute.xlu0 %1015 }
 0x392   : > { %1293 = vmatpush.bf16.msra.mxu2 %v1205_v3  ;;  %1329 = vmatpush.bf16.msra.mxu1 %v1194_v31 }
 0x393   : > { %1350 = vmatpush.bf16.msra.mxu3 %v1206_v38  ;;  %1521 = vrot.lane.b32.xlu1 %v3379_v39, %s3702_s13 }
 0x395   : > { %1319 = vmatmul.bf16.gmra.mxu0 %v3339_v21  ;;  %1453 = vrot.lane.b32.xlu2 %v3355_v57, %s3700_s11 }
 0x396   : > { %1294 = vmatpush.bf16.msra.mxu2 %v1203_v62  ;;  %1330 = vmatpush.bf16.msra.mxu1 %v1192_v33 }
 0x397   : > { %1469 = vrot.lane.b32.xlu0 %v3355_v57, %s3697_s23 }
 0x398   : > { %v1164_v44 = vpop.permute.xlu1 %1163 }
 0x399   : > { %3348 = vmatmul.msk.bf16.vlgmr.msra.gmra.mxu2 %vm671_vm4, %v3335_v47  ;;  %v1204_v0 = vsel %vm598_vm3, %v1162_v42, %v1164_v44 }
 0x39a   : > { %1331 = vmatpush.bf16.msra.mxu1 %v1190_v4  ;;  %1351 = vmatpush.bf16.msra.mxu3 %v1204_v0 }
 0x39b   : > { %1629 = vrot.lane.b32.xlu1 %v3355_v57, %s3698_s24 }
 0x39d   : > { %3350 = vmatmul.msk.bf16.vlgmr.msra.gmra.mxu3 %vm671_vm4, %v3335_v47  ;;  %1459 = vrot.lane.b32.xlu2 %v3367_v27, %s3700_s11 }
 0x39e   : > { %1332 = vmatpush.bf16.msra.mxu1 %v1188_v11 }
 0x3a0   : > { %v1026_v54 = vpop.permute.xlu1 %1025 }
 0x3a1   : > { %1333 = vmatmul.bf16.vlgmr.msra.gmra.mxu1 %v4461_v12  ;;  %v3620_v12 = vld [vmem:[#allocation2 + $0x2c] sm:$0xf] }
 0x3a2   : > { %v3383_v32 = vor.u32 %v3620_v12, %v3380_v20  ;;  %v1031_v12 = vpop.permute.xlu2 %1030 }
 0x3a4   : > { %1511 = vrot.lane.b32.xlu0 %v3383_v32, %s3703_s14 }
 0x3a5   : > { %1543 = vrot.lane.b32.xlu2 %v3383_v32, %s3701_s12 }
 0x3a8   : > { %v1021_v50 = vpop.permute.xlu1 %1020 }
 0x3a9   : > { %3349 = vmatmul.msk.bf16.gmra.mxu2 %vm671_vm4, %v3347_v37 }
 0x3ac   : > { %1635 = vrot.lane.b32.xlu0 %v3367_v27, %s3698_s24 }
 0x3ad   : > { %3351 = vmatmul.msk.bf16.gmra.mxu3 %vm671_vm4, %v3347_v37  ;;  %1537 = vrot.lane.b32.xlu2 %v3379_v39, %s3701_s12 }
 0x3b1   : > { %1338 = vmatmul.bf16.gmra.mxu1 %v4478_v15 }
 0x3b4   : > { %1553 = vrot.lane.b32.xlu0 %v3379_v39, %s3704_s17 }
 0x3b5   : > { %1527 = vrot.lane.b32.xlu2 %v3383_v32, %s3702_s13 }
 0x3bd   : > { %1505 = vrot.lane.b32.xlu2 %v3379_v39, %s3703_s14 }
 0x3c5   : > { %1559 = vrot.lane.b32.xlu2 %v3383_v32, %s3704_s17 }
 0x3ec   : > { %v1277_v24 = vpop.f32.mrf.mxu3 }
 0x3f4   : > { %v1279_v15 = vpop.f32.mrf.mxu3 }
 0x3fc   : > { %v1282_v51 = vpop.f32.mrf.mxu3 }
 0x3fe   : > { %v1258_v41 = vpop.f32.mrf.mxu1 }
 0x3ff   : > { %v1259_v25 = vadd.f32 %v1258_v41, %v1016_v56 }
 0x401   : > { %v1278_v61 = vadd.f32 %v1277_v24, %v1259_v25 }
 0x402   : > { %v1315_v45 = vpop.f32.mrf.mxu0 }
 0x403   : > { %v1316_v8 = vadd.f32 %v1315_v45, %v1016_v56 }
 0x404   : > { %v1284_v63 = vpop.f32.mrf.mxu3 }
 0x406   : > { %v1260_v48 = vpop.f32.mrf.mxu1 }
 0x407   : > { %v1261_v40 = vadd.f32 %v1260_v48, %v1021_v50 }
 0x409   : > { %v1280_v3 = vadd.f32 %v1279_v15, %v1261_v40 }
 0x40a   : > { %v1317_v17 = vpop.f32.mrf.mxu0 }
 0x40b   : > { %v1318_v35 = vadd.f32 %v1317_v17, %v1021_v50 }
 0x40e   : > { %v1263_v53 = vpop.f32.mrf.mxu1 }
 0x40f   : > { %v1264_v62 = vadd.f32 %v1263_v53, %v1026_v54 }
 0x411   : > { %v1283_v55 = vadd.f32 %v1282_v51, %v1264_v62 }
 0x412   : > { %v1320_v4 = vpop.f32.mrf.mxu0 }
 0x413   : > { %v1321_v13 = vadd.f32 %v1320_v4, %v1026_v54 }
 0x416   : > { %v1265_v23 = vpop.f32.mrf.mxu1 }
 0x417   : > { %v1266_v6 = vadd.f32 %v1265_v23, %v1031_v12 }
 0x419   : > { %v1285_v45 = vadd.f32 %v1284_v63, %v1266_v6 }
 0x41a   : > { %v1322_v53 = vpop.f32.mrf.mxu0 }
 0x41c   : > { %v1296_v1 = vpop.f32.mrf.mxu2 }
 0x41d   : > { %v1297_v28 = vadd.f32 %v1296_v1, %v1278_v61  ;;  %v1323_v61 = vadd.f32 %v1322_v53, %v1031_v12 }
 0x41e   : > { %v1334_v34 = vpop.f32.mrf.mxu1 }
 0x41f   : > { %v1363_v52 = vsel %vm4097_vm5, %v1297_v28, 0.0  ;;  %v1335_v2 = vadd.f32 %v1334_v34, %v1316_v8 }
 0x420   : > { %v1353_v26 = vpop.f32.mrf.mxu3  ;;  %v1379_v42 = vmul.f32 0.01, %v1363_v52  ;;  %vm1371_vm11 = vcmp.gt.f32.partialorder %v1363_v52, 0.0 }
 0x421   : > { %v1354_v21 = vadd.f32 %v1353_v26, %v1335_v2 }
 0x422   : > { %v1387_v14 = vsel %vm1371_vm11, %v1363_v52, %v1379_v42 }
 0x423   : > { %v1364_v58 = vsel %vm4105_vm6, %v1354_v21, 0.0 }
 0x424   : > { %vm1372_vm12 = vcmp.gt.f32.partialorder %v1364_v58, 0.0  ;;  %v1380_v31 = vmul.f32 0.01, %v1364_v58  ;;  %v1298_v38 = vpop.f32.mrf.mxu2 }
 0x425   : > { %v1299_v9 = vadd.f32 %v1298_v38, %v1280_v3 }
 0x426   : > { %v1388_v43 = vsel %vm1372_vm12, %v1364_v58, %v1380_v31  ;;  %v1336_v57 = vpop.f32.mrf.mxu1 }
 0x427   : > { %v1395_v33 = vpack.c.bf16 %v1388_v43, %v1387_v14  ;;  %v1365_v47 = vsel %vm4097_vm5, %v1299_v9, 0.0  ;;  %v1337_v44 = vadd.f32 %v1336_v57, %v1318_v35  ;;  %v4590_v43 = vpop.permute.xlu2 %1437 }
 0x428   : > { %v1355_v0 = vpop.f32.mrf.mxu3  ;;  %v1381_v11 = vmul.f32 0.01, %v1365_v47  ;;  %vm1373_vm13 = vcmp.gt.f32.partialorder %v1365_v47, 0.0 }
 0x429   : > { %1399 = vst [vmem:[#allocation2 + $0x4] sm:$0xff] %v1395_v33  ;;  %v1356_v18 = vadd.f32 %v1355_v0, %v1337_v44 }
 0x42a   : > { %v1389_v20 = vsel %vm1373_vm13, %v1365_v47, %v1381_v11 }
 0x42b   : > { %v1366_v29 = vsel %vm4105_vm6, %v1356_v18, 0.0 }
 0x42c   : > { %vm1374_vm14 = vcmp.gt.f32.partialorder %v1366_v29, 0.0  ;;  %v1382_v37 = vmul.f32 0.01, %v1366_v29  ;;  %v1301_v10 = vpop.f32.mrf.mxu2 }
 0x42d   : > { %v1302_v27 = vadd.f32 %v1301_v10, %v1283_v55 }
 0x42e   : > { %v1390_v32 = vsel %vm1374_vm14, %v1366_v29, %v1382_v37  ;;  %v1339_v59 = vpop.f32.mrf.mxu1  ;;  %v4632_v37 = vpop.permute.xlu0 %1475 }
 0x42f   : > { %v1396_v24 = vpack.c.bf16 %v1390_v32, %v1389_v20  ;;  %v1367_v39 = vsel %vm4097_vm5, %v1302_v27, 0.0  ;;  %v1340_v41 = vadd.f32 %v1339_v59, %v1321_v13  ;;  %v4595_v57 = vpop.permute.xlu2 %1443  ;;  %v1522_v32 = vpop.permute.xlu1 %1521 }
 0x430   : > { %v1358_v15 = vpop.f32.mrf.mxu3  ;;  %v1383_v51 = vmul.f32 0.01, %v1367_v39  ;;  %vm1375_vm11 = vcmp.gt.f32.partialorder %v1367_v39, 0.0  ;;  %v3362_v52 = vld [vmem:[#allocation2 + $0x8] sm:$0xf] }
 0x431   : > { %1400 = vst [vmem:[#allocation2 + $0x14] sm:$0xff] %v1396_v24  ;;  %v1359_v48 = vadd.f32 %v1358_v15, %v1340_v41  ;;  %v3615_v63 = vld [vmem:[#allocation2 + $0x4] sm:$0xf] }
 0x432   : > { %v1391_v1 = vsel %vm1375_vm11, %v1367_v39, %v1383_v51 }
 0x433   : > { %v1368_v54 = vsel %vm4105_vm6, %v1359_v48, 0.0 }
 0x434   : > { %vm1376_vm12 = vcmp.gt.f32.partialorder %v1368_v54, 0.0  ;;  %v1384_v56 = vmul.f32 0.01, %v1368_v54  ;;  %v1303_v25 = vpop.f32.mrf.mxu2 }
 0x435   : > { %v1304_v23 = vadd.f32 %v1303_v25, %v1285_v45 }
 0x436   : > { %v1392_v50 = vsel %vm1376_vm12, %v1368_v54, %v1384_v56  ;;  %v1341_v8 = vpop.f32.mrf.mxu1  ;;  %v1470_v13 = vpop.permute.xlu0 %1469 }
 0x437   : > { %v1397_v28 = vpack.c.bf16 %v1392_v50, %v1391_v1  ;;  %v1369_v17 = vsel %vm4097_vm5, %v1304_v23, 0.0  ;;  %v1342_v34 = vadd.f32 %v1341_v8, %v1323_v61  ;;  %v4606_v62 = vpop.permute.xlu2 %1453  ;;  %v4655_v24 = vpop.permute.xlu1 %1629 }
 0x438   : > { %v1360_v40 = vpop.f32.mrf.mxu3  ;;  %v3618_v2 = vld [vmem:[#allocation2 + $0x14] sm:$0xf0]  ;;  %v3356_v42 = vld [vmem:[#allocation2 + $0x10] sm:$0xf0]  ;;  %v1385_v58 = vmul.f32 0.01, %v1369_v17 }
 0x439   : > { %1401 = vst [vmem:[#allocation2 + $0x24] sm:$0xff] %v1397_v28  ;;  %v1361_v26 = vadd.f32 %v1360_v40, %v1342_v34  ;;  %v4576_v21 = vor.u32 %v3618_v2, %v3362_v52  ;;  %v3359_v3 = vor.u32 %v3615_v63, %v3356_v42  ;;  %vm1377_vm13 = vcmp.gt.f32.partialorder %v1369_v17, 0.0 }
 0x43a   : > { %v1393_v35 = vsel %vm1377_vm13, %v1369_v17, %v1385_v58 }
 0x43b   : > { %v1370_v31 = vsel %vm4105_vm6, %v1361_v26, 0.0  ;;  %1473 = vrot.lane.b32.xlu2 %v4576_v21, %s3697_s23  ;;  %1441 = vrot.lane.b32.xlu1 %v4576_v21, %s3695_s21 }
 0x43c   : > { %vm1378_vm14 = vcmp.gt.f32.partialorder %v1370_v31, 0.0  ;;  %v1386_v38 = vmul.f32 0.01, %v1370_v31  ;;  %1439 = vrot.lane.b32.xlu0 %v3359_v3, %s3695_s21 }
 0x43e   : > { %v1394_v9 = vsel %vm1378_vm14, %v1370_v31, %v1386_v38  ;;  %v4644_v12 = vpop.permute.xlu0 %1511 }
 0x43f   : > { %v1398_v14 = vpack.c.bf16 %v1394_v9, %v1393_v35  ;;  %v4615_v11 = vpop.permute.xlu2 %1459 }
 0x440   : > { %v3374_v44 = vld [vmem:[#allocation2 + $0x28] sm:$0xf]  ;;  %v3619_v0 = vld [vmem:[#allocation2 + $0x24] sm:$0xf] }
 0x441   : > { %1402 = vst [vmem:[#allocation2 + $0x34] sm:$0xff] %v1398_v14 }
 0x443   : > { %1535 = vrot.lane.b32.xlu2 %v4576_v21, %s3701_s12  ;;  %1457 = vrot.lane.b32.xlu1 %v4576_v21, %s3700_s11 }
 0x444   : > { %1455 = vrot.lane.b32.xlu0 %v3359_v3, %s3700_s11 }
 0x446   : > { %v4650_v59 = vpop.permute.xlu0 %1635 }
 0x447   : > { %v4620_v29 = vpop.permute.xlu2 %1543 }
 0x448   : > { %v3622_v33 = vld [vmem:[#allocation2 + $0x34] sm:$0xf0]  ;;  %v3368_v47 = vld [vmem:[#allocation2 + $0x30] sm:$0xf0] }
 0x449   : > { %v4608_v4 = vor.u32 %v3622_v33, %v3374_v44  ;;  %v3371_v18 = vor.u32 %v3619_v0, %v3368_v47 }
 0x44b   : > { %1501 = vrot.lane.b32.xlu2 %v3359_v3, %s3703_s14  ;;  %1471 = vrot.lane.b32.xlu1 %v3359_v3, %s3697_s23 }
 0x44c   : > { %1517 = vrot.lane.b32.xlu0 %v3359_v3, %s3702_s13 }
 0x44e   : > { %v4657_v39 = vpop.permute.xlu0 %1553 }
 0x44f   : > { %v4628_v55 = vpop.permute.xlu2 %1537 }
 0x453   : > { %1551 = vrot.lane.b32.xlu2 %v4576_v21, %s3704_s17  ;;  %1533 = vrot.lane.b32.xlu1 %v3359_v3, %s3701_s12 }
 0x454   : > { %1503 = vrot.lane.b32.xlu0 %v4576_v21, %s3703_s14 }
 0x457   : > { %v4636_v10 = vpop.permute.xlu2 %1527 }
 0x45b   : > { %1631 = vrot.lane.b32.xlu2 %v3359_v3, %s3698_s24  ;;  %1519 = vrot.lane.b32.xlu1 %v4576_v21, %s3702_s13 }
 0x45c   : > { %1485 = vrot.lane.b32.xlu0 %v3359_v3, %s3696_s22 }
 0x45f   : > { %v4642_v27 = vpop.permute.xlu2 %1505 }
 0x463   : > { %1487 = vrot.lane.b32.xlu1 %v4576_v21, %s3696_s22  ;;  %1479 = vrot.lane.b32.xlu2 %v4608_v4, %s3697_s23 }
 0x464   : > { %1445 = vrot.lane.b32.xlu0 %v3371_v18, %s3695_s21 }
 0x467   : > { %v4648_v20 = vpop.permute.xlu2 %1559 }
 0x46b   : > { %1549 = vrot.lane.b32.xlu1 %v3359_v3, %s3704_s17  ;;  %1539 = vrot.lane.b32.xlu2 %v3371_v18, %s3701_s12 }
 0x46c   : > { %1461 = vrot.lane.b32.xlu0 %v3371_v18, %s3700_s11 }
 0x473   : > { %1447 = vrot.lane.b32.xlu1 %v4608_v4, %s3695_s21  ;;  %1491 = vrot.lane.b32.xlu2 %v4608_v4, %s3696_s22 }
 0x474   : > { %1541 = vrot.lane.b32.xlu0 %v4608_v4, %s3701_s12 }
 0x47b   : > { %1477 = vrot.lane.b32.xlu1 %v3371_v18, %s3697_s23 }
 0x47c   : > { %1523 = vrot.lane.b32.xlu0 %v3371_v18, %s3702_s13 }
 0x483   : > { %1463 = vrot.lane.b32.xlu1 %v4608_v4, %s3700_s11 }
 0x484   : > { %1507 = vrot.lane.b32.xlu0 %v3371_v18, %s3703_s14 }
 0x48b   : > { %1525 = vrot.lane.b32.xlu1 %v4608_v4, %s3702_s13 }
 0x48c   : > { %1555 = vrot.lane.b32.xlu0 %v3371_v18, %s3704_s17 }
 0x493   : > { %1509 = vrot.lane.b32.xlu1 %v4608_v4, %s3703_s14 }
 0x495   : > { %v1474_v6 = vpop.permute.xlu2 %1473 }
 0x49b   : > { %1489 = vrot.lane.b32.xlu1 %v3371_v18, %s3696_s22 }
 0x49d   : > { %v1536_v41 = vpop.permute.xlu2 %1535 }
 0x49e   : > { %v1546_v44 = vsel %vm977_vm8, %v1536_v41, %v4628_v55 }
 0x4a3   : > { %1557 = vrot.lane.b32.xlu1 %v4608_v4, %s3704_s17 }
 0x4a5   : > { %v1502_v51 = vpop.permute.xlu2 %1501 }
 0x4ab   : > { %1637 = vrot.lane.b32.xlu1 %v3371_v18, %s3698_s24 }
 0x4ad   : > { %v4660_v15 = vpop.permute.xlu1 %1441  ;;  %v4666_v61 = vpop.permute.xlu2 %1551 }
 0x4ae   : > { %v1440_v48 = vpop.permute.xlu0 %1439 }
 0x4af   : > { %v1450_v8 = vsel %vm311_vm0, %v1440_v48, %v4660_v15  ;;  %v1449_v40 = vsel %vm311_vm0, %v4590_v43, %v1440_v48 }
 0x4b5   : > { %v1458_v53 = vpop.permute.xlu1 %1457  ;;  %v4676_v28 = vpop.permute.xlu2 %1631 }
 0x4b6   : > { %v1456_v54 = vpop.permute.xlu0 %1455  ;;  %1657 = vrot.lane.b32.xlu2 %v1458_v53, %s3698_s24 }
 0x4b7   : > { %v1466_v50 = vsel %vm894_vm7, %v1456_v54, %v1458_v53  ;;  %v1465_v43 = vsel %vm894_vm7, %v4606_v62, %v1456_v54 }
 0x4bd   : > { %v1472_v45 = vpop.permute.xlu1 %1471  ;;  %v1480_v2 = vpop.permute.xlu2 %1479 }
 0x4be   : > { %v1518_v56 = vpop.permute.xlu0 %1517  ;;  %v1481_v25 = vsel %vm396_vm2, %v1470_v13, %v1472_v45  ;;  %v1482_v31 = vsel %vm396_vm2, %v1472_v45, %v1474_v6 }
 0x4bf   : > { %1701 = vrot.lane.b32.xlu1 %v1518_v56, %s3698_s24  ;;  %1665 = vrot.lane.b32.xlu2 %v1481_v25, %s3698_s24 }
 0x4c5   : > { %v1534_v23 = vpop.permute.xlu1 %1533  ;;  %v1540_v38 = vpop.permute.xlu2 %1539 }
 0x4c6   : > { %v4668_v1 = vpop.permute.xlu0 %1503  ;;  %1713 = vrot.lane.b32.xlu0 %v1534_v23, %s3698_s24  ;;  %v1545_v42 = vsel %vm977_vm8, %v1534_v23, %v1536_v41 }
 0x4c7   : > { %1655 = vrot.lane.b32.xlu1 %v1466_v50, %s3698_s24  ;;  %1643 = vrot.lane.b32.xlu2 %v1450_v8, %s3698_s24  ;;  %v1513_v9 = vsel %vm943_vm9, %v1502_v51, %v4668_v1 }
 0x4cd   : > { %v1520_v17 = vpop.permute.xlu1 %1519  ;;  %v1492_v53 = vpop.permute.xlu2 %1491 }
 0x4ce   : > { %v4678_v34 = vpop.permute.xlu0 %1485  ;;  %1669 = vrot.lane.b32.xlu0 %v1474_v6, %s3698_s24  ;;  %v1529_v52 = vsel %vm960_vm15, %v1518_v56, %v1520_v17  ;;  %v1530_v58 = vsel %vm960_vm15, %v1520_v17, %v1522_v32 }
 0x4cf   : > { %1641 = vrot.lane.b32.xlu1 %v1449_v40, %s3698_s24  ;;  %1703 = vrot.lane.b32.xlu2 %v1529_v52, %s3698_s24 }
 0x4d5   : > { %v4686_v26 = vpop.permute.xlu1 %1487 }
 0x4d6   : > { %v1446_v63 = vpop.permute.xlu0 %1445  ;;  %1689 = vrot.lane.b32.xlu0 %v1502_v51, %s3698_s24  ;;  %v1493_v25 = vsel %vm425_vm1, %v4678_v34, %v4686_v26 }
 0x4d7   : > { %1715 = vrot.lane.b32.xlu1 %v1545_v42, %s3698_s24  ;;  %1705 = vrot.lane.b32.xlu2 %v1530_v58, %s3698_s24  ;;  %v3392_v42 = vld [vmem:[%s5818_s2 + $0x40] sm:$0xff] }
 0x4dd   : > { %v4693_v3 = vpop.permute.xlu1 %1549 }
 0x4de   : > { %v1462_v35 = vpop.permute.xlu0 %1461  ;;  %1667 = vrot.lane.b32.xlu0 %v1482_v31, %s3698_s24  ;;  %v1561_v58 = vsel %vm994_vm10, %v4693_v3, %v4666_v61 }
 0x4df   : > { %1691 = vrot.lane.b32.xlu1 %v1513_v9, %s3698_s24  ;;  %1719 = vrot.lane.b32.xlu2 %v1540_v38, %s3698_s24  ;;  %v1467_v48 = vsel %vm894_vm7, %v4615_v11, %v1462_v35 }
 0x4e5   : > { %v1448_v14 = vpop.permute.xlu1 %1447 }
 0x4e6   : > { %v1542_v33 = vpop.permute.xlu0 %1541  ;;  %1653 = vrot.lane.b32.xlu0 %v1465_v43, %s3698_s24  ;;  %v1452_v54 = vsel %vm311_vm0, %v1446_v63, %v1448_v14 }
 0x4e7   : > { %1675 = vrot.lane.b32.xlu2 %v1480_v2, %s3698_s24  ;;  %v1547_v45 = vsel %vm977_vm8, %v1540_v38, %v1542_v33  ;;  %v3395_v38 = vld [vmem:[%s5818_s2 + $0x58] sm:$0xff] }
 0x4ed   : > { %v1478_v47 = vpop.permute.xlu1 %1477 }
 0x4ee   : > { %v1524_v0 = vpop.permute.xlu0 %1523  ;;  %1717 = vrot.lane.b32.xlu0 %v1546_v44, %s3698_s24  ;;  %v1483_v32 = vsel %vm396_vm2, %v4632_v37, %v1478_v47  ;;  %v1484_v6 = vsel %vm396_vm2, %v1478_v47, %v1480_v2  ;;  %v1451_v37 = vsel %vm311_vm0, %v4595_v57, %v1446_v63  ;;  %v1548_v57 = vsel %vm977_vm8, %v1542_v33, %v4620_v29 }
 0x4f5   : > { %v1464_v18 = vpop.permute.xlu1 %1463 }
 0x4f6   : > { %v1508_v13 = vpop.permute.xlu0 %1507  ;;  %1663 = vrot.lane.b32.xlu1 %v1464_v18, %s3698_s24  ;;  %1707 = vrot.lane.b32.xlu0 %v1524_v0, %s3698_s24  ;;  %v1468_v55 = vsel %vm894_vm7, %v1462_v35, %v1464_v18  ;;  %v3394_v35 = vld [vmem:[%s5818_s2 + $0x50] sm:$0xff] }
 0x4f7   : > { %1695 = vrot.lane.b32.xlu2 %v1508_v13, %s3698_s24 }
 0x4fd   : > { %v1526_v62 = vpop.permute.xlu1 %1525 }
 0x4fe   : > { %1671 = vrot.lane.b32.xlu0 %v1483_v32, %s3698_s24  ;;  %1673 = vrot.lane.b32.xlu1 %v1484_v6, %s3698_s24  ;;  %v1531_v56 = vsel %vm960_vm15, %v1524_v0, %v1526_v62  ;;  %v1532_v29 = vsel %vm960_vm15, %v1526_v62, %v4636_v10 }
 0x4ff   : > { %1661 = vrot.lane.b32.xlu2 %v1468_v55, %s3698_s24 }
 0x505   : > { %v1510_v41 = vpop.permute.xlu1 %1509 }
 0x506   : > { %1651 = vrot.lane.b32.xlu0 %v1448_v14, %s3698_s24  ;;  %1659 = vrot.lane.b32.xlu1 %v1467_v48, %s3698_s24  ;;  %v1516_v10 = vsel %vm943_vm9, %v1510_v41, %v4644_v12 }
 0x507   : > { %1647 = vrot.lane.b32.xlu2 %v1451_v37, %s3698_s24 }
 0x50d   : > { %v1490_v51 = vpop.permute.xlu1 %1489 }
 0x50e   : > { %1649 = vrot.lane.b32.xlu0 %v1452_v54, %s3698_s24  ;;  %1683 = vrot.lane.b32.xlu1 %v1490_v51, %s3698_s24  ;;  %v1494_v8 = vsel %vm425_vm1, %v1490_v51, %v1492_v53 }
 0x50f   : > { %1677 = vrot.lane.b32.xlu2 %v4678_v34, %s3698_s24  ;;  %v1556_v34 = vpop.permute.xlu0 %1555 }
 0x510   : > { %v4730_v11 = vpop.permute.xlu2 %1657 }
 0x515   : > { %v1558_v50 = vpop.permute.xlu1 %1557 }
 0x516   : > { %1645 = vrot.lane.b32.xlu1 %v4660_v15, %s3698_s24  ;;  %1721 = vrot.lane.b32.xlu0 %v1547_v45, %s3698_s24  ;;  %v1515_v15 = vsel %vm943_vm9, %v1508_v13, %v1510_v41 }
 0x517   : > { %1723 = vrot.lane.b32.xlu2 %v1548_v57, %s3698_s24 }
 0x519   : > { %v4745_v23 = vpop.permute.xlu2 %1665 }
 0x51d   : > { %v4767_v40 = vpop.permute.xlu1 %1637 }
 0x51e   : > { %1709 = vrot.lane.b32.xlu1 %v1531_v56, %s3698_s24  ;;  %1679 = vrot.lane.b32.xlu0 %v1493_v25, %s3698_s24 }
 0x51f   : > { %1639 = vrot.lane.b32.xlu2 %v4608_v4, %s3698_s24  ;;  %v1514_v4 = vsel %vm943_vm9, %v4668_v1, %v4642_v27  ;;  %v1564_v27 = vsel %vm994_vm10, %v1558_v50, %v4648_v20 }
 0x521   : > { %v4756_v17 = vpop.permute.xlu2 %1643 }
 0x526   : > { %1711 = vrot.lane.b32.xlu1 %v1532_v29, %s3698_s24  ;;  %1697 = vrot.lane.b32.xlu0 %v1515_v15, %s3698_s24 }
 0x527   : > { %1685 = vrot.lane.b32.xlu2 %v1494_v8, %s3698_s24 }
 0x529   : > { %v4769_v52 = vpop.permute.xlu2 %1703 }
 0x52e   : > { %1693 = vrot.lane.b32.xlu1 %v1514_v4, %s3698_s24  ;;  %1699 = vrot.lane.b32.xlu0 %v1516_v10, %s3698_s24 }
 0x52f   : > { %1681 = vrot.lane.b32.xlu2 %v4686_v26, %s3698_s24  ;;  %v1563_v26 = vsel %vm994_vm10, %v1556_v34, %v1558_v50 }
 0x531   : > { %v4777_v12 = vpop.permute.xlu1 %1701  ;;  %v4781_v2 = vpop.permute.xlu2 %1705 }
 0x536   : > { %1633 = vrot.lane.b32.xlu1 %v4576_v21, %s3698_s24  ;;  %1687 = vrot.lane.b32.xlu0 %v1492_v53, %s3698_s24  ;;  %v1562_v21 = vsel %vm994_vm10, %v4666_v61, %v4657_v39 }
 0x537   : > { %1735 = vrot.lane.b32.xlu2 %v1564_v27, %s3698_s24 }
 0x538   : > { %v4779_v1 = vpop.permute.xlu0 %1713 }
 0x539   : > { %v1656_v63 = vpop.permute.xlu1 %1655  ;;  %v1720_v39 = vpop.permute.xlu2 %1719 }
 0x53a   : > { %v1746_v29 = vsel %vm598_vm3, %v1656_v63, %v4730_v11  ;;  %v1739_v11 = vsel %vm598_vm3, %v4650_v59, %v4767_v40  ;;  %v1737_v59 = vsel %vm598_vm3, %v4655_v24, %v4676_v28 }
 0x53e   : > { %1733 = vrot.lane.b32.xlu1 %v1563_v26, %s3698_s24  ;;  %1731 = vrot.lane.b32.xlu0 %v1556_v34, %s3698_s24 }
 0x53f   : > { %1729 = vrot.lane.b32.xlu2 %v1562_v21, %s3698_s24 }
 0x540   : > { %v1670_v20 = vpop.permute.xlu0 %1669 }
 0x541   : > { %v1642_v9 = vpop.permute.xlu1 %1641  ;;  %v1676_v14 = vpop.permute.xlu2 %1675 }
 0x542   : > { %v1741_v10 = vsel %vm598_vm3, %v1642_v9, %v4756_v17 }
 0x546   : > { %1727 = vrot.lane.b32.xlu1 %v1561_v58, %s3698_s24  ;;  %1725 = vrot.lane.b32.xlu0 %v4693_v3, %s3698_s24  ;;  %v3393_v3 = vld [vmem:[%s5818_s2 + $0x48] sm:$0xff] }
 0x547   : > { %1581 = vperm.xlu2 %3685, %v3392_v42  }
 0x548   : > { %v4799_v31 = vpop.permute.xlu0 %1689 }
 0x549   : > { %v4810_v43 = vpop.permute.xlu1 %1715 }
 0x54e   : > { %1596 = vperm.xlu1 %3684, %v3395_v38   ;;  %1591 = vperm.xlu0 %3686, %v3394_v35  }
 0x550   : > { %v1668_v61 = vpop.permute.xlu0 %1667 }
 0x551   : > { %v4812_v47 = vpop.permute.xlu2 %1695  ;;  %v4814_v44 = vpop.permute.xlu1 %1691  ;;  %v1749_v37 = vsel %vm598_vm3, %v4745_v23, %v1668_v61  ;;  %v1750_v53 = vsel %vm598_vm3, %v1668_v61, %v1670_v20  ;;  %v3398_v20 = vld [vmem:[%s5817_s1 + $0x60] sm:$0xf] }
 0x556   : > { %1586 = vperm.xlu0 %3686, %v3393_v3  }
 0x558   : > { %v1654_v33 = vpop.permute.xlu0 %1653 }
 0x559   : > { %v1662_v18 = vpop.permute.xlu2 %1661  ;;  %v1745_v25 = vsel %vm598_vm3, %v1654_v33, %v1656_v63  ;;  %v3624_v63 = vld [vmem:[%s5817_s1 + $0x68] sm:$0xf0] }
 0x55a   : > { %v4852_v58 = vor.u32 %v3624_v63, %v3398_v20  ;;  %v3418_v20 = vld [vmem:[%s5817_s1 + $0x80] sm:$0xf]  ;;  %v3628_v63 = vld [vmem:[%s5817_s1 + $0x88] sm:$0xf0] }
 0x560   : > { %v4816_v0 = vpop.permute.xlu0 %1717 }
 0x561   : > { %v1648_v32 = vpop.permute.xlu2 %1647 }
 0x568   : > { %v1664_v13 = vpop.permute.xlu1 %1663  ;;  %v1708_v62 = vpop.permute.xlu0 %1707 }
 0x569   : > { %v4823_v51 = vpop.permute.xlu2 %1677  ;;  %v1748_v56 = vsel %vm598_vm3, %v1662_v18, %v1664_v13 }
 0x570   : > { %v1672_v6 = vpop.permute.xlu0 %1671  ;;  %v1674_v55 = vpop.permute.xlu1 %1673 }
 0x571   : > { %v1751_v41 = vsel %vm598_vm3, %v1672_v6, %v1674_v55  ;;  %v1752_v48 = vsel %vm598_vm3, %v1674_v55, %v1676_v14  ;;  %v1724_v50 = vpop.permute.xlu2 %1723 }
 0x572   : > { %1815 = vmatpush.bf16.msrb.mxu2 %v1751_v41  ;;  %1872 = vmatpush.bf16.msrb.mxu3 %v1752_v48  ;;  %v3626_v41 = vld [vmem:[%s5817_s1 + $0x7c] sm:$0xf]  ;;  %v3412_v48 = vld [vmem:[%s5817_s1 + $0x84] sm:$0xf0] }
 0x576   : > { %1816 = vmatpush.bf16.msrb.mxu2 %v1749_v37  ;;  %1873 = vmatpush.bf16.msrb.mxu3 %v1750_v53 }
 0x578   : > { %v1652_v54 = vpop.permute.xlu0 %1651  ;;  %v1660_v45 = vpop.permute.xlu1 %1659 }
 0x579   : > { %v1747_v57 = vsel %vm598_vm3, %v1660_v45, %v1662_v18  ;;  %v1640_v42 = vpop.permute.xlu2 %1639  ;;  %v3415_v45 = vor.u32 %v3626_v41, %v3412_v48 }
 0x57a   : > { %1817 = vmatpush.bf16.msrb.mxu2 %v1747_v57  ;;  %1874 = vmatpush.bf16.msrb.mxu3 %v1748_v56 }
 0x57e   : > { %1818 = vmatpush.bf16.msrb.mxu2 %v1745_v25  ;;  %1875 = vmatpush.bf16.msrb.mxu3 %v1746_v29 }
 0x580   : > { %v1650_v23 = vpop.permute.xlu0 %1649  ;;  %v1684_v15 = vpop.permute.xlu1 %1683 }
 0x581   : > { %v1743_v8 = vsel %vm598_vm3, %v1648_v32, %v1650_v23  ;;  %v1744_v4 = vsel %vm598_vm3, %v1650_v23, %v1652_v54  ;;  %v1686_v3 = vpop.permute.xlu2 %1685 }
 0x582   : > { %1819 = vmatpush.bf16.msrb.mxu2 %v1743_v8  ;;  %1876 = vmatpush.bf16.msrb.mxu3 %v1744_v4  ;;  %v1755_v6 = vsel %vm598_vm3, %v1684_v15, %v1686_v3  ;;  %v3625_v4 = vld [vmem:[%s5817_s1 + $0x70] sm:$0xf0] }
 0x586   : > { %1820 = vmatpush.bf16.msrb.mxu2 %v1741_v10 }
 0x588   : > { %v1646_v34 = vpop.permute.xlu1 %1645  ;;  %v1722_v27 = vpop.permute.xlu0 %1721 }
 0x589   : > { %v1767_v26 = vsel %vm598_vm3, %v1720_v39, %v1722_v27  ;;  %v1742_v21 = vsel %vm598_vm3, %v4756_v17, %v1646_v34  ;;  %v1765_v17 = vsel %vm598_vm3, %v4779_v1, %v4810_v43  ;;  %v1740_v39 = vsel %vm598_vm3, %v4767_v40, %v1640_v42 }
 0x58a   : > { %1821 = vmatpush.bf16.msrb.mxu2 %v1739_v11  ;;  %1834 = vmatpush.bf16.msrb.mxu0 %v1767_v26  ;;  %v1768_v38 = vsel %vm598_vm3, %v1722_v27, %v1724_v50  ;;  %v1766_v1 = vsel %vm598_vm3, %v4810_v43, %v4816_v0  ;;  %v1761_v40 = vsel %vm598_vm3, %v4777_v12, %v4769_v52  ;;  %v3410_v43 = vld [vmem:[%s5817_s1 + $0x78] sm:$0xf]  ;;  %v3627_v12 = vld [vmem:[%s5817_s1 + $0x80] sm:$0xf0] }
 0x58b   : > { %3657 = vmatpush.bf16.msrb.mxu1 %v1767_v26  ;;  %1877 = vmatpush.bf16.msrb.mxu3 %v1742_v21  ;;  %v1757_v0 = vsel %vm598_vm3, %v4799_v31, %v4814_v44  ;;  %v3411_v13 = vor.u32 %v3627_v12, %v3410_v43  ;;  %v3623_v31 = vld [vmem:[%s5817_s1 + $0x64] sm:$0xf]  ;;  %v3419_v42 = vor.u32 %v3628_v63, %v3418_v20 }
 0x58e   : > { %1822 = vmatpush.bf16.msrb.mxu2 %v1737_v59  ;;  %1835 = vmatpush.bf16.msrb.mxu0 %v1765_v17  ;;  %v3426_v59 = vld [vmem:[#allocation2] sm:$0xf] }
 0x58f   : > { %3658 = vmatpush.bf16.msrb.mxu1 %v1765_v17  ;;  %1878 = vmatpush.bf16.msrb.mxu3 %v1740_v39  ;;  %v3631_v17 = vld [vmem:[#allocation2 + $0xc] sm:$0xf0]  ;;  %v3438_v39 = vld [vmem:[#allocation2 + $0x20] sm:$0xf] }
 0x590   : > { %v1710_v35 = vpop.permute.xlu1 %1709  ;;  %v1680_v9 = vpop.permute.xlu0 %1679 }
 0x591   : > { %1823 = vmatmul.bf16.vlgmr.msrb.gmra.mxu2 %v4852_v58  ;;  %v1763_v24 = vsel %vm598_vm3, %v1708_v62, %v1710_v35  ;;  %v1753_v37 = vsel %vm598_vm3, %v4823_v51, %v1680_v9 }
 0x592   : > { %1891 = vmatpush.bf16.msra.mxu2 %v1768_v38  ;;  %1836 = vmatpush.bf16.msrb.mxu0 %v1763_v24  ;;  %v3635_v38 = vld [vmem:[#allocation2 + $0x2c] sm:$0xf0] }
 0x593   : > { %3659 = vmatpush.bf16.msrb.mxu1 %v1763_v24  ;;  %v3630_v24 = vld [vmem:[#allocation2 + $0xc] sm:$0xf] }
 0x596   : > { %1892 = vmatpush.bf16.msra.mxu2 %v1766_v1  ;;  %1837 = vmatpush.bf16.msrb.mxu0 %v1761_v40  ;;  %v3448_v1 = vld [vmem:[#allocation2 + $0x18] sm:$0xf0] }
 0x597   : > { %3660 = vmatpush.bf16.msrb.mxu1 %v1761_v40  ;;  %v3451_v40 = vor.u32 %v3630_v24, %v3448_v1 }
 0x598   : > { %v1712_v61 = vpop.permute.xlu1 %1711  ;;  %v1698_v14 = vpop.permute.xlu0 %1697 }
 0x599   : > { %v1759_v33 = vsel %vm598_vm3, %v4812_v47, %v1698_v14  ;;  %v1764_v18 = vsel %vm598_vm3, %v1710_v35, %v1712_v61  ;;  %v1762_v47 = vsel %vm598_vm3, %v4769_v52, %v4781_v2  ;;  %v3400_v52 = vld [vmem:[%s5817_s1 + $0x6c] sm:$0xf0]  ;;  %v1682_v2 = vpop.permute.xlu2 %1681  ;;  %v3439_v35 = vor.u32 %v3635_v38, %v3438_v39 }
 0x59a   : > { %1838 = vmatpush.bf16.msrb.mxu0 %v1759_v33  ;;  %1893 = vmatpush.bf16.msra.mxu2 %v1764_v18  ;;  %v3403_v54 = vor.u32 %v3623_v31, %v3400_v52 }
 0x59b   : > { %3661 = vmatpush.bf16.msrb.mxu1 %v1759_v33  ;;  %2049 = vrot.lane.b32.xlu0 %v3439_v35, %s3697_s23 }
 0x59e   : > { %1839 = vmatpush.bf16.msrb.mxu0 %v1757_v0  ;;  %1894 = vmatpush.bf16.msra.mxu2 %v1762_v47 }
 0x59f   : > { %3662 = vmatpush.bf16.msrb.mxu1 %v1757_v0 }
 0x5a0   : > { %v1694_v62 = vpop.permute.xlu1 %1693  ;;  %v1700_v32 = vpop.permute.xlu0 %1699 }
 0x5a1   : > { %1828 = vmatmul.bf16.gmra.mxu2 %v3411_v13  ;;  %v1760_v55 = vsel %vm598_vm3, %v1698_v14, %v1700_v32  ;;  %v1758_v53 = vsel %vm598_vm3, %v4814_v44, %v1694_v62  ;;  %v1736_v51 = vpop.permute.xlu2 %1735  ;;  %v1754_v44 = vsel %vm598_vm3, %v1680_v9, %v1682_v2  ;;  %v3634_v14 = vld [vmem:[#allocation2 + $0x2c] sm:$0xf] }
 0x5a2   : > { %1840 = vmatpush.bf16.msrb.mxu0 %v1755_v6  ;;  %1895 = vmatpush.bf16.msra.mxu2 %v1760_v55 }
 0x5a3   : > { %3663 = vmatpush.bf16.msrb.mxu1 %v1755_v6  ;;  %2111 = vrot.lane.b32.xlu0 %v3451_v40, %s3701_s12 }
 0x5a6   : > { %1841 = vmatpush.bf16.msrb.mxu0 %v1753_v37  ;;  %1896 = vmatpush.bf16.msra.mxu2 %v1758_v53 }
 0x5a7   : > { %3664 = vmatpush.bf16.msrb.mxu1 %v1753_v37 }
 0x5a8   : > { %v1634_v57 = vpop.permute.xlu1 %1633  ;;  %v1688_v56 = vpop.permute.xlu0 %1687 }
 0x5a9   : > { %1842 = vmatmul.bf16.vlgmr.msrb.gmra.mxu0 %v3403_v54  ;;  %v1738_v25 = vsel %vm598_vm3, %v4676_v28, %v1634_v57  ;;  %v1756_v29 = vsel %vm598_vm3, %v1686_v3, %v1688_v56  ;;  %v3406_v28 = vld [vmem:[%s5817_s1 + $0x68] sm:$0xf]  ;;  %v1730_v10 = vpop.permute.xlu2 %1729  ;;  %v3452_v3 = vld [vmem:[#allocation2 + $0x38] sm:$0xf0] }
 0x5aa   : > { %1847 = vmatmul.bf16.vlgmr.msrb.gmra.mxu1 %v3415_v45  ;;  %1879 = vmatpush.bf16.msrb.mxu3 %v1738_v25  ;;  %v3407_v21 = vor.u32 %v3625_v4, %v3406_v28  ;;  %v3455_v33 = vor.u32 %v3634_v14, %v3452_v3 }
 0x5ab   : > { %1897 = vmatpush.bf16.msra.mxu2 %v1756_v29 }
 0x5ac   : > { %2101 = vrot.lane.b32.xlu0 %v3455_v33, %s3702_s13 }
 0x5ad   : > { %1880 = vmatmul.bf16.vlgmr.msrb.gmra.mxu3 %v4852_v58  ;;  %v3427_v58 = vor.u32 %v3631_v17, %v3426_v59 }
 0x5af   : > { %1898 = vmatpush.bf16.msra.mxu2 %v1754_v44  ;;  %2011 = vrot.lane.b32.xlu1 %v3427_v58, %s3695_s21 }
 0x5b0   : > { %v1734_v23 = vpop.permute.xlu1 %1733  ;;  %v1732_v15 = vpop.permute.xlu0 %1731  ;;  %2043 = vrot.lane.b32.xlu2 %v3427_v58, %s3697_s23 }
 0x5b1   : > { %v1771_v50 = vsel %vm598_vm3, %v1732_v15, %v1734_v23  ;;  %v1772_v8 = vsel %vm598_vm3, %v1734_v23, %v1736_v51  ;;  %v1582_v55 = vpop.permute.xlu2 %1581 }
 0x5b2   : > { %1899 = vmatmul.bf16.vlgmr.msra.gmra.mxu2 %v3403_v54  ;;  %1859 = vmatpush.bf16.msra.mxu1 %v1771_v50 }
 0x5b3   : > { %1916 = vmatpush.bf16.msra.mxu0 %v1772_v8 }
 0x5b4   : > { %2079 = vrot.lane.b32.xlu0 %v3451_v40, %s3703_s14 }
 0x5b7   : > { %2017 = vrot.lane.b32.xlu1 %v3439_v35, %s3695_s21 }
 0x5b8   : > { %v1728_v34 = vpop.permute.xlu1 %1727  ;;  %v1726_v27 = vpop.permute.xlu0 %1725  ;;  %2117 = vrot.lane.b32.xlu2 %v3455_v33, %s3701_s12 }
 0x5b9   : > { %v1769_v11 = vsel %vm598_vm3, %v1726_v27, %v1728_v34  ;;  %v1770_v26 = vsel %vm598_vm3, %v1728_v34, %v1730_v10 }
 0x5ba   : > { %1860 = vmatpush.bf16.msra.mxu1 %v1769_v11  ;;  %1917 = vmatpush.bf16.msra.mxu0 %v1770_v26 }
 0x5bc   : > { %2133 = vrot.lane.b32.xlu0 %v3455_v33, %s3704_s17 }
 0x5bd   : > { %3420 = vmatmul.msk.bf16.vlgmr.msra.gmra.mxu1 %vm671_vm4, %v3407_v21  ;;  %1885 = vmatmul.bf16.gmra.mxu3 %v3411_v13 }
 0x5be   : > { %3422 = vmatmul.msk.bf16.vlgmr.msra.gmra.mxu0 %vm671_vm4, %v3407_v21 }
 0x5bf   : > { %2027 = vrot.lane.b32.xlu1 %v3427_v58, %s3700_s11 }
 0x5c0   : > { %2095 = vrot.lane.b32.xlu2 %v3451_v40, %s3702_s13  ;;  %v1592_v32 = vpop.permute.xlu0 %1591 }
 0x5c2   : > { %1904 = vmatmul.bf16.gmra.mxu2 %v3415_v45 }
 0x5c7   : > { %2033 = vrot.lane.b32.xlu1 %v3439_v35, %s3700_s11 }
 0x5c8   : > { %2203 = vrot.lane.b32.xlu2 %v3427_v58, %s3698_s24  ;;  %v1587_v25 = vpop.permute.xlu0 %1586 }
 0x5cd   : > { %3421 = vmatmul.msk.bf16.gmra.mxu1 %vm671_vm4, %v3419_v42 }
 0x5ce   : > { %3423 = vmatmul.msk.bf16.gmra.mxu0 %vm671_vm4, %v3419_v42 }
 0x5cf   : > { %2085 = vrot.lane.b32.xlu1 %v3455_v33, %s3703_s14 }
 0x5d7   : > { %2127 = vrot.lane.b32.xlu1 %v3451_v40, %s3704_s17 }
 0x5df   : > { %2209 = vrot.lane.b32.xlu1 %v3439_v35, %s3698_s24 }
 0x614   : > { %v1824_v9 = vpop.f32.mrf.mxu2 }
 0x615   : > { %v1825_v31 = vadd.f32 %v1824_v9, %v1582_v55 }
 0x61c   : > { %v1826_v61 = vpop.f32.mrf.mxu2 }
 0x61d   : > { %v1827_v44 = vadd.f32 %v1826_v61, %v1587_v25 }
 0x624   : > { %v1829_v18 = vpop.f32.mrf.mxu2 }
 0x625   : > { %v1830_v20 = vadd.f32 %v1829_v18, %v1592_v32 }
 0x626   : > { %v1843_v12 = vpop.f32.mrf.mxu0 }
 0x627   : > { %v1848_v43 = vpop.f32.mrf.mxu1  ;;  %v1844_v2 = vadd.f32 %v1843_v12, %v1825_v31 }
 0x628   : > { %v1849_v35 = vadd.f32 %v1848_v43, %v1830_v20  ;;  %v5046_v20 = vpop.permute.xlu2 %2043 }
 0x62c   : > { %v4936_v0 = vpop.f32.mrf.mxu2 }
 0x62e   : > { %v1845_v62 = vpop.f32.mrf.mxu0 }
 0x62f   : > { %v4941_v13 = vpop.f32.mrf.mxu1  ;;  %v1846_v8 = vadd.f32 %v1845_v62, %v1827_v44 }
 0x630   : > { %v1881_v47 = vpop.f32.mrf.mxu3 }
 0x631   : > { %v1882_v52 = vadd.f32 %v1881_v47, %v1582_v55 }
 0x635   : > { %v1900_v6 = vpop.f32.mrf.mxu2 }
 0x636   : > { %v1901_v48 = vadd.f32 %v1900_v6, %v1882_v52 }
 0x638   : > { %v1883_v41 = vpop.f32.mrf.mxu3 }
 0x639   : > { %v1884_v15 = vadd.f32 %v1883_v41, %v1587_v25 }
 0x63a   : > { %v1862_v37 = vpop.f32.mrf.mxu1 }
 0x63b   : > { %v1863_v53 = vadd.f32 %v1862_v37, %v1844_v2  ;;  %v1919_v54 = vpop.f32.mrf.mxu0 }
 0x63c   : > { %v1920_v45 = vadd.f32 %v1919_v54, %v1901_v48 }
 0x63d   : > { %v1929_v57 = vsel %vm4097_vm5, %v1863_v53, 0.0  ;;  %v1902_v56 = vpop.f32.mrf.mxu2 }
 0x63e   : > { %v4946_v29 = vadd.f32 %v1929_v57, %v4103_v19  ;;  %v1930_v51 = vsel %vm4105_vm6, %v1920_v45, 0.0  ;;  %v1903_v4 = vadd.f32 %v1902_v56, %v1884_v15 }
 0x63f   : > { %v4951_v23 = vadd.f32 %v1930_v51, %v4113_v30 }
 0x640   : > { %vm1945_vm11 = vcmp.gt.f32.partialorder %v4946_v29, 0.0  ;;  %v1953_v50 = vmul.f32 0.01, %v4946_v29  ;;  %v1886_v27 = vpop.f32.mrf.mxu3 }
 0x641   : > { %vm1946_vm12 = vcmp.gt.f32.partialorder %v4951_v23, 0.0  ;;  %v1954_v28 = vmul.f32 0.01, %v4951_v23  ;;  %v1887_v39 = vadd.f32 %v1886_v27, %v1592_v32 }
 0x642   : > { %v1961_v19 = vsel %vm1945_vm11, %v4946_v29, %v1953_v50  ;;  %v1864_v10 = vpop.f32.mrf.mxu1 }
 0x643   : > { %v1962_v34 = vsel %vm1946_vm12, %v4951_v23, %v1954_v28  ;;  %v1865_v11 = vadd.f32 %v1864_v10, %v1846_v8  ;;  %v1921_v30 = vpop.f32.mrf.mxu0 }
 0x644   : > { %v1969_v26 = vpack.c.bf16 %v1962_v34, %v1961_v19  ;;  %v1922_v21 = vadd.f32 %v1921_v30, %v1903_v4 }
 0x645   : > { %v1931_v63 = vsel %vm4097_vm5, %v1865_v11, 0.0  ;;  %v1905_v42 = vpop.f32.mrf.mxu2 }
 0x646   : > { %1973 = vst [vmem:[#allocation2 + $0x4] sm:$0xff] %v1969_v26  ;;  %v4962_v59 = vadd.f32 %v1931_v63, %v4121_v36  ;;  %v1932_v17 = vsel %vm4105_vm6, %v1922_v21, 0.0  ;;  %v1906_v36 = vadd.f32 %v1905_v42, %v1887_v39  ;;  %v5054_v42 = vpop.permute.xlu2 %2117  ;;  %v5059_v39 = vpop.permute.xlu0 %2049 }
 0x647   : > { %v4967_v58 = vadd.f32 %v1932_v17, %v4127_v46  ;;  %v1597_v46 = vpop.permute.xlu1 %1596 }
 0x648   : > { %vm1947_vm13 = vcmp.gt.f32.partialorder %v4962_v59, 0.0  ;;  %v1955_v38 = vmul.f32 0.01, %v4962_v59  ;;  %v1832_v18 = vadd.f32 %v4936_v0, %v1597_v46  ;;  %v1888_v12 = vpop.f32.mrf.mxu3 }
 0x649   : > { %vm1948_vm14 = vcmp.gt.f32.partialorder %v4967_v58, 0.0  ;;  %v1956_v9 = vmul.f32 0.01, %v4967_v58  ;;  %v1889_v55 = vadd.f32 %v1888_v12, %v1597_v46 }
 0x64a   : > { %v1963_v24 = vsel %vm1947_vm13, %v4962_v59, %v1955_v38  ;;  %v1867_v1 = vpop.f32.mrf.mxu1  ;;  %v1851_v31 = vadd.f32 %v4941_v13, %v1832_v18 }
 0x64b   : > { %v1964_v40 = vsel %vm1948_vm14, %v4967_v58, %v1956_v9  ;;  %v1868_v61 = vadd.f32 %v1867_v1, %v1849_v35  ;;  %v1924_v14 = vpop.f32.mrf.mxu0 }
 0x64c   : > { %v1970_v3 = vpack.c.bf16 %v1964_v40, %v1963_v24  ;;  %v1925_v33 = vadd.f32 %v1924_v14, %v1906_v36 }
 0x64d   : > { %v1933_v43 = vsel %vm4097_vm5, %v1868_v61, 0.0  ;;  %v1907_v6 = vpop.f32.mrf.mxu2  ;;  %v3434_v45 = vld [vmem:[#allocation2 + $0x8] sm:$0xf]  ;;  %v3629_v57 = vld [vmem:[#allocation2 + $0x4] sm:$0xf] }
 0x64e   : > { %1974 = vst [vmem:[#allocation2 + $0x14] sm:$0xff] %v1970_v3  ;;  %v4979_v47 = vadd.f32 %v1933_v43, %v4135_v49  ;;  %v1934_v62 = vsel %vm4105_vm6, %v1925_v33, 0.0  ;;  %v1908_v2 = vadd.f32 %v1907_v6, %v1889_v55  ;;  %v5062_v38 = vpop.permute.xlu2 %2095  ;;  %v5069_v9 = vpop.permute.xlu0 %2111 }
 0x64f   : > { %v4984_v32 = vadd.f32 %v1934_v62, %v4142_v60  ;;  %v5036_v30 = vpop.permute.xlu1 %2011 }
 0x650   : > { %vm1949_vm11 = vcmp.gt.f32.partialorder %v4979_v47, 0.0  ;;  %v1957_v0 = vmul.f32 0.01, %v4979_v47 }
 0x651   : > { %vm1950_vm12 = vcmp.gt.f32.partialorder %v4984_v32, 0.0  ;;  %v1958_v52 = vmul.f32 0.01, %v4984_v32 }
 0x652   : > { %v1965_v49 = vsel %vm1949_vm11, %v4979_v47, %v1957_v0  ;;  %v1869_v41 = vpop.f32.mrf.mxu1 }
 0x653   : > { %v1966_v48 = vsel %vm1950_vm12, %v4984_v32, %v1958_v52  ;;  %v1870_v60 = vadd.f32 %v1869_v41, %v1851_v31  ;;  %v1926_v37 = vpop.f32.mrf.mxu0 }
 0x654   : > { %v1971_v53 = vpack.c.bf16 %v1966_v48, %v1965_v49  ;;  %v1927_v54 = vadd.f32 %v1926_v37, %v1908_v2 }
 0x655   : > { %v1935_v56 = vsel %vm4097_vm5, %v1870_v60, 0.0  ;;  %v3632_v13 = vld [vmem:[#allocation2 + $0x14] sm:$0xf0]  ;;  %v3428_v25 = vld [vmem:[#allocation2 + $0x10] sm:$0xf0] }
 0x656   : > { %1975 = vst [vmem:[#allocation2 + $0x24] sm:$0xff] %v1971_v53  ;;  %v4996_v51 = vadd.f32 %v1935_v56, %v4150_v5  ;;  %v1936_v44 = vsel %vm4105_vm6, %v1927_v54, 0.0  ;;  %v5000_v15 = vor.u32 %v3632_v13, %v3434_v45  ;;  %v3431_v50 = vor.u32 %v3629_v57, %v3428_v25  ;;  %v5075_v24 = vpop.permute.xlu2 %2203  ;;  %v5079_v1 = vpop.permute.xlu0 %2101 }
 0x657   : > { %v5003_v8 = vadd.f32 %v1936_v44, %v4158_v16  ;;  %v5048_v63 = vpop.permute.xlu1 %2017 }
 0x658   : > { %vm1951_vm13 = vcmp.gt.f32.partialorder %v4996_v51, 0.0  ;;  %v1959_v28 = vmul.f32 0.01, %v4996_v51  ;;  %2109 = vrot.lane.b32.xlu1 %v5000_v15, %s3701_s12  ;;  %2015 = vrot.lane.b32.xlu0 %v5000_v15, %s3695_s21 }
 0x659   : > { %vm1952_vm14 = vcmp.gt.f32.partialorder %v5003_v8, 0.0  ;;  %v1960_v5 = vmul.f32 0.01, %v5003_v8  ;;  %2013 = vrot.lane.b32.xlu2 %v3431_v50, %s3695_s21 }
 0x65a   : > { %v1967_v19 = vsel %vm1951_vm13, %v4996_v51, %v1959_v28 }
 0x65b   : > { %v1968_v16 = vsel %vm1952_vm14, %v5003_v8, %v1960_v5 }
 0x65c   : > { %v1972_v4 = vpack.c.bf16 %v1968_v16, %v1967_v19 }
 0x65d   : > { %v3633_v34 = vld [vmem:[#allocation2 + $0x24] sm:$0xf]  ;;  %v3446_v26 = vld [vmem:[#allocation2 + $0x28] sm:$0xf] }
 0x65e   : > { %1976 = vst [vmem:[#allocation2 + $0x34] sm:$0xff] %v1972_v4  ;;  %v5086_v14 = vpop.permute.xlu0 %2079 }
 0x65f   : > { %v2028_v17 = vpop.permute.xlu1 %2027 }
 0x660   : > { %2047 = vrot.lane.b32.xlu1 %v5000_v15, %s3697_s23  ;;  %2031 = vrot.lane.b32.xlu0 %v5000_v15, %s3700_s11 }
 0x661   : > { %2029 = vrot.lane.b32.xlu2 %v3431_v50, %s3700_s11 }
 0x665   : > { %v3440_v10 = vld [vmem:[#allocation2 + $0x30] sm:$0xf0]  ;;  %v3636_v11 = vld [vmem:[#allocation2 + $0x34] sm:$0xf0] }
 0x666   : > { %v3443_v27 = vor.u32 %v3633_v34, %v3440_v10  ;;  %v5038_v21 = vor.u32 %v3636_v11, %v3446_v26  ;;  %v5091_v33 = vpop.permute.xlu0 %2133 }
 0x667   : > { %v5067_v35 = vpop.permute.xlu1 %2033 }
 0x668   : > { %2091 = vrot.lane.b32.xlu1 %v3431_v50, %s3702_s13  ;;  %2107 = vrot.lane.b32.xlu0 %v3431_v50, %s3701_s12 }
 0x669   : > { %2093 = vrot.lane.b32.xlu2 %v5000_v15, %s3702_s13 }
 0x66f   : > { %v5077_v36 = vpop.permute.xlu1 %2085 }
 0x670   : > { %2061 = vrot.lane.b32.xlu1 %v5000_v15, %s3696_s22  ;;  %2045 = vrot.lane.b32.xlu0 %v3431_v50, %s3697_s23 }
 0x671   : > { %2075 = vrot.lane.b32.xlu2 %v3431_v50, %s3703_s14 }
 0x677   : > { %v5084_v61 = vpop.permute.xlu1 %2127 }
 0x678   : > { %2113 = vrot.lane.b32.xlu1 %v3443_v27, %s3701_s12  ;;  %2077 = vrot.lane.b32.xlu0 %v5000_v15, %s3703_s14 }
 0x679   : > { %2123 = vrot.lane.b32.xlu2 %v3431_v50, %s3704_s17 }
 0x67f   : > { %v5089_v3 = vpop.permute.xlu1 %2209 }
 0x680   : > { %2051 = vrot.lane.b32.xlu1 %v3443_v27, %s3697_s23  ;;  %2059 = vrot.lane.b32.xlu0 %v3431_v50, %s3696_s22 }
 0x681   : > { %2019 = vrot.lane.b32.xlu2 %v3443_v27, %s3695_s21 }
 0x688   : > { %2083 = vrot.lane.b32.xlu1 %v5038_v21, %s3703_s14  ;;  %2125 = vrot.lane.b32.xlu0 %v5000_v15, %s3704_s17 }
 0x689   : > { %2115 = vrot.lane.b32.xlu2 %v5038_v21, %s3701_s12 }
 0x690   : > { %2063 = vrot.lane.b32.xlu1 %v3443_v27, %s3696_s22  ;;  %2205 = vrot.lane.b32.xlu0 %v3431_v50, %s3698_s24 }
 0x691   : > { %2053 = vrot.lane.b32.xlu2 %v5038_v21, %s3697_s23 }
 0x698   : > { %2129 = vrot.lane.b32.xlu1 %v3443_v27, %s3704_s17  ;;  %2021 = vrot.lane.b32.xlu0 %v5038_v21, %s3695_s21 }
 0x699   : > { %2097 = vrot.lane.b32.xlu2 %v3443_v27, %s3702_s13 }
 0x6a0   : > { %2099 = vrot.lane.b32.xlu0 %v5038_v21, %s3702_s13 }
 0x6a1   : > { %2035 = vrot.lane.b32.xlu2 %v3443_v27, %s3700_s11 }
 0x6a8   : > { %2037 = vrot.lane.b32.xlu0 %v5038_v21, %s3700_s11 }
 0x6a9   : > { %2065 = vrot.lane.b32.xlu2 %v5038_v21, %s3696_s22 }
 0x6b0   : > { %2081 = vrot.lane.b32.xlu0 %v3443_v27, %s3703_s14 }
 0x6b1   : > { %2131 = vrot.lane.b32.xlu2 %v5038_v21, %s3704_s17 }
 0x6b3   : > { %v2014_v40 = vpop.permute.xlu2 %2013 }
 0x6b4   : > { %v2023_v11 = vsel %vm311_vm0, %v5036_v30, %v2014_v40 }
 0x6b9   : > { %2211 = vrot.lane.b32.xlu2 %v3443_v27, %s3698_s24 }
 0x6bb   : > { %v2030_v46 = vpop.permute.xlu2 %2029 }
 0x6bc   : > { %v2039_v19 = vsel %vm894_vm7, %v2028_v17, %v2030_v46 }
 0x6c3   : > { %v5093_v18 = vpop.permute.xlu2 %2093 }
 0x6ca   : > { %v5095_v12 = vpop.permute.xlu1 %2109  ;;  %v5097_v43 = vpop.permute.xlu0 %2015 }
 0x6cb   : > { %v2076_v62 = vpop.permute.xlu2 %2075  ;;  %v2024_v34 = vsel %vm311_vm0, %v2014_v40, %v5097_v43 }
 0x6d2   : > { %v2048_v6 = vpop.permute.xlu1 %2047  ;;  %v5099_v55 = vpop.permute.xlu0 %2031 }
 0x6d3   : > { %v5101_v0 = vpop.permute.xlu2 %2123  ;;  %v2040_v37 = vsel %vm894_vm7, %v2030_v46, %v5099_v55 }
 0x6da   : > { %v2092_v31 = vpop.permute.xlu1 %2091  ;;  %v2108_v52 = vpop.permute.xlu0 %2107 }
 0x6db   : > { %v5103_v49 = vpop.permute.xlu2 %2019  ;;  %2275 = vrot.lane.b32.xlu1 %v2092_v31, %s3698_s24  ;;  %2287 = vrot.lane.b32.xlu0 %v2108_v52, %s3698_s24  ;;  %v2103_v2 = vsel %vm960_vm15, %v2092_v31, %v5093_v18  ;;  %v2119_v45 = vsel %vm977_vm8, %v2108_v52, %v5095_v12  ;;  %v2120_v52 = vsel %vm977_vm8, %v5095_v12, %v5069_v9 }
 0x6dc   : > { %2277 = vrot.lane.b32.xlu2 %v2103_v2, %s3698_s24  ;;  %v2104_v9 = vsel %vm960_vm15, %v5093_v18, %v5062_v38 }
 0x6e2   : > { %v5110_v41 = vpop.permute.xlu1 %2061  ;;  %v2046_v48 = vpop.permute.xlu0 %2045 }
 0x6e3   : > { %v5112_v60 = vpop.permute.xlu2 %2115  ;;  %2263 = vrot.lane.b32.xlu1 %v2076_v62, %s3698_s24  ;;  %v2056_v44 = vsel %vm396_vm2, %v2046_v48, %v2048_v6  ;;  %v2055_v10 = vsel %vm396_vm2, %v5046_v20, %v2046_v48 }
 0x6e4   : > { %2229 = vrot.lane.b32.xlu2 %v2040_v37, %s3698_s24 }
 0x6ea   : > { %v2114_v53 = vpop.permute.xlu1 %2113  ;;  %v5118_v54 = vpop.permute.xlu0 %2077 }
 0x6eb   : > { %v2054_v57 = vpop.permute.xlu2 %2053  ;;  %2289 = vrot.lane.b32.xlu1 %v2119_v45, %s3698_s24  ;;  %v2087_v56 = vsel %vm943_vm9, %v2076_v62, %v5118_v54  ;;  %v2121_v20 = vsel %vm977_vm8, %v2114_v53, %v5112_v60 }
 0x6ec   : > { %2265 = vrot.lane.b32.xlu2 %v2087_v56, %s3698_s24 }
 0x6f2   : > { %v2052_v13 = vpop.permute.xlu1 %2051  ;;  %v2060_v25 = vpop.permute.xlu0 %2059 }
 0x6f3   : > { %v2098_v50 = vpop.permute.xlu2 %2097  ;;  %2251 = vrot.lane.b32.xlu0 %v2060_v25, %s3698_s24  ;;  %2241 = vrot.lane.b32.xlu1 %v2056_v44, %s3698_s24  ;;  %v2067_v26 = vsel %vm425_vm1, %v2060_v25, %v5110_v41  ;;  %v2058_v31 = vsel %vm396_vm2, %v2052_v13, %v2054_v57 }
 0x6f4   : > { %2281 = vrot.lane.b32.xlu2 %v2098_v50, %s3698_s24 }
 0x6fa   : > { %v5130_v28 = vpop.permute.xlu1 %2083  ;;  %v5132_v5 = vpop.permute.xlu0 %2125 }
 0x6fb   : > { %2243 = vrot.lane.b32.xlu0 %v2048_v6, %s3698_s24  ;;  %2227 = vrot.lane.b32.xlu1 %v2039_v19, %s3698_s24  ;;  %v2036_v46 = vpop.permute.xlu2 %2035  ;;  %v2057_v6 = vsel %vm396_vm2, %v5059_v39, %v2052_v13 }
 0x6fc   : > { %v2041_v39 = vsel %vm894_vm7, %v5067_v35, %v2036_v46  ;;  %v2025_v35 = vsel %vm311_vm0, %v5048_v63, %v5103_v49  ;;  %v2122_v63 = vsel %vm977_vm8, %v5112_v60, %v5054_v42  ;;  %v2135_v60 = vsel %vm994_vm10, %v5101_v0, %v5132_v5 }
 0x702   : > { %v2064_v16 = vpop.permute.xlu1 %2063  ;;  %v5137_v4 = vpop.permute.xlu0 %2205 }
 0x703   : > { %2239 = vrot.lane.b32.xlu0 %v2055_v10, %s3698_s24  ;;  %2217 = vrot.lane.b32.xlu1 %v2024_v34, %s3698_s24  ;;  %v2066_v30 = vpop.permute.xlu2 %2065  ;;  %v3467_v34 = vld [vmem:[%s5818_s2 + $0x78] sm:$0xff] }
 0x704   : > { %2257 = vrot.lane.b32.xlu2 %v2064_v16, %s3698_s24 }
 0x70a   : > { %v2022_v27 = vpop.permute.xlu0 %2021 }
 0x70b   : > { %2215 = vrot.lane.b32.xlu0 %v2023_v11, %s3698_s24  ;;  %2253 = vrot.lane.b32.xlu1 %v2067_v26, %s3698_s24  ;;  %v2132_v48 = vpop.permute.xlu2 %2131  ;;  %v2026_v38 = vsel %vm311_vm0, %v5103_v49, %v2022_v27 }
 0x70c   : > { %2295 = vrot.lane.b32.xlu2 %v2121_v20, %s3698_s24 }
 0x712   : > { %v2100_v17 = vpop.permute.xlu0 %2099 }
 0x713   : > { %2293 = vrot.lane.b32.xlu1 %v2114_v53, %s3698_s24  ;;  %v2105_v2 = vsel %vm960_vm15, %v2098_v50, %v2100_v17  ;;  %v5182_v12 = vpop.permute.xlu2 %2211  ;;  %v2106_v13 = vsel %vm960_vm15, %v2100_v17, %v5079_v1  ;;  %v2136_v1 = vsel %vm994_vm10, %v5132_v5, %v5084_v61 }
 0x71a   : > { %v2038_v62 = vpop.permute.xlu0 %2037 }
 0x71b   : > { %2249 = vrot.lane.b32.xlu1 %v2054_v57, %s3698_s24  ;;  %2237 = vrot.lane.b32.xlu2 %v2038_v62, %s3698_s24  ;;  %v2042_v53 = vsel %vm894_vm7, %v2036_v46, %v2038_v62  ;;  %v2130_v57 = vpop.permute.xlu1 %2129 }
 0x722   : > { %v2082_v40 = vpop.permute.xlu0 %2081 }
 0x723   : > { %2269 = vrot.lane.b32.xlu0 %v2082_v40, %s3698_s24  ;;  %2245 = vrot.lane.b32.xlu1 %v2057_v6, %s3698_s24  ;;  %v2089_v37 = vsel %vm943_vm9, %v2082_v40, %v5130_v28 }
 0x724   : > { %2247 = vrot.lane.b32.xlu2 %v2058_v31, %s3698_s24 }
 0x72b   : > { %2291 = vrot.lane.b32.xlu1 %v2120_v52, %s3698_s24  ;;  %2283 = vrot.lane.b32.xlu0 %v2105_v2, %s3698_s24 }
 0x72c   : > { %2233 = vrot.lane.b32.xlu2 %v2041_v39, %s3698_s24 }
 0x733   : > { %2271 = vrot.lane.b32.xlu1 %v2089_v37, %s3698_s24  ;;  %2235 = vrot.lane.b32.xlu0 %v2042_v53, %s3698_s24 }
 0x734   : > { %2279 = vrot.lane.b32.xlu2 %v2104_v9, %s3698_s24 }
 0x736   : > { %v5191_v45 = vpop.permute.xlu2 %2277 }
 0x73b   : > { %2231 = vrot.lane.b32.xlu1 %v5099_v55, %s3698_s24  ;;  %2225 = vrot.lane.b32.xlu0 %v2022_v27, %s3698_s24  ;;  %v2068_v55 = vsel %vm425_vm1, %v2064_v16, %v2066_v30  ;;  %v3465_v16 = vld [vmem:[%s5818_s2 + $0x68] sm:$0xff] }
 0x73c   : > { %2221 = vrot.lane.b32.xlu2 %v2025_v35, %s3698_s24 }
 0x73e   : > { %v5199_v18 = vpop.permute.xlu2 %2229 }
 0x743   : > { %2305 = vrot.lane.b32.xlu1 %v2130_v57, %s3698_s24  ;;  %2223 = vrot.lane.b32.xlu0 %v2026_v38, %s3698_s24 }
 0x744   : > { %2219 = vrot.lane.b32.xlu2 %v5097_v43, %s3698_s24  ;;  %v2090_v43 = vsel %vm943_vm9, %v5130_v28, %v5077_v36  ;;  %v2137_v36 = vsel %vm994_vm10, %v2130_v57, %v2132_v48  ;;  %v3464_v28 = vld [vmem:[%s5818_s2 + $0x60] sm:$0xff] }
 0x746   : > { %v5211_v56 = vpop.permute.xlu2 %2265 }
 0x74b   : > { %2213 = vrot.lane.b32.xlu1 %v5038_v21, %s3698_s24  ;;  %2259 = vrot.lane.b32.xlu0 %v2068_v55, %s3698_s24  ;;  %v2088_v21 = vsel %vm943_vm9, %v5118_v54, %v5086_v14 }
 0x74c   : > { %2297 = vrot.lane.b32.xlu2 %v2122_v63, %s3698_s24 }
 0x74d   : > { %v5209_v49 = vpop.permute.xlu1 %2275  ;;  %v2288_v50 = vpop.permute.xlu0 %2287 }
 0x74e   : > { %v2282_v14 = vpop.permute.xlu2 %2281  ;;  %v2335_v55 = vsel %vm598_vm3, %v5209_v49, %v5191_v45 }
 0x753   : > { %2273 = vrot.lane.b32.xlu1 %v2090_v43, %s3698_s24  ;;  %2267 = vrot.lane.b32.xlu0 %v2088_v21, %s3698_s24 }
 0x754   : > { %2261 = vrot.lane.b32.xlu2 %v2066_v30, %s3698_s24 }
 0x755   : > { %v5222_v42 = vpop.permute.xlu1 %2263 }
 0x756   : > { %v2331_v49 = vsel %vm598_vm3, %v5222_v42, %v5211_v56 }
 0x75b   : > { %2301 = vrot.lane.b32.xlu1 %v2135_v60, %s3698_s24  ;;  %2285 = vrot.lane.b32.xlu0 %v2106_v13, %s3698_s24 }
 0x75c   : > { %2307 = vrot.lane.b32.xlu2 %v2137_v36, %s3698_s24 }
 0x75d   : > { %v5233_v54 = vpop.permute.xlu1 %2289 }
 0x75e   : > { %v5242_v25 = vpop.permute.xlu2 %2257 }
 0x763   : > { %2255 = vrot.lane.b32.xlu1 %v5110_v41, %s3698_s24  ;;  %2299 = vrot.lane.b32.xlu0 %v5101_v0, %s3698_s24  ;;  %v3466_v41 = vld [vmem:[%s5818_s2 + $0x70] sm:$0xff]  ;;  %v2138_v0 = vsel %vm994_vm10, %v2132_v48, %v5091_v33 }
 0x764   : > { %2303 = vrot.lane.b32.xlu2 %v2136_v1, %s3698_s24 }
 0x765   : > { %v2242_v44 = vpop.permute.xlu1 %2241  ;;  %v5256_v19 = vpop.permute.xlu0 %2251 }
 0x766   : > { %v5254_v5 = vpop.permute.xlu2 %2295 }
 0x76b   : > { %2155 = vperm.xlu1 %3684, %v3464_v28   ;;  %2309 = vrot.lane.b32.xlu0 %v2138_v0, %s3698_s24 }
 0x76c   : > { %2165 = vperm.xlu2 %3685, %v3466_v41  }
 0x76d   : > { %v2228_v61 = vpop.permute.xlu1 %2227  ;;  %v2244_v27 = vpop.permute.xlu0 %2243 }
 0x76e   : > { %v2324_v52 = vsel %vm598_vm3, %v2242_v44, %v2244_v27 }
 0x773   : > { %2207 = vrot.lane.b32.xlu0 %v5000_v15, %s3698_s24  ;;  %v2339_v15 = vsel %vm598_vm3, %v2288_v50, %v5233_v54 }
 0x774   : > { %2160 = vperm.xlu2 %3685, %v3465_v16  }
 0x775   : > { %v5263_v10 = vpop.permute.xlu1 %2217  ;;  %v2238_v33 = vpop.permute.xlu2 %2237 }
 0x776   : > { %v2240_v20 = vpop.permute.xlu0 %2239 }
 0x777   : > { %v2323_v53 = vsel %vm598_vm3, %v2240_v20, %v2242_v44  ;;  %v2313_v20 = vsel %vm598_vm3, %v5089_v3, %v5182_v12  ;;  %v3637_v3 = vld [vmem:[%s5817_s1 + $0x94] sm:$0xf] }
 0x77b   : > { %2170 = vperm.xlu0 %3686, %v3467_v34  }
 0x77d   : > { %v5268_v11 = vpop.permute.xlu1 %2253 }
 0x77e   : > { %v2248_v26 = vpop.permute.xlu2 %2247  ;;  %v2216_v30 = vpop.permute.xlu0 %2215 }
 0x77f   : > { %v2315_v34 = vsel %vm598_vm3, %v2216_v30, %v5263_v10 }
 0x785   : > { %v2294_v17 = vpop.permute.xlu1 %2293 }
 0x786   : > { %v2341_v46 = vsel %vm598_vm3, %v2294_v17, %v5254_v5  ;;  %v2234_v62 = vpop.permute.xlu2 %2233 }
 0x787   : > { %2408 = vmatpush.bf16.msra.mxu3 %v2341_v46 }
 0x78b   : > { %2409 = vmatpush.bf16.msra.mxu3 %v2339_v15  ;;  %v2327_v15 = vsel %vm598_vm3, %v5256_v19, %v5268_v11 }
 0x78d   : > { %v2250_v40 = vpop.permute.xlu1 %2249 }
 0x78e   : > { %v2326_v6 = vsel %vm598_vm3, %v2248_v26, %v2250_v40  ;;  %v5275_v31 = vpop.permute.xlu2 %2279 }
 0x78f   : > { %2446 = vmatpush.bf16.msrb.mxu0 %v2326_v6 }
 0x793   : > { %2447 = vmatpush.bf16.msrb.mxu0 %v2324_v52 }
 0x795   : > { %v2270_v2 = vpop.permute.xlu0 %2269  ;;  %v2246_v39 = vpop.permute.xlu1 %2245 }
 0x796   : > { %v2325_v48 = vsel %vm598_vm3, %v2246_v39, %v2248_v26  ;;  %v2222_v37 = vpop.permute.xlu2 %2221 }
 0x797   : > { %2389 = vmatpush.bf16.msrb.mxu1 %v2325_v48  ;;  %v3641_v48 = vld [vmem:[%s5817_s1 + $0xb0] sm:$0xf0] }
 0x79b   : > { %2390 = vmatpush.bf16.msrb.mxu1 %v2323_v53  ;;  %v2336_v53 = vsel %vm598_vm3, %v5191_v45, %v5275_v31 }
 0x79d   : > { %v2292_v9 = vpop.permute.xlu1 %2291  ;;  %v5280_v35 = vpop.permute.xlu0 %2283 }
 0x79e   : > { %v2220_v57 = vpop.permute.xlu2 %2219  ;;  %v2337_v38 = vsel %vm598_vm3, %v2282_v14, %v5280_v35  ;;  %v2319_v14 = vsel %vm598_vm3, %v2228_v61, %v5199_v18 }
 0x79f   : > { %2410 = vmatpush.bf16.msra.mxu3 %v2337_v38  ;;  %v3639_v38 = vld [vmem:[%s5817_s1 + $0xa0] sm:$0xf0] }
 0x7a3   : > { %2411 = vmatpush.bf16.msra.mxu3 %v2335_v55 }
 0x7a5   : > { %v5287_v63 = vpop.permute.xlu1 %2271  ;;  %v2236_v43 = vpop.permute.xlu0 %2235 }
 0x7a6   : > { %v2298_v21 = vpop.permute.xlu2 %2297  ;;  %v2321_v60 = vsel %vm598_vm3, %v2234_v62, %v2236_v43  ;;  %v2333_v13 = vsel %vm598_vm3, %v2270_v2, %v5287_v63  ;;  %v2322_v36 = vsel %vm598_vm3, %v2236_v43, %v2238_v33  ;;  %v3470_v62 = vld [vmem:[%s5817_s1 + $0x90] sm:$0xf] }
 0x7a7   : > { %2391 = vmatpush.bf16.msrb.mxu1 %v2321_v60  ;;  %2412 = vmatpush.bf16.msra.mxu3 %v2333_v13  ;;  %v2342_v6 = vsel %vm598_vm3, %v5254_v5, %v2298_v21  ;;  %v3482_v5 = vld [vmem:[%s5817_s1 + $0xa8] sm:$0xf]  ;;  %v3498_v13 = vld [vmem:[#allocation2] sm:$0xf] }
 0x7a8   : > { %2448 = vmatpush.bf16.msrb.mxu0 %v2322_v36  ;;  %v3645_v36 = vld [vmem:[#allocation2 + $0xc] sm:$0xf0] }
 0x7ab   : > { %2392 = vmatpush.bf16.msrb.mxu1 %v2319_v14  ;;  %2413 = vmatpush.bf16.msra.mxu3 %v2331_v49  ;;  %v3499_v14 = vor.u32 %v3645_v36, %v3498_v13 }
 0x7ad   : > { %v2232_v1 = vpop.permute.xlu1 %2231  ;;  %v2226_v44 = vpop.permute.xlu0 %2225  ;;  %2577 = vrot.lane.b32.xlu0 %v3499_v14, %s3695_s21  ;;  %2593 = vrot.lane.b32.xlu2 %v3499_v14, %s3700_s11 }
 0x7ae   : > { %v5298_v50 = vpop.permute.xlu2 %2261  ;;  %v2320_v28 = vsel %vm598_vm3, %v5199_v18, %v2232_v1  ;;  %v2316_v18 = vsel %vm598_vm3, %v5263_v10, %v2220_v57  ;;  %v3638_v10 = vld [vmem:[%s5817_s1 + $0x98] sm:$0xf0]  ;;  %v3478_v57 = vld [vmem:[%s5817_s1 + $0x98] sm:$0xf]  ;;  %2769 = vrot.lane.b32.xlu1 %v3499_v14, %s3698_s24 }
 0x7af   : > { %2449 = vmatpush.bf16.msrb.mxu0 %v2320_v28  ;;  %v5337_v30 = vor.u32 %v3638_v10, %v3470_v62  ;;  %v3479_v31 = vor.u32 %v3639_v38, %v3478_v57  ;;  %v3649_v28 = vld [vmem:[#allocation2 + $0x2c] sm:$0xf0] }
 0x7b5   : > { %v2306_v41 = vpop.permute.xlu1 %2305  ;;  %v2224_v0 = vpop.permute.xlu0 %2223 }
 0x7b6   : > { %v5302_v16 = vpop.permute.xlu2 %2307  ;;  %v2317_v61 = vsel %vm598_vm3, %v2222_v37, %v2224_v0  ;;  %v2318_v33 = vsel %vm598_vm3, %v2224_v0, %v2226_v44  ;;  %v3640_v37 = vld [vmem:[%s5817_s1 + $0xac] sm:$0xf]  ;;  %v3510_v44 = vld [vmem:[#allocation2 + $0x20] sm:$0xf] }
 0x7b7   : > { %v2345_v42 = vsel %vm598_vm3, %v2306_v41, %v5302_v16  ;;  %2393 = vmatpush.bf16.msrb.mxu1 %v2317_v61  ;;  %2450 = vmatpush.bf16.msrb.mxu0 %v2318_v33  ;;  %v3511_v0 = vor.u32 %v3649_v28, %v3510_v44 }
 0x7b8   : > { %2433 = vmatpush.bf16.msrb.mxu2 %v2345_v42 }
 0x7b9   : > { %2583 = vrot.lane.b32.xlu0 %v3511_v0, %s3695_s21 }
 0x7bb   : > { %2394 = vmatpush.bf16.msrb.mxu1 %v2315_v34  ;;  %2451 = vmatpush.bf16.msrb.mxu0 %v2316_v18  ;;  %v3648_v18 = vld [vmem:[#allocation2 + $0x2c] sm:$0xf] }
 0x7bd   : > { %v2214_v27 = vpop.permute.xlu1 %2213  ;;  %v2260_v26 = vpop.permute.xlu0 %2259 }
 0x7be   : > { %v2329_v17 = vsel %vm598_vm3, %v5242_v25, %v2260_v26  ;;  %v2314_v46 = vsel %vm598_vm3, %v5182_v12, %v2214_v27  ;;  %v3472_v25 = vld [vmem:[%s5817_s1 + $0x9c] sm:$0xf0]  ;;  %v2311_v12 = vsel %vm598_vm3, %v5075_v24, %v5137_v4  ;;  %v2340_v24 = vsel %vm598_vm3, %v5233_v54, %v2292_v9  ;;  %v3484_v54 = vld [vmem:[%s5817_s1 + $0xb4] sm:$0xf0]  ;;  %v2304_v41 = vpop.permute.xlu2 %2303 }
 0x7bf   : > { %2395 = vmatpush.bf16.msrb.mxu1 %v2313_v20  ;;  %2414 = vmatpush.bf16.msra.mxu3 %v2329_v17  ;;  %v5339_v40 = vor.u32 %v3637_v3, %v3472_v25  ;;  %v3483_v9 = vor.u32 %v3641_v48, %v3482_v5  ;;  %v2330_v1 = vsel %vm598_vm3, %v2260_v26, %v5298_v50  ;;  %v3490_v50 = vld [vmem:[%s5817_s1 + $0xb0] sm:$0xf]  ;;  %v3644_v20 = vld [vmem:[#allocation2 + $0xc] sm:$0xf]  ;;  %v3520_v17 = vld [vmem:[#allocation2 + $0x18] sm:$0xf0] }
 0x7c0   : > { %2452 = vmatpush.bf16.msrb.mxu0 %v2314_v46  ;;  %v3523_v46 = vor.u32 %v3644_v20, %v3520_v17 }
 0x7c1   : > { %2615 = vrot.lane.b32.xlu0 %v3511_v0, %s3697_s23 }
 0x7c3   : > { %2396 = vmatpush.bf16.msrb.mxu1 %v2311_v12  ;;  %2415 = vmatpush.bf16.msra.mxu3 %v2327_v15 }
 0x7c5   : > { %v2268_v52 = vpop.permute.xlu0 %2267  ;;  %v2274_v19 = vpop.permute.xlu1 %2273 }
 0x7c6   : > { %2397 = vmatmul.bf16.vlgmr.msrb.gmra.mxu1 %v5337_v30  ;;  %2416 = vmatmul.bf16.vlgmr.msra.gmra.mxu3 %v5339_v40  ;;  %v2334_v45 = vsel %vm598_vm3, %v5287_v63, %v2274_v19  ;;  %v2332_v60 = vsel %vm598_vm3, %v5211_v56, %v2268_v52 }
 0x7c7   : > { %2465 = vmatpush.bf16.msra.mxu1 %v2342_v6 }
 0x7c9   : > { %2609 = vrot.lane.b32.xlu0 %v3499_v14, %s3697_s23 }
 0x7cb   : > { %2466 = vmatpush.bf16.msra.mxu1 %v2340_v24 }
 0x7cd   : > { %v2286_v2 = vpop.permute.xlu0 %2285  ;;  %v2302_v55 = vpop.permute.xlu1 %2301 }
 0x7ce   : > { %v2338_v39 = vsel %vm598_vm3, %v5280_v35, %v2286_v2  ;;  %v3487_v35 = vor.u32 %v3640_v37, %v3484_v54  ;;  %v2344_v33 = vsel %vm598_vm3, %v2302_v55, %v2304_v41 }
 0x7cf   : > { %2467 = vmatpush.bf16.msra.mxu1 %v2338_v39 }
 0x7d1   : > { %2599 = vrot.lane.b32.xlu0 %v3511_v0, %s3700_s11 }
 0x7d3   : > { %2468 = vmatpush.bf16.msra.mxu1 %v2336_v53 }
 0x7d5   : > { %v2300_v43 = vpop.permute.xlu0 %2299  ;;  %v2256_v56 = vpop.permute.xlu1 %2255 }
 0x7d6   : > { %2402 = vmatmul.bf16.gmra.mxu1 %v3483_v9  ;;  %2421 = vmatmul.bf16.gmra.mxu3 %v3487_v35  ;;  %v2343_v21 = vsel %vm598_vm3, %v2300_v43, %v2302_v55  ;;  %v2328_v61 = vsel %vm598_vm3, %v5268_v11, %v2256_v56 }
 0x7d7   : > { %2434 = vmatpush.bf16.msrb.mxu2 %v2343_v21  ;;  %2469 = vmatpush.bf16.msra.mxu1 %v2334_v45 }
 0x7da   : > { %3492 = vmatmul.msk.bf16.vlgmr.msrb.gmra.mxu2 %vm671_vm4, %v3479_v31 }
 0x7db   : > { %2470 = vmatpush.bf16.msra.mxu1 %v2332_v60 }
 0x7dd   : > { %v2310_v49 = vpop.permute.xlu0 %2309  ;;  %v2156_v6 = vpop.permute.xlu1 %2155 }
 0x7de   : > { %v2346_v63 = vsel %vm598_vm3, %v5302_v16, %v2310_v49  ;;  %v3642_v16 = vld [vmem:[%s5817_s1 + $0xb8] sm:$0xf0] }
 0x7df   : > { %2471 = vmatpush.bf16.msra.mxu1 %v2330_v1  ;;  %2490 = vmatpush.bf16.msrb.mxu3 %v2346_v63  ;;  %v3491_v34 = vor.u32 %v3642_v16, %v3490_v50 }
 0x7e3   : > { %2472 = vmatpush.bf16.msra.mxu1 %v2328_v61  ;;  %2491 = vmatpush.bf16.msrb.mxu3 %v2344_v33 }
 0x7e5   : > { %v2208_v42 = vpop.permute.xlu0 %2207 }
 0x7e6   : > { %3494 = vmatmul.msk.bf16.vlgmr.msrb.gmra.mxu3 %vm671_vm4, %v3479_v31  ;;  %v2312_v11 = vsel %vm598_vm3, %v5137_v4, %v2208_v42  ;;  %2473 = vmatmul.bf16.vlgmr.msra.gmra.mxu1 %v5339_v40  ;;  %v3524_v4 = vld [vmem:[#allocation2 + $0x38] sm:$0xf0]  ;;  %v2166_v40 = vpop.permute.xlu2 %2165 }
 0x7e7   : > { %2453 = vmatpush.bf16.msrb.mxu0 %v2312_v11  ;;  %v3527_v27 = vor.u32 %v3648_v18, %v3524_v4 }
 0x7e9   : > { %2667 = vrot.lane.b32.xlu0 %v3527_v27, %s3702_s13  ;;  %2683 = vrot.lane.b32.xlu2 %v3527_v27, %s3701_s12 }
 0x7ea   : > { %3493 = vmatmul.msk.bf16.gmra.mxu2 %vm671_vm4, %v3491_v34  ;;  %2454 = vmatmul.bf16.vlgmr.msrb.gmra.mxu0 %v5337_v30 }
 0x7ed   : > { %v2171_v4 = vpop.permute.xlu0 %2170 }
 0x7ee   : > { %v2161_v54 = vpop.permute.xlu2 %2160 }
 0x7f1   : > { %2661 = vrot.lane.b32.xlu0 %v3523_v46, %s3702_s13  ;;  %2677 = vrot.lane.b32.xlu2 %v3523_v46, %s3701_s12 }
 0x7f6   : > { %3495 = vmatmul.msk.bf16.gmra.mxu3 %vm671_vm4, %v3491_v34  ;;  %2478 = vmatmul.bf16.gmra.mxu1 %v3487_v35 }
 0x7f9   : > { %2651 = vrot.lane.b32.xlu0 %v3527_v27, %s3703_s14  ;;  %2645 = vrot.lane.b32.xlu2 %v3523_v46, %s3703_s14 }
 0x7fa   : > { %2459 = vmatmul.bf16.gmra.mxu0 %v3483_v9 }
 0x801   : > { %2775 = vrot.lane.b32.xlu0 %v3511_v0, %s3698_s24  ;;  %2699 = vrot.lane.b32.xlu2 %v3527_v27, %s3704_s17 }
 0x809   : > { %2693 = vrot.lane.b32.xlu0 %v3523_v46, %s3704_s17 }
 0x843   : > { %v2398_v26 = vpop.f32.mrf.mxu1 }
 0x844   : > { %v2399_v24 = vadd.f32 %v2398_v26, %v2156_v6 }
 0x849   : > { %v2417_v62 = vpop.f32.mrf.mxu3 }
 0x84a   : > { %v2418_v2 = vadd.f32 %v2417_v62, %v2399_v24 }
 0x84b   : > { %v2400_v10 = vpop.f32.mrf.mxu1 }
 0x84c   : > { %v2401_v9 = vadd.f32 %v2400_v10, %v2161_v54 }
 0x851   : > { %v2419_v3 = vpop.f32.mrf.mxu3 }
 0x852   : > { %v2420_v38 = vadd.f32 %v2419_v3, %v2401_v9 }
 0x853   : > { %v2403_v25 = vpop.f32.mrf.mxu1 }
 0x854   : > { %v2404_v44 = vadd.f32 %v2403_v25, %v2166_v40 }
 0x859   : > { %v2422_v12 = vpop.f32.mrf.mxu3 }
 0x85a   : > { %v2423_v0 = vadd.f32 %v2422_v12, %v2404_v44 }
 0x85b   : > { %v2405_v15 = vpop.f32.mrf.mxu1 }
 0x85c   : > { %v2406_v17 = vadd.f32 %v2405_v15, %v2171_v4 }
 0x85d   : > { %v2436_v30 = vpop.f32.mrf.mxu2 }
 0x85e   : > { %v2437_v39 = vadd.f32 %v2436_v30, %v2418_v2 }
 0x860   : > { %v2503_v35 = vsel %vm4097_vm5, %v2437_v39, 0.0 }
 0x861   : > { %v2424_v52 = vpop.f32.mrf.mxu3  ;;  %v2519_v43 = vmul.f32 0.01, %v2503_v35  ;;  %vm2511_vm11 = vcmp.gt.f32.partialorder %v2503_v35, 0.0 }
 0x862   : > { %v2425_v25 = vadd.f32 %v2424_v52, %v2406_v17 }
 0x863   : > { %v2474_v19 = vpop.f32.mrf.mxu1  ;;  %v2527_v14 = vsel %vm2511_vm11, %v2503_v35, %v2519_v43 }
 0x865   : > { %v2438_v5 = vpop.f32.mrf.mxu2 }
 0x866   : > { %v2439_v45 = vadd.f32 %v2438_v5, %v2420_v38 }
 0x867   : > { %v2455_v48 = vpop.f32.mrf.mxu0 }
 0x868   : > { %v2456_v37 = vadd.f32 %v2455_v48, %v2156_v6  ;;  %v2505_v28 = vsel %vm4097_vm5, %v2439_v45, 0.0 }
 0x869   : > { %v2493_v53 = vpop.f32.mrf.mxu3  ;;  %v2521_v33 = vmul.f32 0.01, %v2505_v28  ;;  %vm2513_vm13 = vcmp.gt.f32.partialorder %v2505_v28, 0.0 }
 0x86a   : > { %v2475_v57 = vadd.f32 %v2474_v19, %v2456_v37 }
 0x86b   : > { %v2476_v21 = vpop.f32.mrf.mxu1  ;;  %v2529_v27 = vsel %vm2513_vm13, %v2505_v28, %v2521_v33 }
 0x86c   : > { %v2494_v55 = vadd.f32 %v2493_v53, %v2475_v57 }
 0x86d   : > { %v2441_v63 = vpop.f32.mrf.mxu2 }
 0x86e   : > { %v2504_v31 = vsel %vm4105_vm6, %v2494_v55, 0.0  ;;  %v2442_v16 = vadd.f32 %v2441_v63, %v2423_v0 }
 0x86f   : > { %vm2512_vm12 = vcmp.gt.f32.partialorder %v2504_v31, 0.0  ;;  %v2520_v60 = vmul.f32 0.01, %v2504_v31  ;;  %v2457_v13 = vpop.f32.mrf.mxu0 }
 0x870   : > { %v2458_v36 = vadd.f32 %v2457_v13, %v2161_v54  ;;  %v2507_v46 = vsel %vm4097_vm5, %v2442_v16, 0.0 }
 0x871   : > { %v2528_v49 = vsel %vm2512_vm12, %v2504_v31, %v2520_v60  ;;  %v2495_v1 = vpop.f32.mrf.mxu3  ;;  %v2523_v30 = vmul.f32 0.01, %v2507_v46  ;;  %vm2515_vm11 = vcmp.gt.f32.partialorder %v2507_v46, 0.0 }
 0x872   : > { %v2535_v56 = vpack.c.bf16 %v2528_v49, %v2527_v14  ;;  %v2477_v41 = vadd.f32 %v2476_v21, %v2458_v36  ;;  %v5439_v14 = vpop.permute.xlu0 %2577 }
 0x873   : > { %v2479_v50 = vpop.f32.mrf.mxu1  ;;  %v2531_v39 = vsel %vm2515_vm11, %v2507_v46, %v2523_v30 }
 0x874   : > { %2539 = vst [vmem:[#allocation2 + $0x4] sm:$0xff] %v2535_v56  ;;  %v2496_v61 = vadd.f32 %v2495_v1, %v2477_v41 }
 0x875   : > { %v2443_v3 = vpop.f32.mrf.mxu2 }
 0x876   : > { %v2506_v42 = vsel %vm4105_vm6, %v2496_v61, 0.0  ;;  %v2444_v6 = vadd.f32 %v2443_v3, %v2425_v25  ;;  %v5463_v61 = vpop.permute.xlu2 %2593 }
 0x877   : > { %vm2514_vm14 = vcmp.gt.f32.partialorder %v2506_v42, 0.0  ;;  %v2522_v11 = vmul.f32 0.01, %v2506_v42  ;;  %v2460_v34 = vpop.f32.mrf.mxu0 }
 0x878   : > { %v2461_v18 = vadd.f32 %v2460_v34, %v2166_v40  ;;  %v2509_v37 = vsel %vm4097_vm5, %v2444_v6, 0.0 }
 0x879   : > { %v2530_v26 = vsel %vm2514_vm14, %v2506_v42, %v2522_v11  ;;  %v2498_v20 = vpop.f32.mrf.mxu3  ;;  %v2525_v21 = vmul.f32 0.01, %v2509_v37  ;;  %vm2517_vm13 = vcmp.gt.f32.partialorder %v2509_v37, 0.0 }
 0x87a   : > { %v2536_v62 = vpack.c.bf16 %v2530_v26, %v2529_v27  ;;  %v2480_v10 = vadd.f32 %v2479_v50, %v2461_v18  ;;  %v5448_v49 = vpop.permute.xlu0 %2583 }
 0x87b   : > { %v2481_v2 = vpop.f32.mrf.mxu1  ;;  %v3506_v53 = vld [vmem:[#allocation2 + $0x8] sm:$0xf]  ;;  %v3643_v35 = vld [vmem:[#allocation2 + $0x4] sm:$0xf]  ;;  %v2533_v60 = vsel %vm2517_vm13, %v2509_v37, %v2525_v21 }
 0x87c   : > { %2540 = vst [vmem:[#allocation2 + $0x14] sm:$0xff] %v2536_v62  ;;  %v2499_v12 = vadd.f32 %v2498_v20, %v2480_v10  ;;  %v5509_v62 = vpop.permute.xlu1 %2769 }
 0x87e   : > { %v2508_v40 = vsel %vm4105_vm6, %v2499_v12, 0.0  ;;  %v5471_v50 = vpop.permute.xlu2 %2683 }
 0x87f   : > { %vm2516_vm12 = vcmp.gt.f32.partialorder %v2508_v40, 0.0  ;;  %v2524_v24 = vmul.f32 0.01, %v2508_v40  ;;  %v2462_v19 = vpop.f32.mrf.mxu0 }
 0x880   : > { %v2463_v15 = vadd.f32 %v2462_v19, %v2171_v4 }
 0x881   : > { %v2532_v5 = vsel %vm2516_vm12, %v2508_v40, %v2524_v24  ;;  %v2500_v48 = vpop.f32.mrf.mxu3 }
 0x882   : > { %v2537_v52 = vpack.c.bf16 %v2532_v5, %v2531_v39  ;;  %v2482_v54 = vadd.f32 %v2481_v2, %v2463_v15  ;;  %v5456_v28 = vpop.permute.xlu0 %2615 }
 0x883   : > { %v3646_v9 = vld [vmem:[#allocation2 + $0x14] sm:$0xf0]  ;;  %v3500_v57 = vld [vmem:[#allocation2 + $0x10] sm:$0xf0] }
 0x884   : > { %2541 = vst [vmem:[#allocation2 + $0x24] sm:$0xff] %v2537_v52  ;;  %v2501_v38 = vadd.f32 %v2500_v48, %v2482_v54  ;;  %v5426_v55 = vor.u32 %v3646_v9, %v3506_v53  ;;  %v3503_v43 = vor.u32 %v3643_v35, %v3500_v57 }
 0x886   : > { %v2510_v45 = vsel %vm4105_vm6, %v2501_v38, 0.0  ;;  %2581 = vrot.lane.b32.xlu2 %v5426_v55, %s3695_s21  ;;  %2595 = vrot.lane.b32.xlu0 %v3503_v43, %s3700_s11  ;;  %v5479_v42 = vpop.permute.xlu2 %2677 }
 0x887   : > { %vm2518_vm14 = vcmp.gt.f32.partialorder %v2510_v45, 0.0  ;;  %v2526_v31 = vmul.f32 0.01, %v2510_v45  ;;  %2579 = vrot.lane.b32.xlu1 %v3503_v43, %s3695_s21 }
 0x889   : > { %v2534_v13 = vsel %vm2518_vm14, %v2510_v45, %v2526_v31 }
 0x88a   : > { %v2538_v36 = vpack.c.bf16 %v2534_v13, %v2533_v60  ;;  %v2610_v33 = vpop.permute.xlu0 %2609 }
 0x88b   : > { %v3647_v1 = vld [vmem:[#allocation2 + $0x24] sm:$0xf]  ;;  %v3518_v41 = vld [vmem:[#allocation2 + $0x28] sm:$0xf] }
 0x88c   : > { %2542 = vst [vmem:[#allocation2 + $0x34] sm:$0xff] %v2538_v36 }
 0x88e   : > { %2613 = vrot.lane.b32.xlu2 %v5426_v55, %s3697_s23  ;;  %2675 = vrot.lane.b32.xlu0 %v5426_v55, %s3701_s12  ;;  %v5486_v34 = vpop.permute.xlu2 %2645 }
 0x88f   : > { %2611 = vrot.lane.b32.xlu1 %v3503_v43, %s3697_s23 }
 0x892   : > { %v5473_v16 = vpop.permute.xlu0 %2599 }
 0x893   : > { %v3512_v63 = vld [vmem:[#allocation2 + $0x30] sm:$0xf0]  ;;  %v3650_v56 = vld [vmem:[#allocation2 + $0x34] sm:$0xf0] }
 0x894   : > { %v3515_v44 = vor.u32 %v3647_v1, %v3512_v63  ;;  %v5458_v0 = vor.u32 %v3650_v56, %v3518_v41 }
 0x896   : > { %2673 = vrot.lane.b32.xlu2 %v3503_v43, %s3701_s12  ;;  %2657 = vrot.lane.b32.xlu0 %v3503_v43, %s3702_s13  ;;  %v5494_v4 = vpop.permute.xlu2 %2699 }
 0x897   : > { %2597 = vrot.lane.b32.xlu1 %v5426_v55, %s3700_s11 }
 0x89a   : > { %v5483_v11 = vpop.permute.xlu0 %2667 }
 0x89e   : > { %2643 = vrot.lane.b32.xlu2 %v5426_v55, %s3703_s14  ;;  %2625 = vrot.lane.b32.xlu0 %v3503_v43, %s3696_s22 }
 0x89f   : > { %2659 = vrot.lane.b32.xlu1 %v5426_v55, %s3702_s13 }
 0x8a2   : > { %v5491_v18 = vpop.permute.xlu0 %2661 }
 0x8a6   : > { %2691 = vrot.lane.b32.xlu2 %v5426_v55, %s3704_s17  ;;  %2679 = vrot.lane.b32.xlu0 %v3515_v44, %s3701_s12 }
 0x8a7   : > { %2641 = vrot.lane.b32.xlu1 %v3503_v43, %s3703_s14 }
 0x8aa   : > { %v5498_v27 = vpop.permute.xlu0 %2651 }
 0x8ae   : > { %2771 = vrot.lane.b32.xlu2 %v3503_v43, %s3698_s24  ;;  %2649 = vrot.lane.b32.xlu0 %v5458_v0, %s3703_s14 }
 0x8af   : > { %2627 = vrot.lane.b32.xlu1 %v5426_v55, %s3696_s22 }
 0x8b2   : > { %v5503_v20 = vpop.permute.xlu0 %2775 }
 0x8b6   : > { %2587 = vrot.lane.b32.xlu2 %v5458_v0, %s3695_s21  ;;  %2629 = vrot.lane.b32.xlu0 %v3515_v44, %s3696_s22 }
 0x8b7   : > { %2689 = vrot.lane.b32.xlu1 %v3503_v43, %s3704_s17 }
 0x8ba   : > { %v2694_v46 = vpop.permute.xlu0 %2693 }
 0x8be   : > { %2619 = vrot.lane.b32.xlu2 %v5458_v0, %s3697_s23  ;;  %2695 = vrot.lane.b32.xlu0 %v3515_v44, %s3704_s17 }
 0x8bf   : > { %2585 = vrot.lane.b32.xlu1 %v3515_v44, %s3695_s21 }
 0x8c6   : > { %2603 = vrot.lane.b32.xlu2 %v5458_v0, %s3700_s11 }
 0x8c7   : > { %2617 = vrot.lane.b32.xlu1 %v3515_v44, %s3697_s23 }
 0x8ce   : > { %2665 = vrot.lane.b32.xlu2 %v5458_v0, %s3702_s13 }
 0x8cf   : > { %2601 = vrot.lane.b32.xlu1 %v3515_v44, %s3700_s11 }
 0x8d6   : > { %2647 = vrot.lane.b32.xlu2 %v3515_v44, %s3703_s14 }
 0x8d7   : > { %2681 = vrot.lane.b32.xlu1 %v5458_v0, %s3701_s12 }
 0x8df   : > { %2663 = vrot.lane.b32.xlu1 %v3515_v44, %s3702_s13 }
 0x8e0   : > { %v5501_v26 = vpop.permute.xlu2 %2581 }
 0x8e7   : > { %2631 = vrot.lane.b32.xlu1 %v5458_v0, %s3696_s22 }
 0x8e8   : > { %v2614_v17 = vpop.permute.xlu2 %2613 }
 0x8ef   : > { %2697 = vrot.lane.b32.xlu1 %v5458_v0, %s3704_s17  ;;  %s3570_s17 = sshll.u32 %s5826_s16, 6 }
 0x8f0   : > { %v2674_v10 = vpop.permute.xlu2 %2673  ;;  %s5779_s6 = scalar_lea.vmem %s5820_s4, %s3570_s17 }
 0x8f1   : > { %2853 = vrot.lane.b32.xlu2 %v2674_v10, %s3698_s24 }
 0x8f7   : > { %2777 = vrot.lane.b32.xlu1 %v3515_v44, %s3698_s24 }
 0x8f8   : > { %v2596_v3 = vpop.permute.xlu0 %2595  ;;  %v5513_v25 = vpop.permute.xlu2 %2643 }
 0x8f9   : > { %v2580_v12 = vpop.permute.xlu1 %2579  ;;  %v2605_v60 = vsel %vm894_vm7, %v5463_v61, %v2596_v3 }
 0x8fa   : > { %v2589_v5 = vsel %vm311_vm0, %v5439_v14, %v2580_v12  ;;  %v2590_v1 = vsel %vm311_vm0, %v2580_v12, %v5501_v26 }
 0x900   : > { %v2676_v30 = vpop.permute.xlu0 %2675  ;;  %v5515_v6 = vpop.permute.xlu2 %2691 }
 0x901   : > { %v2612_v40 = vpop.permute.xlu1 %2611  ;;  %v5519_v24 = vsel %vm994_vm10, %v5515_v6, %v2694_v46  ;;  %v2685_v14 = vsel %vm977_vm8, %v2674_v10, %v2676_v30  ;;  %v2686_v61 = vsel %vm977_vm8, %v2676_v30, %v5479_v42 }
 0x902   : > { %v2622_v19 = vsel %vm396_vm2, %v2612_v40, %v2614_v17  ;;  %v2621_v53 = vsel %vm396_vm2, %v2610_v33, %v2612_v40 }
 0x903   : > { %2807 = vrot.lane.b32.xlu2 %v2622_v19, %s3698_s24 }
 0x908   : > { %v2658_v2 = vpop.permute.xlu0 %2657  ;;  %v5523_v15 = vpop.permute.xlu2 %2771 }
 0x909   : > { %v5525_v39 = vpop.permute.xlu1 %2597  ;;  %2841 = vrot.lane.b32.xlu1 %v2658_v2, %s3698_s24 }
 0x90a   : > { %v2606_v57 = vsel %vm894_vm7, %v2596_v3, %v5525_v39 }
 0x90b   : > { %2781 = vrot.lane.b32.xlu2 %v2589_v5, %s3698_s24 }
 0x910   : > { %v2626_v48 = vpop.permute.xlu0 %2625  ;;  %v2588_v37 = vpop.permute.xlu2 %2587 }
 0x911   : > { %v5531_v52 = vpop.permute.xlu1 %2659  ;;  %2817 = vrot.lane.b32.xlu1 %v2626_v48, %s3698_s24 }
 0x912   : > { %v2669_v54 = vsel %vm960_vm15, %v2658_v2, %v5531_v52 }
 0x913   : > { %2843 = vrot.lane.b32.xlu2 %v2669_v54, %s3698_s24 }
 0x918   : > { %v2620_v9 = vpop.permute.xlu2 %2619 }
 0x919   : > { %v2642_v35 = vpop.permute.xlu1 %2641  ;;  %2805 = vrot.lane.b32.xlu1 %v2621_v53, %s3698_s24 }
 0x91a   : > { %2829 = vrot.lane.b32.xlu0 %v2642_v35, %s3698_s24  ;;  %v2653_v45 = vsel %vm943_vm9, %v2642_v35, %v5513_v25 }
 0x920   : > { %v2604_v38 = vpop.permute.xlu2 %2603 }
 0x921   : > { %v5542_v43 = vpop.permute.xlu1 %2627  ;;  %2795 = vrot.lane.b32.xlu1 %v2606_v57, %s3698_s24 }
 0x922   : > { %v2633_v21 = vsel %vm425_vm1, %v2626_v48, %v5542_v43  ;;  %2809 = vrot.lane.b32.xlu0 %v2614_v17, %s3698_s24 }
 0x923   : > { %2819 = vrot.lane.b32.xlu2 %v2633_v21, %s3698_s24  ;;  %v3537_v21 = vld [vmem:[%s5818_s2 + $0x88] sm:$0xff] }
 0x928   : > { %v2666_v31 = vpop.permute.xlu2 %2665 }
 0x929   : > { %v5553_v13 = vpop.permute.xlu1 %2689  ;;  %2831 = vrot.lane.b32.xlu1 %v2653_v45, %s3698_s24  ;;  %v2672_v54 = vsel %vm960_vm15, %v2666_v31, %v5483_v11  ;;  %v2670_v11 = vsel %vm960_vm15, %v5531_v52, %v5491_v18 }
 0x92a   : > { %2793 = vrot.lane.b32.xlu0 %v2605_v60, %s3698_s24  ;;  %v3536_v60 = vld [vmem:[%s5818_s2 + $0x80] sm:$0xff] }
 0x930   : > { %v2648_v36 = vpop.permute.xlu2 %2647 }
 0x931   : > { %v2586_v63 = vpop.permute.xlu1 %2585  ;;  %2835 = vrot.lane.b32.xlu2 %v2648_v36, %s3698_s24 }
 0x932   : > { %2855 = vrot.lane.b32.xlu0 %v2685_v14, %s3698_s24  ;;  %v2592_v12 = vsel %vm311_vm0, %v2586_v63, %v2588_v37  ;;  %v2591_v30 = vsel %vm311_vm0, %v5448_v49, %v2586_v63 }
 0x939   : > { %v2618_v44 = vpop.permute.xlu1 %2617  ;;  %2815 = vrot.lane.b32.xlu2 %v2620_v9, %s3698_s24 }
 0x93a   : > { %v2623_v56 = vsel %vm396_vm2, %v5456_v28, %v2618_v44  ;;  %2783 = vrot.lane.b32.xlu0 %v2590_v1, %s3698_s24  ;;  %v2624_v41 = vsel %vm396_vm2, %v2618_v44, %v2620_v9  ;;  %v2680_v28 = vpop.permute.xlu0 %2679  ;;  %v2654_v9 = vsel %vm943_vm9, %v5513_v25, %v5486_v34  ;;  %v3539_v1 = vld [vmem:[%s5818_s2 + $0x98] sm:$0xff] }
 0x93b   : > { %2811 = vrot.lane.b32.xlu1 %v2623_v56, %s3698_s24 }
 0x941   : > { %v2602_v33 = vpop.permute.xlu1 %2601  ;;  %2813 = vrot.lane.b32.xlu2 %v2624_v41, %s3698_s24 }
 0x942   : > { %v2607_v17 = vsel %vm894_vm7, %v5473_v16, %v2602_v33  ;;  %2857 = vrot.lane.b32.xlu0 %v2686_v61, %s3698_s24  ;;  %v2608_v46 = vsel %vm894_vm7, %v2602_v33, %v2604_v38  ;;  %v2650_v42 = vpop.permute.xlu0 %2649 }
 0x943   : > { %2799 = vrot.lane.b32.xlu1 %v2607_v17, %s3698_s24  ;;  %v2655_v49 = vsel %vm943_vm9, %v2648_v36, %v2650_v42  ;;  %v2656_v57 = vsel %vm943_vm9, %v2650_v42, %v5498_v27 }
 0x949   : > { %v2682_v10 = vpop.permute.xlu1 %2681  ;;  %2801 = vrot.lane.b32.xlu2 %v2608_v46, %s3698_s24 }
 0x94a   : > { %v2687_v3 = vsel %vm977_vm8, %v2680_v28, %v2682_v10  ;;  %2859 = vrot.lane.b32.xlu0 %v2680_v28, %s3698_s24  ;;  %v2630_v40 = vpop.permute.xlu0 %2629  ;;  %v2688_v5 = vsel %vm977_vm8, %v2682_v10, %v5471_v50 }
 0x94b   : > { %2861 = vrot.lane.b32.xlu1 %v2687_v3, %s3698_s24  ;;  %v5590_v2 = vpop.permute.xlu2 %2853 }
 0x951   : > { %v2664_v16 = vpop.permute.xlu1 %2663  ;;  %2789 = vrot.lane.b32.xlu2 %v2592_v12, %s3698_s24 }
 0x952   : > { %2847 = vrot.lane.b32.xlu0 %v2664_v16, %s3698_s24  ;;  %v2671_v19 = vsel %vm960_vm15, %v2664_v16, %v2666_v31  ;;  %v3538_v31 = vld [vmem:[%s5818_s2 + $0x90] sm:$0xff] }
 0x953   : > { %2787 = vrot.lane.b32.xlu1 %v2591_v30, %s3698_s24 }
 0x959   : > { %2791 = vrot.lane.b32.xlu2 %v2588_v37, %s3698_s24  ;;  %v2632_v48 = vpop.permute.xlu1 %2631 }
 0x95a   : > { %2823 = vrot.lane.b32.xlu0 %v2630_v40, %s3698_s24  ;;  %v2634_v53 = vsel %vm425_vm1, %v2630_v40, %v2632_v48 }
 0x95b   : > { %2849 = vrot.lane.b32.xlu1 %v2671_v19, %s3698_s24 }
 0x95d   : > { %v2808_v37 = vpop.permute.xlu2 %2807 }
 0x961   : > { %2863 = vrot.lane.b32.xlu2 %v2688_v5, %s3698_s24  ;;  %v2698_v50 = vpop.permute.xlu1 %2697 }
 0x962   : > { %2837 = vrot.lane.b32.xlu0 %v2655_v49, %s3698_s24  ;;  %v2704_v52 = vsel %vm994_vm10, %v2698_v50, %v5494_v4 }
 0x963   : > { %2803 = vrot.lane.b32.xlu1 %v2604_v38, %s3698_s24 }
 0x965   : > { %v5608_v35 = vpop.permute.xlu2 %2781 }
 0x969   : > { %2851 = vrot.lane.b32.xlu2 %v2672_v54, %s3698_s24 }
 0x96a   : > { %2797 = vrot.lane.b32.xlu0 %v5525_v39, %s3698_s24  ;;  %v5617_v39 = vpop.permute.xlu1 %2777 }
 0x96b   : > { %2825 = vrot.lane.b32.xlu1 %v2634_v53, %s3698_s24 }
 0x96d   : > { %v5624_v34 = vpop.permute.xlu2 %2843 }
 0x971   : > { %2833 = vrot.lane.b32.xlu2 %v2654_v9, %s3698_s24  ;;  %v2879_v9 = vsel %vm598_vm3, %v5503_v20, %v5617_v39 }
 0x972   : > { %2779 = vrot.lane.b32.xlu0 %v5458_v0, %s3698_s24  ;;  %v2696_v0 = vpop.permute.xlu0 %2695 }
 0x973   : > { %2845 = vrot.lane.b32.xlu1 %v2670_v11, %s3698_s24  ;;  %v2703_v25 = vsel %vm994_vm10, %v2696_v0, %v2698_v50  ;;  %v3542_v11 = vld [vmem:[%s5817_s1 + $0xc0] sm:$0xf] }
 0x979   : > { %2773 = vrot.lane.b32.xlu2 %v5426_v55, %s3698_s24 }
 0x97a   : > { %2839 = vrot.lane.b32.xlu0 %v2656_v57, %s3698_s24  ;;  %v3652_v57 = vld [vmem:[%s5817_s1 + $0xc8] sm:$0xf0] }
 0x97b   : > { %2785 = vrot.lane.b32.xlu1 %v5501_v26, %s3698_s24  ;;  %v5628_v18 = vpop.permute.xlu1 %2841  ;;  %v2701_v26 = vsel %vm994_vm10, %v5553_v13, %v5515_v6 }
 0x97c   : > { %v2901_v20 = vsel %vm598_vm3, %v5628_v18, %v5624_v34 }
 0x97d   : > { %v5634_v27 = vpop.permute.xlu2 %2819 }
 0x981   : > { %2873 = vrot.lane.b32.xlu2 %v2703_v25, %s3698_s24  ;;  %v5703_v25 = vor.u32 %v3652_v57, %v3542_v11 }
 0x982   : > { %2821 = vrot.lane.b32.xlu0 %v5542_v43, %s3698_s24 }
 0x983   : > { %2827 = vrot.lane.b32.xlu1 %v2632_v48, %s3698_s24  ;;  %v5637_v55 = vpop.permute.xlu1 %2817 }
 0x989   : > { %2867 = vrot.lane.b32.xlu2 %v2701_v26, %s3698_s24 }
 0x98a   : > { %2875 = vrot.lane.b32.xlu0 %v2704_v52, %s3698_s24 }
 0x98b   : > { %2871 = vrot.lane.b32.xlu1 %v2696_v0, %s3698_s24  ;;  %v5647_v38 = vpop.permute.xlu2 %2835  ;;  %v2806_v45 = vpop.permute.xlu1 %2805  ;;  %v2877_v0 = vsel %vm598_vm3, %v5509_v62, %v5523_v15 }
 0x98c   : > { %v5649_v43 = vpop.permute.xlu0 %2829  ;;  %v2889_v28 = vsel %vm598_vm3, %v2806_v45, %v2808_v37 }
 0x991   : > { %2726 = vperm.xlu2 %3685, %v3537_v21  }
 0x992   : > { %2869 = vrot.lane.b32.xlu0 %v5519_v24, %s3698_s24 }
 0x993   : > { %2865 = vrot.lane.b32.xlu1 %v5553_v13, %s3698_s24  ;;  %v2816_v4 = vpop.permute.xlu2 %2815  ;;  %v5664_v36 = vpop.permute.xlu1 %2795 }
 0x994   : > { %v2810_v6 = vpop.permute.xlu0 %2809 }
 0x995   : > { %v2890_v13 = vsel %vm598_vm3, %v2808_v37, %v2810_v6 }
 0x99a   : > { %2731 = vperm.xlu0 %3686, %v3538_v31  }
 0x99b   : > { %2721 = vperm.xlu1 %3684, %v3536_v60   ;;  %v2814_v14 = vpop.permute.xlu2 %2813  ;;  %v5671_v56 = vpop.permute.xlu1 %2831 }
 0x99c   : > { %v2794_v63 = vpop.permute.xlu0 %2793  ;;  %v2892_v24 = vsel %vm598_vm3, %v2814_v14, %v2816_v4  ;;  %v2897_v6 = vsel %vm598_vm3, %v5649_v43, %v5671_v56  ;;  %v3655_v43 = vld [vmem:[%s5817_s1 + $0xe0] sm:$0xf0] }
 0x99d   : > { %3012 = vmatpush.bf16.msra.mxu3 %v2892_v24  ;;  %v2885_v42 = vsel %vm598_vm3, %v2794_v63, %v5664_v36  ;;  %v3554_v24 = vld [vmem:[%s5817_s1 + $0xd8] sm:$0xf] }
 0x9a1   : > { %3013 = vmatpush.bf16.msra.mxu3 %v2890_v13  ;;  %v3651_v13 = vld [vmem:[%s5817_s1 + $0xc4] sm:$0xf] }
 0x9a3   : > { %2736 = vperm.xlu1 %3684, %v3539_v1   ;;  %v2802_v17 = vpop.permute.xlu2 %2801 }
 0x9a4   : > { %v2856_v44 = vpop.permute.xlu0 %2855 }
 0x9a5   : > { %v2905_v19 = vsel %vm598_vm3, %v5590_v2, %v2856_v44 }
 0x9ab   : > { %v2790_v12 = vpop.permute.xlu2 %2789 }
 0x9ac   : > { %v5673_v41 = vpop.permute.xlu0 %2783 }
 0x9ad   : > { %v2812_v61 = vpop.permute.xlu1 %2811  ;;  %v2881_v54 = vsel %vm598_vm3, %v5608_v35, %v5673_v41 }
 0x9ae   : > { %v2891_v33 = vsel %vm598_vm3, %v2812_v61, %v2814_v14  ;;  %v3555_v61 = vor.u32 %v3655_v43, %v3554_v24 }
 0x9af   : > { %2955 = vmatpush.bf16.msra.mxu2 %v2891_v33 }
 0x9b3   : > { %2956 = vmatpush.bf16.msra.mxu2 %v2889_v28  ;;  %v2792_v48 = vpop.permute.xlu2 %2791 }
 0x9b4   : > { %v2858_v46 = vpop.permute.xlu0 %2857  ;;  %v2884_v1 = vsel %vm598_vm3, %v2790_v12, %v2792_v48 }
 0x9b5   : > { %v2800_v10 = vpop.permute.xlu1 %2799  ;;  %v2906_v18 = vsel %vm598_vm3, %v2856_v44, %v2858_v46  ;;  %v2893_v44 = vsel %vm598_vm3, %v5637_v55, %v5634_v27 }
 0x9b6   : > { %v2887_v3 = vsel %vm598_vm3, %v2800_v10, %v2802_v17 }
 0x9b7   : > { %2957 = vmatpush.bf16.msra.mxu2 %v2887_v3 }
 0x9bb   : > { %2958 = vmatpush.bf16.msra.mxu2 %v2885_v42  ;;  %v2864_v35 = vpop.permute.xlu2 %2863 }
 0x9bc   : > { %v2860_v16 = vpop.permute.xlu0 %2859 }
 0x9bd   : > { %v2862_v30 = vpop.permute.xlu1 %2861 }
 0x9be   : > { %v2907_v40 = vsel %vm598_vm3, %v2860_v16, %v2862_v30  ;;  %v2908_v26 = vsel %vm598_vm3, %v2862_v30, %v2864_v35  ;;  %v3654_v16 = vld [vmem:[%s5817_s1 + $0xdc] sm:$0xf]  ;;  %v3556_v30 = vld [vmem:[%s5817_s1 + $0xe4] sm:$0xf0] }
 0x9bf   : > { %2974 = vmatpush.bf16.msra.mxu0 %v2907_v40 }
 0x9c3   : > { %2975 = vmatpush.bf16.msra.mxu0 %v2905_v19  ;;  %v2852_v4 = vpop.permute.xlu2 %2851 }
 0x9c4   : > { %v2848_v5 = vpop.permute.xlu0 %2847 }
 0x9c5   : > { %v2788_v49 = vpop.permute.xlu1 %2787 }
 0x9c6   : > { %v2883_v37 = vsel %vm598_vm3, %v2788_v49, %v2790_v12 }
 0x9c7   : > { %2959 = vmatpush.bf16.msra.mxu2 %v2883_v37 }
 0x9cb   : > { %2960 = vmatpush.bf16.msra.mxu2 %v2881_v54  ;;  %v2834_v46 = vpop.permute.xlu2 %2833 }
 0x9cc   : > { %v2824_v53 = vpop.permute.xlu0 %2823 }
 0x9cd   : > { %v2850_v50 = vpop.permute.xlu1 %2849 }
 0x9ce   : > { %v2903_v2 = vsel %vm598_vm3, %v2848_v5, %v2850_v50  ;;  %v2904_v31 = vsel %vm598_vm3, %v2850_v50, %v2852_v4  ;;  %v3559_v5 = vor.u32 %v3654_v16, %v3556_v30 }
 0x9cf   : > { %2961 = vmatpush.bf16.msra.mxu2 %v2879_v9  ;;  %2976 = vmatpush.bf16.msra.mxu0 %v2903_v2  ;;  %v3653_v2 = vld [vmem:[%s5817_s1 + $0xd0] sm:$0xf0] }
 0x9d3   : > { %2962 = vmatpush.bf16.msra.mxu2 %v2877_v0  ;;  %2977 = vmatpush.bf16.msra.mxu0 %v2901_v20  ;;  %v2774_v40 = vpop.permute.xlu2 %2773 }
 0x9d4   : > { %v2838_v52 = vpop.permute.xlu0 %2837  ;;  %v2878_v48 = vsel %vm598_vm3, %v5523_v15, %v2774_v40  ;;  %v3550_v15 = vld [vmem:[%s5817_s1 + $0xc8] sm:$0xf] }
 0x9d5   : > { %v2804_v21 = vpop.permute.xlu1 %2803  ;;  %v2899_v45 = vsel %vm598_vm3, %v5647_v38, %v2838_v52  ;;  %v3551_v0 = vor.u32 %v3653_v2, %v3550_v15 }
 0x9d6   : > { %2963 = vmatmul.bf16.vlgmr.msra.gmra.mxu2 %v5703_v25  ;;  %v2888_v62 = vsel %vm598_vm3, %v2802_v17, %v2804_v21 }
 0x9d7   : > { %3031 = vmatpush.bf16.msrb.mxu2 %v2908_v26  ;;  %2978 = vmatpush.bf16.msra.mxu0 %v2899_v45  ;;  %v3656_v26 = vld [vmem:[%s5817_s1 + $0xe8] sm:$0xf0] }
 0x9d8   : > { %3014 = vmatpush.bf16.msra.mxu3 %v2888_v62 }
 0x9db   : > { %3032 = vmatpush.bf16.msrb.mxu2 %v2906_v18  ;;  %2979 = vmatpush.bf16.msra.mxu0 %v2897_v6  ;;  %v2874_v54 = vpop.permute.xlu2 %2873 }
 0x9dc   : > { %v2798_v60 = vpop.permute.xlu0 %2797 }
 0x9dd   : > { %v2826_v38 = vpop.permute.xlu1 %2825  ;;  %v2886_v14 = vsel %vm598_vm3, %v5664_v36, %v2798_v60  ;;  %v3544_v36 = vld [vmem:[%s5817_s1 + $0xcc] sm:$0xf0] }
 0x9de   : > { %3015 = vmatpush.bf16.msra.mxu3 %v2886_v14  ;;  %v2895_v63 = vsel %vm598_vm3, %v2824_v53, %v2826_v38  ;;  %v3547_v33 = vor.u32 %v3651_v13, %v3544_v36 }
 0x9df   : > { %3033 = vmatpush.bf16.msrb.mxu2 %v2904_v31  ;;  %2980 = vmatpush.bf16.msra.mxu0 %v2895_v63 }
 0x9e2   : > { %3016 = vmatpush.bf16.msra.mxu3 %v2884_v1 }
 0x9e3   : > { %2981 = vmatpush.bf16.msra.mxu0 %v2893_v44  ;;  %v2868_v11 = vpop.permute.xlu2 %2867 }
 0x9e4   : > { %v2780_v17 = vpop.permute.xlu0 %2779 }
 0x9e5   : > { %v2846_v28 = vpop.permute.xlu1 %2845  ;;  %v2880_v19 = vsel %vm598_vm3, %v5617_v39, %v2780_v17 }
 0x9e6   : > { %2968 = vmatmul.bf16.gmra.mxu2 %v3555_v61  ;;  %2982 = vmatmul.bf16.vlgmr.msra.gmra.mxu0 %v3547_v33  ;;  %v2902_v10 = vsel %vm598_vm3, %v5624_v34, %v2846_v28  ;;  %v2898_v34 = vsel %vm598_vm3, %v5671_v56, %v2834_v46 }
 0x9e7   : > { %3034 = vmatpush.bf16.msrb.mxu2 %v2902_v10 }
 0x9eb   : > { %v2727_v10 = vpop.permute.xlu2 %2726 }
 0x9ec   : > { %v2840_v3 = vpop.permute.xlu0 %2839 }
 0x9ed   : > { %v2786_v42 = vpop.permute.xlu1 %2785  ;;  %v2900_v12 = vsel %vm598_vm3, %v2838_v52, %v2840_v3 }
 0x9ee   : > { %3035 = vmatpush.bf16.msrb.mxu2 %v2900_v12  ;;  %v2882_v55 = vsel %vm598_vm3, %v5673_v41, %v2786_v42 }
 0x9ef   : > { %3017 = vmatpush.bf16.msra.mxu3 %v2882_v55 }
 0x9f2   : > { %3036 = vmatpush.bf16.msrb.mxu2 %v2898_v34 }
 0x9f3   : > { %3018 = vmatpush.bf16.msra.mxu3 %v2880_v19 }
 0x9f4   : > { %v2822_v41 = vpop.permute.xlu0 %2821 }
 0x9f5   : > { %v2828_v49 = vpop.permute.xlu1 %2827  ;;  %v2894_v56 = vsel %vm598_vm3, %v5634_v27, %v2822_v41 }
 0x9f6   : > { %2987 = vmatmul.bf16.gmra.mxu0 %v3559_v5  ;;  %v2896_v37 = vsel %vm598_vm3, %v2826_v38, %v2828_v49 }
 0x9f7   : > { %3019 = vmatpush.bf16.msra.mxu3 %v2878_v48  ;;  %3037 = vmatpush.bf16.msrb.mxu2 %v2896_v37 }
 0x9fa   : > { %3020 = vmatmul.bf16.vlgmr.msra.gmra.mxu3 %v5703_v25  ;;  %v3562_v25 = vld [vmem:[%s5817_s1 + $0xe0] sm:$0xf] }
 0x9fb   : > { %3038 = vmatpush.bf16.msrb.mxu2 %v2894_v56  ;;  %v3563_v52 = vor.u32 %v3656_v26, %v3562_v25 }
 0x9fc   : > { %v2876_v39 = vpop.permute.xlu0 %2875 }
 0x9fd   : > { %v2912_v53 = vsel %vm598_vm3, %v2874_v54, %v2876_v39  ;;  %v2872_v50 = vpop.permute.xlu1 %2871 }
 0x9fe   : > { %v2911_v9 = vsel %vm598_vm3, %v2872_v50, %v2874_v54  ;;  %3039 = vmatmul.bf16.vlgmr.msrb.gmra.mxu2 %v3547_v33  ;;  %3056 = vmatpush.bf16.msrb.mxu0 %v2912_v53 }
 0x9ff   : > { %2999 = vmatpush.bf16.msrb.mxu1 %v2911_v9 }
 0xa04   : > { %v2870_v27 = vpop.permute.xlu0 %2869 }
 0xa05   : > { %v2866_v57 = vpop.permute.xlu1 %2865  ;;  %v2910_v35 = vsel %vm598_vm3, %v2868_v11, %v2870_v27 }
 0xa06   : > { %3057 = vmatpush.bf16.msrb.mxu0 %v2910_v35  ;;  %v2909_v20 = vsel %vm598_vm3, %v2866_v57, %v2868_v11 }
 0xa07   : > { %3000 = vmatpush.bf16.msrb.mxu1 %v2909_v20 }
 0xa09   : > { %3566 = vmatmul.msk.bf16.vlgmr.msrb.gmra.mxu0 %vm671_vm4, %v3551_v0 }
 0xa0a   : > { %3564 = vmatmul.msk.bf16.vlgmr.msrb.gmra.mxu1 %vm671_vm4, %v3551_v0  ;;  %3025 = vmatmul.bf16.gmra.mxu3 %v3555_v61 }
 0xa0c   : > { %v2732_v37 = vpop.permute.xlu0 %2731 }
 0xa0d   : > { %v2722_v63 = vpop.permute.xlu1 %2721 }
 0xa0e   : > { %3044 = vmatmul.bf16.gmra.mxu2 %v3559_v5 }
 0xa15   : > { %v2737_v35 = vpop.permute.xlu1 %2736 }
 0xa19   : > { %3567 = vmatmul.msk.bf16.gmra.mxu0 %vm671_vm4, %v3563_v52 }
 0xa1a   : > { %3565 = vmatmul.msk.bf16.gmra.mxu1 %vm671_vm4, %v3563_v52 }
 0xa59   : > { %v2964_v21 = vpop.f32.mrf.mxu2 }
 0xa5a   : > { %v2965_v43 = vadd.f32 %v2964_v21, %v2722_v63 }
 0xa61   : > { %v2966_v62 = vpop.f32.mrf.mxu2 }
 0xa62   : > { %v2967_v16 = vadd.f32 %v2966_v62, %v2727_v10 }
 0xa63   : > { %v2983_v45 = vpop.f32.mrf.mxu0 }
 0xa64   : > { %v2984_v1 = vadd.f32 %v2983_v45, %v2965_v43 }
 0xa69   : > { %v2969_v4 = vpop.f32.mrf.mxu2 }
 0xa6a   : > { %v2970_v53 = vadd.f32 %v2969_v4, %v2732_v37 }
 0xa6b   : > { %v2985_v18 = vpop.f32.mrf.mxu0 }
 0xa6c   : > { %v2986_v40 = vadd.f32 %v2985_v18, %v2967_v16 }
 0xa71   : > { %v2971_v31 = vpop.f32.mrf.mxu2 }
 0xa72   : > { %v2972_v52 = vadd.f32 %v2971_v31, %v2737_v35 }
 0xa73   : > { %v2988_v6 = vpop.f32.mrf.mxu0 }
 0xa74   : > { %v2989_v9 = vadd.f32 %v2988_v6, %v2970_v53 }
 0xa7b   : > { %v2990_v38 = vpop.f32.mrf.mxu0 }
 0xa7c   : > { %v2991_v45 = vadd.f32 %v2990_v38, %v2972_v52 }
 0xa7d   : > { %v3021_v60 = vpop.f32.mrf.mxu3 }
 0xa7e   : > { %v3022_v24 = vadd.f32 %v3021_v60, %v2722_v63 }
 0xa81   : > { %v3040_v14 = vpop.f32.mrf.mxu2 }
 0xa82   : > { %v3041_v13 = vadd.f32 %v3040_v14, %v3022_v24 }
 0xa85   : > { %v3023_v36 = vpop.f32.mrf.mxu3 }
 0xa86   : > { %v3059_v44 = vpop.f32.mrf.mxu0  ;;  %v3024_v12 = vadd.f32 %v3023_v36, %v2727_v10 }
 0xa87   : > { %v3060_v61 = vadd.f32 %v3059_v44, %v3041_v13  ;;  %v3002_v33 = vpop.f32.mrf.mxu1 }
 0xa88   : > { %v3003_v17 = vadd.f32 %v3002_v33, %v2984_v1 }
 0xa89   : > { %v3070_v28 = vsel %vm4105_vm6, %v3060_v61, 0.0  ;;  %v3042_v46 = vpop.f32.mrf.mxu2 }
 0xa8a   : > { %v3078_v3 = vadd.f32 %v3070_v28, %v4951_v23  ;;  %v3069_v42 = vsel %vm4097_vm5, %v3003_v17, 0.0  ;;  %v3043_v30 = vadd.f32 %v3042_v46, %v3024_v12 }
 0xa8b   : > { %v3077_v55 = vadd.f32 %v3069_v42, %v4946_v29 }
 0xa8c   : > { %3086 = vst [vmem:[%s5779_s6 + $0x8] sm:$0xff] %v3078_v3 }
 0xa8d   : > { %3085 = vst [vmem:[%s5779_s6] sm:$0xff] %v3077_v55  ;;  %v3026_v34 = vpop.f32.mrf.mxu3 }
 0xa8e   : > { %v3061_v19 = vpop.f32.mrf.mxu0  ;;  %v3027_v56 = vadd.f32 %v3026_v34, %v2732_v37 }
 0xa8f   : > { %v3062_v5 = vadd.f32 %v3061_v19, %v3043_v30  ;;  %v3004_v41 = vpop.f32.mrf.mxu1 }
 0xa90   : > { %v3005_v49 = vadd.f32 %v3004_v41, %v2986_v40 }
 0xa91   : > { %v3072_v23 = vsel %vm4105_vm6, %v3062_v5, 0.0  ;;  %v3045_v48 = vpop.f32.mrf.mxu2 }
 0xa92   : > { %v3080_v54 = vadd.f32 %v3072_v23, %v4967_v58  ;;  %v3071_v29 = vsel %vm4097_vm5, %v3005_v49, 0.0  ;;  %v3046_v50 = vadd.f32 %v3045_v48, %v3027_v56 }
 0xa93   : > { %v3079_v39 = vadd.f32 %v3071_v29, %v4962_v59 }
 0xa94   : > { %3088 = vst [vmem:[%s5779_s6 + $0x18] sm:$0xff] %v3080_v54 }
 0xa95   : > { %3087 = vst [vmem:[%s5779_s6 + $0x10] sm:$0xff] %v3079_v39  ;;  %v3028_v27 = vpop.f32.mrf.mxu3 }
 0xa96   : > { %v3064_v15 = vpop.f32.mrf.mxu0  ;;  %v3029_v25 = vadd.f32 %v3028_v27, %v2737_v35 }
 0xa97   : > { %v3065_v2 = vadd.f32 %v3064_v15, %v3046_v50  ;;  %v3007_v11 = vpop.f32.mrf.mxu1 }
 0xa98   : > { %v3008_v57 = vadd.f32 %v3007_v11, %v2989_v9 }
 0xa99   : > { %v3074_v58 = vsel %vm4105_vm6, %v3065_v2, 0.0  ;;  %v3047_v20 = vpop.f32.mrf.mxu2 }
 0xa9a   : > { %v3082_v0 = vadd.f32 %v3074_v58, %v4984_v32  ;;  %v3073_v59 = vsel %vm4097_vm5, %v3008_v57, 0.0  ;;  %v3048_v21 = vadd.f32 %v3047_v20, %v3029_v25 }
 0xa9b   : > { %v3081_v26 = vadd.f32 %v3073_v59, %v4979_v47 }
 0xa9c   : > { %3090 = vst [vmem:[%s5779_s6 + $0x28] sm:$0xff] %v3082_v0 }
 0xa9d   : > { %3089 = vst [vmem:[%s5779_s6 + $0x20] sm:$0xff] %v3081_v26 }
 0xa9e   : > { %v3066_v62 = vpop.f32.mrf.mxu0 }
 0xa9f   : > { %v3067_v18 = vadd.f32 %v3066_v62, %v3048_v21  ;;  %v3009_v4 = vpop.f32.mrf.mxu1 }
 0xaa0   : > { %v3010_v6 = vadd.f32 %v3009_v4, %v2991_v45 }
 0xaa1   : > { %v3076_v32 = vsel %vm4105_vm6, %v3067_v18, 0.0 }
 0xaa2   : > { %v3084_v60 = vadd.f32 %v3076_v32, %v5003_v8  ;;  %v3075_v14 = vsel %vm4097_vm5, %v3010_v6, 0.0 }
 0xaa3   : > { %v3083_v63 = vadd.f32 %v3075_v14, %v4996_v51 }
 0xaa4   : > { %3092 = vst [vmem:[%s5779_s6 + $0x38] sm:$0xff] %v3084_v60 }
 0xaa5   : > { %3091 = vst [vmem:[%s5779_s6 + $0x30] sm:$0xff] %v3083_v63 }
 0xaa6 PF: > { %s14_s15 = sadd.s32 1, %s3693_s15  }
 0xaa7   : > { %p11_p4 = scmp.ge.s32.totalorder %s14_s15, 4  }
 0xaa9   :  { %13 = sbr.rel (!%p11_p4) target bundleno = 1 (0x1), region = 74 }

</bundles_post_ra>
